<compile_context>
chip_gen: v6e
topology: v6e:2x2x1
jax: 0.10.0
libtpu: 0.0.40
codegen_flags: <defaults>
</compile_context>

<pallas_src>
import math

import jax
import jax.numpy as jnp
from jax.experimental import pallas as pl
from jax.experimental.pallas import tpu as pltpu

NEG_SLOPE = 0.01
IN_EPS = 1e-5


# ---------------------------------------------------------------------------
# Fused Pallas kernel:
#   out = act?( IN?( sum_j W_j @ A_j + bias? ) + residual? )
# computed per sample (grid over N), spatial axis in lanes.
# ---------------------------------------------------------------------------
def _make_fused_kernel(n_ops, has_bias, has_norm, has_res, act):
    def kernel(*refs):
        i = 0
        acc = None
        for _ in range(n_ops):
            a = refs[i][0]                       # (K_j, S)    bf16
            w = refs[i + 1][...]                 # (Cout, K_j) bf16
            d = jnp.dot(w, a, preferred_element_type=jnp.float32)
            acc = d if acc is None else acc + d
            i += 2
        if has_bias:
            acc = acc + refs[i][...]             # (Cout, 1) f32
            i += 1
        if has_norm:
            g = refs[i][...]                     # (Cout, 1)
            b = refs[i + 1][...]                 # (Cout, 1)
            i += 2
            mean = jnp.mean(acc, axis=1, keepdims=True)
            var = jnp.mean((acc - mean) ** 2, axis=1, keepdims=True)
            acc = (acc - mean) * jax.lax.rsqrt(var + IN_EPS) * g + b
        if has_res:
            acc = acc + refs[i][0]               # (Cout, S) f32
            i += 1
        if act:
            acc = jnp.where(acc > 0, acc, NEG_SLOPE * acc)
        refs[i][0] = acc                         # out block (1, Cout, S)

    return kernel


def fused_conv(ops, bias=None, norm=None, act=False, residual=None):
    """ops: list of (A, W) with A: (N, K_j, S), W: (Cout, K_j).
    Returns (N, Cout, S) float32."""
    N, _, S = ops[0][0].shape
    Cout = ops[0][1].shape[0]

    in_arrays = []
    in_specs = []
    for a, w in ops:
        K = w.shape[1]
        in_arrays.append(a.astype(jnp.bfloat16))
        in_specs.append(pl.BlockSpec((1, K, S), lambda n: (n, 0, 0)))
        in_arrays.append(w.astype(jnp.bfloat16))
        in_specs.append(pl.BlockSpec((Cout, K), lambda n: (0, 0)))
    if bias is not None:
        in_arrays.append(bias.reshape(Cout, 1).astype(jnp.float32))
        in_specs.append(pl.BlockSpec((Cout, 1), lambda n: (0, 0)))
    if norm is not None:
        g, b = norm
        in_arrays.append(g.reshape(Cout, 1).astype(jnp.float32))
        in_specs.append(pl.BlockSpec((Cout, 1), lambda n: (0, 0)))
        in_arrays.append(b.reshape(Cout, 1).astype(jnp.float32))
        in_specs.append(pl.BlockSpec((Cout, 1), lambda n: (0, 0)))
    if residual is not None:
        in_arrays.append(residual.astype(jnp.float32))
        in_specs.append(pl.BlockSpec((1, Cout, S), lambda n: (n, 0, 0)))

    kernel = _make_fused_kernel(
        len(ops), bias is not None, norm is not None, residual is not None, act
    )
    return pl.pallas_call(
        kernel,
        out_shape=jax.ShapeDtypeStruct((N, Cout, S), jnp.float32),
        grid=(N,),
        in_specs=in_specs,
        out_specs=pl.BlockSpec((1, Cout, S), lambda n: (n, 0, 0)),
        compiler_params=pltpu.CompilerParams(dimension_semantics=("parallel",)),
    )(*in_arrays)


# ---------------------------------------------------------------------------
# XLA-side glue: im2col patch extraction (channel-major K, spatial-major S)
# ---------------------------------------------------------------------------
def conv_out_size(d, k, stride):
    p = (k - stride + 1) // 2
    return (d + 2 * p - k) // stride + 1


def im2col(x, k, stride):
    """x: (N,C,D,H,W) -> (N, C*k^3, oD*oH*oW).  MONAI padding = (k-s+1)//2."""
    N, C, D, H, W = x.shape
    if k == 1:
        if stride > 1:
            x = x[:, :, ::stride, ::stride, ::stride]
        return x.reshape(N, C, -1)
    p = (k - stride + 1) // 2
    oD = (D + 2 * p - k) // stride + 1
    oH = (H + 2 * p - k) // stride + 1
    oW = (W + 2 * p - k) // stride + 1
    xp = jnp.pad(x, ((0, 0), (0, 0), (p, p), (p, p), (p, p)))
    cols = []
    for kd in range(k):
        for kh in range(k):
            for kw in range(k):
                cols.append(
                    xp[:, :,
                       kd:kd + stride * (oD - 1) + 1:stride,
                       kh:kh + stride * (oH - 1) + 1:stride,
                       kw:kw + stride * (oW - 1) + 1:stride]
                )
    patches = jnp.stack(cols, axis=2)          # (N, C, k^3, oD, oH, oW)
    return patches.reshape(N, C * k ** 3, oD * oH * oW)


# ---------------------------------------------------------------------------
# Blocks (MONAI DynUNet semantics; gating disabled)
# ---------------------------------------------------------------------------
def res_block(x, p, stride):
    N, _, D, H, W = x.shape
    Cout = p["w1"].shape[0]
    oD = conv_out_size(D, 3, stride)
    oH = conv_out_size(H, 3, stride)
    oW = conv_out_size(W, 3, stride)

    # conv1 (k=3, stride) + IN + LeakyReLU   — one fused call
    h = fused_conv([(im2col(x, 3, stride), p["w1"].reshape(Cout, -1))],
                   norm=(p["g1"], p["b1"]), act=True)
    h5 = h.reshape(N, Cout, oD, oH, oW)

    # residual branch: 1x1 conv (stride) + IN — one fused call
    res = fused_conv([(im2col(x, 1, stride), p["w3"].reshape(Cout, -1))],
                     norm=(p["g3"], p["b3"]), act=False)

    # conv2 (k=3, s=1) + IN + residual add + LeakyReLU — one fused call
    out = fused_conv([(im2col(h5, 3, 1), p["w2"].reshape(Cout, -1))],
                     norm=(p["g2"], p["b2"]), act=True, residual=res)
    return out.reshape(N, Cout, oD, oH, oW)


def up_block(x, skip, p):
    N, Cin, D, H, W = x.shape
    Cout = p["w2"].shape[0]
    k = 2

    # transposed conv (k == s == 2, no bias): plain matmul + interleave glue
    a = x.reshape(N, Cin, D * H * W)
    bT = p["wt"].reshape(Cin, Cout * k ** 3).T        # (Cout*8, Cin)
    y = fused_conv([(a, bT)])                         # (N, Cout*8, D*H*W)
    y = y.reshape(N, Cout, k, k, k, D, H, W)
    y = y.transpose(0, 1, 5, 2, 6, 3, 7, 4)           # (N,Cout,D,kd,H,kh,W,kw)
    up = y.reshape(N, Cout, D * k, H * k, W * k)

    # conv1 on cat([up, skip]) WITHOUT materializing the concat:
    # split w1 along input channels, accumulate two matmuls in the kernel.
    w_up = p["w1"][:, :Cout].reshape(Cout, -1)
    w_sk = p["w1"][:, Cout:].reshape(Cout, -1)
    h = fused_conv([(im2col(up, 3, 1), w_up), (im2col(skip, 3, 1), w_sk)],
                   norm=(p["g1"], p["b1"]), act=True)
    h5 = h.reshape(N, Cout, D * k, H * k, W * k)

    # conv2 + IN + LeakyReLU
    out = fused_conv([(im2col(h5, 3, 1), p["w2"].reshape(Cout, -1))],
                     norm=(p["g2"], p["b2"]), act=True)
    return out.reshape(N, Cout, D * k, H * k, W * k)


def out_block(x, p):
    N, Cin, D, H, W = x.shape
    Cout = p["w"].shape[0]
    y = fused_conv([(x.reshape(N, Cin, D * H * W), p["w"].reshape(Cout, Cin))],
                   bias=p["b"])
    return y.reshape(N, Cout, D, H, W)


def gate_dyn_unet_forward(x, params):
    # GateDynUNet.forward: stack the three anatomical views along the batch dim.
    zy = x
    xz = jnp.swapaxes(x, 2, 3)
    xy = jnp.swapaxes(x, 2, 4)
    inp = jnp.concatenate([zy, xz, xy], axis=0)

    d0 = res_block(inp, params["input_block"], stride=1)   # 1  -> 8,  8^3
    d1 = res_block(d0, params["down0"], stride=2)          # 8  -> 16, 4^3
    bn = res_block(d1, params["bottleneck"], stride=2)     # 16 -> 32, 2^3
    u1 = up_block(bn, d1, params["up1"])                   # 32 -> 16, 4^3
    u0 = up_block(u1, d0, params["up0"])                   # 16 -> 8,  8^3
    return out_block(u0, params["output"])                 # 8  -> 2,  8^3


# ---------------------------------------------------------------------------
# Deterministic parameter init (kaiming_normal_(a=0.01), IN affine=1/0, bias=0)
# ---------------------------------------------------------------------------
def _kaiming(key, shape, fan_in):
    std = math.sqrt(2.0 / ((1.0 + NEG_SLOPE ** 2) * fan_in))
    return std * jax.random.normal(key, shape, jnp.float32)


def init_res_block(key, cin, cout, k=3):
    k1, k2, k3 = jax.random.split(key, 3)
    ones = lambda c: jnp.ones((c,), jnp.float32)
    zeros = lambda c: jnp.zeros((c,), jnp.float32)
    return dict(
        w1=_kaiming(k1, (cout, cin, k, k, k), cin * k ** 3), g1=ones(cout), b1=zeros(cout),
        w2=_kaiming(k2, (cout, cout, k, k, k), cout * k ** 3), g2=ones(cout), b2=zeros(cout),
        w3=_kaiming(k3, (cout, cin, 1, 1, 1), cin), g3=ones(cout), b3=zeros(cout),
    )


def init_up_block(key, cin, cout, k=3, up_k=2):
    k1, k2, k3 = jax.random.split(key, 3)
    ones = lambda c: jnp.ones((c,), jnp.float32)
    zeros = lambda c: jnp.zeros((c,), jnp.float32)
    return dict(
        wt=_kaiming(k1, (cin, cout, up_k, up_k, up_k), cout * up_k ** 3),
        w1=_kaiming(k2, (cout, 2 * cout, k, k, k), 2 * cout * k ** 3), g1=ones(cout), b1=zeros(cout),
        w2=_kaiming(k3, (cout, cout, k, k, k), cout * k ** 3), g2=ones(cout), b2=zeros(cout),
    )


def init_params(key, in_channels=1, out_channels=2, filters=(8, 16, 32)):
    keys = jax.random.split(key, 6)
    f0, f1, f2 = filters
    return dict(
        input_block=init_res_block(keys[0], in_channels, f0),
        down0=init_res_block(keys[1], f0, f1),
        bottleneck=init_res_block(keys[2], f1, f2),
        up1=init_up_block(keys[3], f2, f1),
        up0=init_up_block(keys[4], f1, f0),
        output=dict(
            w=_kaiming(keys[5], (out_channels, f0, 1, 1, 1), f0),
            b=jnp.zeros((out_channels,), jnp.float32),
        ),
    )


# ---------------------------------------------------------------------------
if __name__ == "__main__":
    key = jax.random.PRNGKey(0)
    pkey, xkey = jax.random.split(key)
    params = init_params(pkey)

    # x: (N=1, C=1, D=8, H=8, W=8); D==H==W so the transposed views concatenate.
    x = jax.random.normal(xkey, (1, 1, 8, 8, 8), jnp.float32)

    fwd = jax.jit(gate_dyn_unet_forward)
    out = fwd(x, params)
    out = jax.block_until_ready(out)

    assert out.shape == (3, 2, 8, 8, 8), out.shape
    assert jnp.all(jnp.isfinite(out))
    print("KERNEL_OK")
</pallas_src>

<mosaic_0001>
module attributes {stable_mosaic.version = 11 : i64} {
  func.func @kernel(%arg0: i32, %arg1: memref<1x27x512xbf16, #tpu.memory_space<vmem>>, %arg2: memref<8x27xbf16, #tpu.memory_space<vmem>>, %arg3: memref<8x1xf32, #tpu.memory_space<vmem>>, %arg4: memref<8x1xf32, #tpu.memory_space<vmem>>, %arg5: memref<1x8x512xf32, #tpu.memory_space<vmem>>) attributes {dimension_semantics = [#tpu.dimension_semantics<parallel>], iteration_bounds = array<i64: 3>, scalar_prefetch = 0 : i64, scratch_operands = 0 : i64, tpu.core_type = #tpu.core_type<tc>, window_params = [{transform_indices = @transform_0, window_bounds = array<i64: 1, 27, 512>}, {pipeline_mode = #tpu.pipeline_mode<synchronous>, transform_indices = @transform_1, window_bounds = array<i64: 8, 27>}, {pipeline_mode = #tpu.pipeline_mode<synchronous>, transform_indices = @transform_2, window_bounds = array<i64: 8, 1>}, {pipeline_mode = #tpu.pipeline_mode<synchronous>, transform_indices = @transform_3, window_bounds = array<i64: 8, 1>}, {transform_indices = @transform_4, window_bounds = array<i64: 1, 8, 512>}]} {
    %c0 = arith.constant 0 : index
    %c0_0 = arith.constant 0 : index
    %c0_1 = arith.constant 0 : index
    %0 = vector.load %arg1[%c0, %c0_0, %c0_1] : memref<1x27x512xbf16, #tpu.memory_space<vmem>>, vector<1x27x512xbf16>
    %1 = vector.shape_cast %0 : vector<1x27x512xbf16> to vector<27x512xbf16>
    %c0_2 = arith.constant 0 : index
    %c0_3 = arith.constant 0 : index
    %2 = vector.load %arg2[%c0_2, %c0_3] : memref<8x27xbf16, #tpu.memory_space<vmem>>, vector<8x27xbf16>
    %cst = arith.constant dense<0.000000e+00> : vector<8x512xf32>
    %3 = tpu.matmul %2, %1, %cst {dimension_numbers = #tpu.dot_dimension_numbers<[1], [0], [0], [1], [0, 0, 1, 1], [], []>} : vector<8x27xbf16>, vector<27x512xbf16>, vector<8x512xf32> -> vector<8x512xf32>
    %c0_4 = arith.constant 0 : index
    %c0_5 = arith.constant 0 : index
    %4 = vector.load %arg3[%c0_4, %c0_5] : memref<8x1xf32, #tpu.memory_space<vmem>>, vector<8x1xf32>
    %c0_6 = arith.constant 0 : index
    %c0_7 = arith.constant 0 : index
    %5 = vector.load %arg4[%c0_6, %c0_7] : memref<8x1xf32, #tpu.memory_space<vmem>>, vector<8x1xf32>
    %cst_8 = arith.constant dense<0.000000e+00> : vector<8xf32>
    %6 = vector.multi_reduction <add>, %3, %cst_8 [1] : vector<8x512xf32> to vector<8xf32>
    %7 = vector.shape_cast %6 : vector<8xf32> to vector<8x1xf32>
    %cst_9 = arith.constant 5.120000e+02 : f32
    %8 = vector.broadcast %cst_9 : f32 to vector<8x1xf32>
    %9 = arith.divf %7, %8 : vector<8x1xf32>
    %10 = vector.broadcast %9 : vector<8x1xf32> to vector<8x512xf32>
    %11 = arith.subf %3, %10 : vector<8x512xf32>
    %12 = arith.mulf %11, %11 : vector<8x512xf32>
    %cst_10 = arith.constant dense<0.000000e+00> : vector<8xf32>
    %13 = vector.multi_reduction <add>, %12, %cst_10 [1] : vector<8x512xf32> to vector<8xf32>
    %14 = vector.shape_cast %13 : vector<8xf32> to vector<8x1xf32>
    %cst_11 = arith.constant 5.120000e+02 : f32
    %15 = vector.broadcast %cst_11 : f32 to vector<8x1xf32>
    %16 = arith.divf %14, %15 : vector<8x1xf32>
    %17 = vector.broadcast %9 : vector<8x1xf32> to vector<8x512xf32>
    %18 = arith.subf %3, %17 : vector<8x512xf32>
    %cst_12 = arith.constant 9.99999974E-6 : f32
    %19 = vector.broadcast %cst_12 : f32 to vector<8x1xf32>
    %20 = arith.addf %16, %19 : vector<8x1xf32>
    %21 = math.rsqrt %20 : vector<8x1xf32>
    %22 = vector.broadcast %21 : vector<8x1xf32> to vector<8x512xf32>
    %23 = arith.mulf %18, %22 : vector<8x512xf32>
    %24 = vector.broadcast %4 : vector<8x1xf32> to vector<8x512xf32>
    %25 = arith.mulf %23, %24 : vector<8x512xf32>
    %26 = vector.broadcast %5 : vector<8x1xf32> to vector<8x512xf32>
    %27 = arith.addf %25, %26 : vector<8x512xf32>
    %cst_13 = arith.constant 0.000000e+00 : f32
    %28 = vector.broadcast %cst_13 : f32 to vector<8x512xf32>
    %29 = arith.cmpf ogt, %27, %28 : vector<8x512xf32>
    %cst_14 = arith.constant 0.00999999977 : f32
    %30 = vector.broadcast %cst_14 : f32 to vector<8x512xf32>
    %31 = arith.mulf %30, %27 : vector<8x512xf32>
    %32 = arith.select %29, %27, %31 : vector<8x512xi1>, vector<8x512xf32>
    %c0_15 = arith.constant 0 : index
    %c0_16 = arith.constant 0 : index
    %c0_17 = arith.constant 0 : index
    %33 = vector.load %arg5[%c0_15, %c0_16, %c0_17] : memref<1x8x512xf32, #tpu.memory_space<vmem>>, vector<1x8x512xf32>
    %34 = vector.shape_cast %33 : vector<1x8x512xf32> to vector<8x512xf32>
    %35 = vector.shape_cast %32 : vector<8x512xf32> to vector<1x8x512xf32>
    tpu.vector_store %arg5[%c0_15, %c0_16, %c0_17], %35 {strides = array<i32>} : memref<1x8x512xf32, #tpu.memory_space<vmem>>, vector<1x8x512xf32>,
    return
  }
  func.func @transform_0(%arg0: i32) -> (i32, i32, i32) {
    %c0_i32 = arith.constant 0 : i32
    %c0_i32_0 = arith.constant 0 : i32
    %c0_i32_1 = arith.constant 0 : i32
    return %arg0, %c0_i32, %c0_i32_0 : i32, i32, i32
  }
  func.func @transform_1(%arg0: i32) -> (i32, i32) {
    %c0_i32 = arith.constant 0 : i32
    %c0_i32_0 = arith.constant 0 : i32
    %c0_i32_1 = arith.constant 0 : i32
    return %c0_i32, %c0_i32_0 : i32, i32
  }
  func.func @transform_2(%arg0: i32) -> (i32, i32) {
    %c0_i32 = arith.constant 0 : i32
    %c0_i32_0 = arith.constant 0 : i32
    %c0_i32_1 = arith.constant 0 : i32
    return %c0_i32, %c0_i32_0 : i32, i32
  }
  func.func @transform_3(%arg0: i32) -> (i32, i32) {
    %c0_i32 = arith.constant 0 : i32
    %c0_i32_0 = arith.constant 0 : i32
    %c0_i32_1 = arith.constant 0 : i32
    return %c0_i32, %c0_i32_0 : i32, i32
  }
  func.func @transform_4(%arg0: i32) -> (i32, i32, i32) {
    %c0_i32 = arith.constant 0 : i32
    %c0_i32_0 = arith.constant 0 : i32
    %c0_i32_1 = arith.constant 0 : i32
    return %arg0, %c0_i32, %c0_i32_0 : i32, i32, i32
  }
}

module attributes {stable_mosaic.version = 11 : i64} {
  func.func @kernel(%arg0: i32, %arg1: memref<1x1x512xbf16, #tpu.memory_space<vmem>>, %arg2: memref<8x1xbf16, #tpu.memory_space<vmem>>, %arg3: memref<8x1xf32, #tpu.memory_space<vmem>>, %arg4: memref<8x1xf32, #tpu.memory_space<vmem>>, %arg5: memref<1x8x512xf32, #tpu.memory_space<vmem>>) attributes {dimension_semantics = [#tpu.dimension_semantics<parallel>], iteration_bounds = array<i64: 3>, scalar_prefetch = 0 : i64, scratch_operands = 0 : i64, tpu.core_type = #tpu.core_type<tc>, window_params = [{transform_indices = @transform_0, window_bounds = array<i64: 1, 1, 512>}, {pipeline_mode = #tpu.pipeline_mode<synchronous>, transform_indices = @transform_1, window_bounds = array<i64: 8, 1>}, {pipeline_mode = #tpu.pipeline_mode<synchronous>, transform_indices = @transform_2, window_bounds = array<i64: 8, 1>}, {pipeline_mode = #tpu.pipeline_mode<synchronous>, transform_indices = @transform_3, window_bounds = array<i64: 8, 1>}, {transform_indices = @transform_4, window_bounds = array<i64: 1, 8, 512>}]} {
    %c0 = arith.constant 0 : index
    %c0_0 = arith.constant 0 : index
    %c0_1 = arith.constant 0 : index
    %0 = vector.load %arg1[%c0, %c0_0, %c0_1] : memref<1x1x512xbf16, #tpu.memory_space<vmem>>, vector<1x1x512xbf16>
    %1 = vector.shape_cast %0 : vector<1x1x512xbf16> to vector<1x512xbf16>
    %c0_2 = arith.constant 0 : index
    %c0_3 = arith.constant 0 : index
    %2 = vector.load %arg2[%c0_2, %c0_3] : memref<8x1xbf16, #tpu.memory_space<vmem>>, vector<8x1xbf16>
    %cst = arith.constant dense<0.000000e+00> : vector<8x512xf32>
    %3 = tpu.matmul %2, %1, %cst {dimension_numbers = #tpu.dot_dimension_numbers<[1], [0], [0], [1], [0, 0, 1, 1], [], []>} : vector<8x1xbf16>, vector<1x512xbf16>, vector<8x512xf32> -> vector<8x512xf32>
    %c0_4 = arith.constant 0 : index
    %c0_5 = arith.constant 0 : index
    %4 = vector.load %arg3[%c0_4, %c0_5] : memref<8x1xf32, #tpu.memory_space<vmem>>, vector<8x1xf32>
    %c0_6 = arith.constant 0 : index
    %c0_7 = arith.constant 0 : index
    %5 = vector.load %arg4[%c0_6, %c0_7] : memref<8x1xf32, #tpu.memory_space<vmem>>, vector<8x1xf32>
    %cst_8 = arith.constant dense<0.000000e+00> : vector<8xf32>
    %6 = vector.multi_reduction <add>, %3, %cst_8 [1] : vector<8x512xf32> to vector<8xf32>
    %7 = vector.shape_cast %6 : vector<8xf32> to vector<8x1xf32>
    %cst_9 = arith.constant 5.120000e+02 : f32
    %8 = vector.broadcast %cst_9 : f32 to vector<8x1xf32>
    %9 = arith.divf %7, %8 : vector<8x1xf32>
    %10 = vector.broadcast %9 : vector<8x1xf32> to vector<8x512xf32>
    %11 = arith.subf %3, %10 : vector<8x512xf32>
    %12 = arith.mulf %11, %11 : vector<8x512xf32>
    %cst_10 = arith.constant dense<0.000000e+00> : vector<8xf32>
    %13 = vector.multi_reduction <add>, %12, %cst_10 [1] : vector<8x512xf32> to vector<8xf32>
    %14 = vector.shape_cast %13 : vector<8xf32> to vector<8x1xf32>
    %cst_11 = arith.constant 5.120000e+02 : f32
    %15 = vector.broadcast %cst_11 : f32 to vector<8x1xf32>
    %16 = arith.divf %14, %15 : vector<8x1xf32>
    %17 = vector.broadcast %9 : vector<8x1xf32> to vector<8x512xf32>
    %18 = arith.subf %3, %17 : vector<8x512xf32>
    %cst_12 = arith.constant 9.99999974E-6 : f32
    %19 = vector.broadcast %cst_12 : f32 to vector<8x1xf32>
    %20 = arith.addf %16, %19 : vector<8x1xf32>
    %21 = math.rsqrt %20 : vector<8x1xf32>
    %22 = vector.broadcast %21 : vector<8x1xf32> to vector<8x512xf32>
    %23 = arith.mulf %18, %22 : vector<8x512xf32>
    %24 = vector.broadcast %4 : vector<8x1xf32> to vector<8x512xf32>
    %25 = arith.mulf %23, %24 : vector<8x512xf32>
    %26 = vector.broadcast %5 : vector<8x1xf32> to vector<8x512xf32>
    %27 = arith.addf %25, %26 : vector<8x512xf32>
    %c0_13 = arith.constant 0 : index
    %c0_14 = arith.constant 0 : index
    %c0_15 = arith.constant 0 : index
    %28 = vector.load %arg5[%c0_13, %c0_14, %c0_15] : memref<1x8x512xf32, #tpu.memory_space<vmem>>, vector<1x8x512xf32>
    %29 = vector.shape_cast %28 : vector<1x8x512xf32> to vector<8x512xf32>
    %30 = vector.shape_cast %27 : vector<8x512xf32> to vector<1x8x512xf32>
    tpu.vector_store %arg5[%c0_13, %c0_14, %c0_15], %30 {strides = array<i32>} : memref<1x8x512xf32, #tpu.memory_space<vmem>>, vector<1x8x512xf32>,
    return
  }
  func.func @transform_0(%arg0: i32) -> (i32, i32, i32) {
    %c0_i32 = arith.constant 0 : i32
    %c0_i32_0 = arith.constant 0 : i32
    %c0_i32_1 = arith.constant 0 : i32
    return %arg0, %c0_i32, %c0_i32_0 : i32, i32, i32
  }
  func.func @transform_1(%arg0: i32) -> (i32, i32) {
    %c0_i32 = arith.constant 0 : i32
    %c0_i32_0 = arith.constant 0 : i32
    %c0_i32_1 = arith.constant 0 : i32
    return %c0_i32, %c0_i32_0 : i32, i32
  }
  func.func @transform_2(%arg0: i32) -> (i32, i32) {
    %c0_i32 = arith.constant 0 : i32
    %c0_i32_0 = arith.constant 0 : i32
    %c0_i32_1 = arith.constant 0 : i32
    return %c0_i32, %c0_i32_0 : i32, i32
  }
  func.func @transform_3(%arg0: i32) -> (i32, i32) {
    %c0_i32 = arith.constant 0 : i32
    %c0_i32_0 = arith.constant 0 : i32
    %c0_i32_1 = arith.constant 0 : i32
    return %c0_i32, %c0_i32_0 : i32, i32
  }
  func.func @transform_4(%arg0: i32) -> (i32, i32, i32) {
    %c0_i32 = arith.constant 0 : i32
    %c0_i32_0 = arith.constant 0 : i32
    %c0_i32_1 = arith.constant 0 : i32
    return %arg0, %c0_i32, %c0_i32_0 : i32, i32, i32
  }
}

module attributes {stable_mosaic.version = 11 : i64} {
  func.func @kernel(%arg0: i32, %arg1: memref<1x216x512xbf16, #tpu.memory_space<vmem>>, %arg2: memref<8x216xbf16, #tpu.memory_space<vmem>>, %arg3: memref<8x1xf32, #tpu.memory_space<vmem>>, %arg4: memref<8x1xf32, #tpu.memory_space<vmem>>, %arg5: memref<1x8x512xf32, #tpu.memory_space<vmem>>, %arg6: memref<1x8x512xf32, #tpu.memory_space<vmem>>) attributes {dimension_semantics = [#tpu.dimension_semantics<parallel>], iteration_bounds = array<i64: 3>, scalar_prefetch = 0 : i64, scratch_operands = 0 : i64, tpu.core_type = #tpu.core_type<tc>, window_params = [{transform_indices = @transform_0, window_bounds = array<i64: 1, 216, 512>}, {pipeline_mode = #tpu.pipeline_mode<synchronous>, transform_indices = @transform_1, window_bounds = array<i64: 8, 216>}, {pipeline_mode = #tpu.pipeline_mode<synchronous>, transform_indices = @transform_2, window_bounds = array<i64: 8, 1>}, {pipeline_mode = #tpu.pipeline_mode<synchronous>, transform_indices = @transform_3, window_bounds = array<i64: 8, 1>}, {transform_indices = @transform_4, window_bounds = array<i64: 1, 8, 512>}, {transform_indices = @transform_5, window_bounds = array<i64: 1, 8, 512>}]} {
    %c0 = arith.constant 0 : index
    %c0_0 = arith.constant 0 : index
    %c0_1 = arith.constant 0 : index
    %0 = vector.load %arg1[%c0, %c0_0, %c0_1] : memref<1x216x512xbf16, #tpu.memory_space<vmem>>, vector<1x216x512xbf16>
    %1 = vector.shape_cast %0 : vector<1x216x512xbf16> to vector<216x512xbf16>
    %c0_2 = arith.constant 0 : index
    %c0_3 = arith.constant 0 : index
    %2 = vector.load %arg2[%c0_2, %c0_3] : memref<8x216xbf16, #tpu.memory_space<vmem>>, vector<8x216xbf16>
    %cst = arith.constant dense<0.000000e+00> : vector<8x512xf32>
    %3 = tpu.matmul %2, %1, %cst {dimension_numbers = #tpu.dot_dimension_numbers<[1], [0], [0], [1], [0, 0, 1, 1], [], []>} : vector<8x216xbf16>, vector<216x512xbf16>, vector<8x512xf32> -> vector<8x512xf32>
    %c0_4 = arith.constant 0 : index
    %c0_5 = arith.constant 0 : index
    %4 = vector.load %arg3[%c0_4, %c0_5] : memref<8x1xf32, #tpu.memory_space<vmem>>, vector<8x1xf32>
    %c0_6 = arith.constant 0 : index
    %c0_7 = arith.constant 0 : index
    %5 = vector.load %arg4[%c0_6, %c0_7] : memref<8x1xf32, #tpu.memory_space<vmem>>, vector<8x1xf32>
    %cst_8 = arith.constant dense<0.000000e+00> : vector<8xf32>
    %6 = vector.multi_reduction <add>, %3, %cst_8 [1] : vector<8x512xf32> to vector<8xf32>
    %7 = vector.shape_cast %6 : vector<8xf32> to vector<8x1xf32>
    %cst_9 = arith.constant 5.120000e+02 : f32
    %8 = vector.broadcast %cst_9 : f32 to vector<8x1xf32>
    %9 = arith.divf %7, %8 : vector<8x1xf32>
    %10 = vector.broadcast %9 : vector<8x1xf32> to vector<8x512xf32>
    %11 = arith.subf %3, %10 : vector<8x512xf32>
    %12 = arith.mulf %11, %11 : vector<8x512xf32>
    %cst_10 = arith.constant dense<0.000000e+00> : vector<8xf32>
    %13 = vector.multi_reduction <add>, %12, %cst_10 [1] : vector<8x512xf32> to vector<8xf32>
    %14 = vector.shape_cast %13 : vector<8xf32> to vector<8x1xf32>
    %cst_11 = arith.constant 5.120000e+02 : f32
    %15 = vector.broadcast %cst_11 : f32 to vector<8x1xf32>
    %16 = arith.divf %14, %15 : vector<8x1xf32>
    %17 = vector.broadcast %9 : vector<8x1xf32> to vector<8x512xf32>
    %18 = arith.subf %3, %17 : vector<8x512xf32>
    %cst_12 = arith.constant 9.99999974E-6 : f32
    %19 = vector.broadcast %cst_12 : f32 to vector<8x1xf32>
    %20 = arith.addf %16, %19 : vector<8x1xf32>
    %21 = math.rsqrt %20 : vector<8x1xf32>
    %22 = vector.broadcast %21 : vector<8x1xf32> to vector<8x512xf32>
    %23 = arith.mulf %18, %22 : vector<8x512xf32>
    %24 = vector.broadcast %4 : vector<8x1xf32> to vector<8x512xf32>
    %25 = arith.mulf %23, %24 : vector<8x512xf32>
    %26 = vector.broadcast %5 : vector<8x1xf32> to vector<8x512xf32>
    %27 = arith.addf %25, %26 : vector<8x512xf32>
    %c0_13 = arith.constant 0 : index
    %c0_14 = arith.constant 0 : index
    %c0_15 = arith.constant 0 : index
    %28 = vector.load %arg5[%c0_13, %c0_14, %c0_15] : memref<1x8x512xf32, #tpu.memory_space<vmem>>, vector<1x8x512xf32>
    %29 = vector.shape_cast %28 : vector<1x8x512xf32> to vector<8x512xf32>
    %30 = arith.addf %27, %29 : vector<8x512xf32>
    %cst_16 = arith.constant 0.000000e+00 : f32
    %31 = vector.broadcast %cst_16 : f32 to vector<8x512xf32>
    %32 = arith.cmpf ogt, %30, %31 : vector<8x512xf32>
    %cst_17 = arith.constant 0.00999999977 : f32
    %33 = vector.broadcast %cst_17 : f32 to vector<8x512xf32>
    %34 = arith.mulf %33, %30 : vector<8x512xf32>
    %35 = arith.select %32, %30, %34 : vector<8x512xi1>, vector<8x512xf32>
    %c0_18 = arith.constant 0 : index
    %c0_19 = arith.constant 0 : index
    %c0_20 = arith.constant 0 : index
    %36 = vector.load %arg6[%c0_18, %c0_19, %c0_20] : memref<1x8x512xf32, #tpu.memory_space<vmem>>, vector<1x8x512xf32>
    %37 = vector.shape_cast %36 : vector<1x8x512xf32> to vector<8x512xf32>
    %38 = vector.shape_cast %35 : vector<8x512xf32> to vector<1x8x512xf32>
    tpu.vector_store %arg6[%c0_18, %c0_19, %c0_20], %38 {strides = array<i32>} : memref<1x8x512xf32, #tpu.memory_space<vmem>>, vector<1x8x512xf32>,
    return
  }
  func.func @transform_0(%arg0: i32) -> (i32, i32, i32) {
    %c0_i32 = arith.constant 0 : i32
    %c0_i32_0 = arith.constant 0 : i32
    %c0_i32_1 = arith.constant 0 : i32
    return %arg0, %c0_i32, %c0_i32_0 : i32, i32, i32
  }
  func.func @transform_1(%arg0: i32) -> (i32, i32) {
    %c0_i32 = arith.constant 0 : i32
    %c0_i32_0 = arith.constant 0 : i32
    %c0_i32_1 = arith.constant 0 : i32
    return %c0_i32, %c0_i32_0 : i32, i32
  }
  func.func @transform_2(%arg0: i32) -> (i32, i32) {
    %c0_i32 = arith.constant 0 : i32
    %c0_i32_0 = arith.constant 0 : i32
    %c0_i32_1 = arith.constant 0 : i32
    return %c0_i32, %c0_i32_0 : i32, i32
  }
  func.func @transform_3(%arg0: i32) -> (i32, i32) {
    %c0_i32 = arith.constant 0 : i32
    %c0_i32_0 = arith.constant 0 : i32
    %c0_i32_1 = arith.constant 0 : i32
    return %c0_i32, %c0_i32_0 : i32, i32
  }
  func.func @transform_4(%arg0: i32) -> (i32, i32, i32) {
    %c0_i32 = arith.constant 0 : i32
    %c0_i32_0 = arith.constant 0 : i32
    %c0_i32_1 = arith.constant 0 : i32
    return %arg0, %c0_i32, %c0_i32_0 : i32, i32, i32
  }
  func.func @transform_5(%arg0: i32) -> (i32, i32, i32) {
    %c0_i32 = arith.constant 0 : i32
    %c0_i32_0 = arith.constant 0 : i32
    %c0_i32_1 = arith.constant 0 : i32
    return %arg0, %c0_i32, %c0_i32_0 : i32, i32, i32
  }
}

module attributes {stable_mosaic.version = 11 : i64} {
  func.func @kernel(%arg0: i32, %arg1: memref<1x216x64xbf16, #tpu.memory_space<vmem>>, %arg2: memref<16x216xbf16, #tpu.memory_space<vmem>>, %arg3: memref<16x1xf32, #tpu.memory_space<vmem>>, %arg4: memref<16x1xf32, #tpu.memory_space<vmem>>, %arg5: memref<1x16x64xf32, #tpu.memory_space<vmem>>) attributes {dimension_semantics = [#tpu.dimension_semantics<parallel>], iteration_bounds = array<i64: 3>, scalar_prefetch = 0 : i64, scratch_operands = 0 : i64, tpu.core_type = #tpu.core_type<tc>, window_params = [{transform_indices = @transform_0, window_bounds = array<i64: 1, 216, 64>}, {pipeline_mode = #tpu.pipeline_mode<synchronous>, transform_indices = @transform_1, window_bounds = array<i64: 16, 216>}, {pipeline_mode = #tpu.pipeline_mode<synchronous>, transform_indices = @transform_2, window_bounds = array<i64: 16, 1>}, {pipeline_mode = #tpu.pipeline_mode<synchronous>, transform_indices = @transform_3, window_bounds = array<i64: 16, 1>}, {transform_indices = @transform_4, window_bounds = array<i64: 1, 16, 64>}]} {
    %c0 = arith.constant 0 : index
    %c0_0 = arith.constant 0 : index
    %c0_1 = arith.constant 0 : index
    %0 = vector.load %arg1[%c0, %c0_0, %c0_1] : memref<1x216x64xbf16, #tpu.memory_space<vmem>>, vector<1x216x64xbf16>
    %1 = vector.shape_cast %0 : vector<1x216x64xbf16> to vector<216x64xbf16>
    %c0_2 = arith.constant 0 : index
    %c0_3 = arith.constant 0 : index
    %2 = vector.load %arg2[%c0_2, %c0_3] : memref<16x216xbf16, #tpu.memory_space<vmem>>, vector<16x216xbf16>
    %cst = arith.constant dense<0.000000e+00> : vector<16x64xf32>
    %3 = tpu.matmul %2, %1, %cst {dimension_numbers = #tpu.dot_dimension_numbers<[1], [0], [0], [1], [0, 0, 1, 1], [], []>} : vector<16x216xbf16>, vector<216x64xbf16>, vector<16x64xf32> -> vector<16x64xf32>
    %c0_4 = arith.constant 0 : index
    %c0_5 = arith.constant 0 : index
    %4 = vector.load %arg3[%c0_4, %c0_5] : memref<16x1xf32, #tpu.memory_space<vmem>>, vector<16x1xf32>
    %c0_6 = arith.constant 0 : index
    %c0_7 = arith.constant 0 : index
    %5 = vector.load %arg4[%c0_6, %c0_7] : memref<16x1xf32, #tpu.memory_space<vmem>>, vector<16x1xf32>
    %cst_8 = arith.constant dense<0.000000e+00> : vector<16xf32>
    %6 = vector.multi_reduction <add>, %3, %cst_8 [1] : vector<16x64xf32> to vector<16xf32>
    %7 = vector.shape_cast %6 : vector<16xf32> to vector<16x1xf32>
    %cst_9 = arith.constant 6.400000e+01 : f32
    %8 = vector.broadcast %cst_9 : f32 to vector<16x1xf32>
    %9 = arith.divf %7, %8 : vector<16x1xf32>
    %10 = vector.broadcast %9 : vector<16x1xf32> to vector<16x64xf32>
    %11 = arith.subf %3, %10 : vector<16x64xf32>
    %12 = arith.mulf %11, %11 : vector<16x64xf32>
    %cst_10 = arith.constant dense<0.000000e+00> : vector<16xf32>
    %13 = vector.multi_reduction <add>, %12, %cst_10 [1] : vector<16x64xf32> to vector<16xf32>
    %14 = vector.shape_cast %13 : vector<16xf32> to vector<16x1xf32>
    %cst_11 = arith.constant 6.400000e+01 : f32
    %15 = vector.broadcast %cst_11 : f32 to vector<16x1xf32>
    %16 = arith.divf %14, %15 : vector<16x1xf32>
    %17 = vector.broadcast %9 : vector<16x1xf32> to vector<16x64xf32>
    %18 = arith.subf %3, %17 : vector<16x64xf32>
    %cst_12 = arith.constant 9.99999974E-6 : f32
    %19 = vector.broadcast %cst_12 : f32 to vector<16x1xf32>
    %20 = arith.addf %16, %19 : vector<16x1xf32>
    %21 = math.rsqrt %20 : vector<16x1xf32>
    %22 = vector.broadcast %21 : vector<16x1xf32> to vector<16x64xf32>
    %23 = arith.mulf %18, %22 : vector<16x64xf32>
    %24 = vector.broadcast %4 : vector<16x1xf32> to vector<16x64xf32>
    %25 = arith.mulf %23, %24 : vector<16x64xf32>
    %26 = vector.broadcast %5 : vector<16x1xf32> to vector<16x64xf32>
    %27 = arith.addf %25, %26 : vector<16x64xf32>
    %cst_13 = arith.constant 0.000000e+00 : f32
    %28 = vector.broadcast %cst_13 : f32 to vector<16x64xf32>
    %29 = arith.cmpf ogt, %27, %28 : vector<16x64xf32>
    %cst_14 = arith.constant 0.00999999977 : f32
    %30 = vector.broadcast %cst_14 : f32 to vector<16x64xf32>
    %31 = arith.mulf %30, %27 : vector<16x64xf32>
    %32 = arith.select %29, %27, %31 : vector<16x64xi1>, vector<16x64xf32>
    %c0_15 = arith.constant 0 : index
    %c0_16 = arith.constant 0 : index
    %c0_17 = arith.constant 0 : index
    %33 = vector.load %arg5[%c0_15, %c0_16, %c0_17] : memref<1x16x64xf32, #tpu.memory_space<vmem>>, vector<1x16x64xf32>
    %34 = vector.shape_cast %33 : vector<1x16x64xf32> to vector<16x64xf32>
    %35 = vector.shape_cast %32 : vector<16x64xf32> to vector<1x16x64xf32>
    tpu.vector_store %arg5[%c0_15, %c0_16, %c0_17], %35 {strides = array<i32>} : memref<1x16x64xf32, #tpu.memory_space<vmem>>, vector<1x16x64xf32>,
    return
  }
  func.func @transform_0(%arg0: i32) -> (i32, i32, i32) {
    %c0_i32 = arith.constant 0 : i32
    %c0_i32_0 = arith.constant 0 : i32
    %c0_i32_1 = arith.constant 0 : i32
    return %arg0, %c0_i32, %c0_i32_0 : i32, i32, i32
  }
  func.func @transform_1(%arg0: i32) -> (i32, i32) {
    %c0_i32 = arith.constant 0 : i32
    %c0_i32_0 = arith.constant 0 : i32
    %c0_i32_1 = arith.constant 0 : i32
    return %c0_i32, %c0_i32_0 : i32, i32
  }
  func.func @transform_2(%arg0: i32) -> (i32, i32) {
    %c0_i32 = arith.constant 0 : i32
    %c0_i32_0 = arith.constant 0 : i32
    %c0_i32_1 = arith.constant 0 : i32
    return %c0_i32, %c0_i32_0 : i32, i32
  }
  func.func @transform_3(%arg0: i32) -> (i32, i32) {
    %c0_i32 = arith.constant 0 : i32
    %c0_i32_0 = arith.constant 0 : i32
    %c0_i32_1 = arith.constant 0 : i32
    return %c0_i32, %c0_i32_0 : i32, i32
  }
  func.func @transform_4(%arg0: i32) -> (i32, i32, i32) {
    %c0_i32 = arith.constant 0 : i32
    %c0_i32_0 = arith.constant 0 : i32
    %c0_i32_1 = arith.constant 0 : i32
    return %arg0, %c0_i32, %c0_i32_0 : i32, i32, i32
  }
}

module attributes {stable_mosaic.version = 11 : i64} {
  func.func @kernel(%arg0: i32, %arg1: memref<1x8x64xbf16, #tpu.memory_space<vmem>>, %arg2: memref<16x8xbf16, #tpu.memory_space<vmem>>, %arg3: memref<16x1xf32, #tpu.memory_space<vmem>>, %arg4: memref<16x1xf32, #tpu.memory_space<vmem>>, %arg5: memref<1x16x64xf32, #tpu.memory_space<vmem>>) attributes {dimension_semantics = [#tpu.dimension_semantics<parallel>], iteration_bounds = array<i64: 3>, scalar_prefetch = 0 : i64, scratch_operands = 0 : i64, tpu.core_type = #tpu.core_type<tc>, window_params = [{transform_indices = @transform_0, window_bounds = array<i64: 1, 8, 64>}, {pipeline_mode = #tpu.pipeline_mode<synchronous>, transform_indices = @transform_1, window_bounds = array<i64: 16, 8>}, {pipeline_mode = #tpu.pipeline_mode<synchronous>, transform_indices = @transform_2, window_bounds = array<i64: 16, 1>}, {pipeline_mode = #tpu.pipeline_mode<synchronous>, transform_indices = @transform_3, window_bounds = array<i64: 16, 1>}, {transform_indices = @transform_4, window_bounds = array<i64: 1, 16, 64>}]} {
    %c0 = arith.constant 0 : index
    %c0_0 = arith.constant 0 : index
    %c0_1 = arith.constant 0 : index
    %0 = vector.load %arg1[%c0, %c0_0, %c0_1] : memref<1x8x64xbf16, #tpu.memory_space<vmem>>, vector<1x8x64xbf16>
    %1 = vector.shape_cast %0 : vector<1x8x64xbf16> to vector<8x64xbf16>
    %c0_2 = arith.constant 0 : index
    %c0_3 = arith.constant 0 : index
    %2 = vector.load %arg2[%c0_2, %c0_3] : memref<16x8xbf16, #tpu.memory_space<vmem>>, vector<16x8xbf16>
    %cst = arith.constant dense<0.000000e+00> : vector<16x64xf32>
    %3 = tpu.matmul %2, %1, %cst {dimension_numbers = #tpu.dot_dimension_numbers<[1], [0], [0], [1], [0, 0, 1, 1], [], []>} : vector<16x8xbf16>, vector<8x64xbf16>, vector<16x64xf32> -> vector<16x64xf32>
    %c0_4 = arith.constant 0 : index
    %c0_5 = arith.constant 0 : index
    %4 = vector.load %arg3[%c0_4, %c0_5] : memref<16x1xf32, #tpu.memory_space<vmem>>, vector<16x1xf32>
    %c0_6 = arith.constant 0 : index
    %c0_7 = arith.constant 0 : index
    %5 = vector.load %arg4[%c0_6, %c0_7] : memref<16x1xf32, #tpu.memory_space<vmem>>, vector<16x1xf32>
    %cst_8 = arith.constant dense<0.000000e+00> : vector<16xf32>
    %6 = vector.multi_reduction <add>, %3, %cst_8 [1] : vector<16x64xf32> to vector<16xf32>
    %7 = vector.shape_cast %6 : vector<16xf32> to vector<16x1xf32>
    %cst_9 = arith.constant 6.400000e+01 : f32
    %8 = vector.broadcast %cst_9 : f32 to vector<16x1xf32>
    %9 = arith.divf %7, %8 : vector<16x1xf32>
    %10 = vector.broadcast %9 : vector<16x1xf32> to vector<16x64xf32>
    %11 = arith.subf %3, %10 : vector<16x64xf32>
    %12 = arith.mulf %11, %11 : vector<16x64xf32>
    %cst_10 = arith.constant dense<0.000000e+00> : vector<16xf32>
    %13 = vector.multi_reduction <add>, %12, %cst_10 [1] : vector<16x64xf32> to vector<16xf32>
    %14 = vector.shape_cast %13 : vector<16xf32> to vector<16x1xf32>
    %cst_11 = arith.constant 6.400000e+01 : f32
    %15 = vector.broadcast %cst_11 : f32 to vector<16x1xf32>
    %16 = arith.divf %14, %15 : vector<16x1xf32>
    %17 = vector.broadcast %9 : vector<16x1xf32> to vector<16x64xf32>
    %18 = arith.subf %3, %17 : vector<16x64xf32>
    %cst_12 = arith.constant 9.99999974E-6 : f32
    %19 = vector.broadcast %cst_12 : f32 to vector<16x1xf32>
    %20 = arith.addf %16, %19 : vector<16x1xf32>
    %21 = math.rsqrt %20 : vector<16x1xf32>
    %22 = vector.broadcast %21 : vector<16x1xf32> to vector<16x64xf32>
    %23 = arith.mulf %18, %22 : vector<16x64xf32>
    %24 = vector.broadcast %4 : vector<16x1xf32> to vector<16x64xf32>
    %25 = arith.mulf %23, %24 : vector<16x64xf32>
    %26 = vector.broadcast %5 : vector<16x1xf32> to vector<16x64xf32>
    %27 = arith.addf %25, %26 : vector<16x64xf32>
    %c0_13 = arith.constant 0 : index
    %c0_14 = arith.constant 0 : index
    %c0_15 = arith.constant 0 : index
    %28 = vector.load %arg5[%c0_13, %c0_14, %c0_15] : memref<1x16x64xf32, #tpu.memory_space<vmem>>, vector<1x16x64xf32>
    %29 = vector.shape_cast %28 : vector<1x16x64xf32> to vector<16x64xf32>
    %30 = vector.shape_cast %27 : vector<16x64xf32> to vector<1x16x64xf32>
    tpu.vector_store %arg5[%c0_13, %c0_14, %c0_15], %30 {strides = array<i32>} : memref<1x16x64xf32, #tpu.memory_space<vmem>>, vector<1x16x64xf32>,
    return
  }
  func.func @transform_0(%arg0: i32) -> (i32, i32, i32) {
    %c0_i32 = arith.constant 0 : i32
    %c0_i32_0 = arith.constant 0 : i32
    %c0_i32_1 = arith.constant 0 : i32
    return %arg0, %c0_i32, %c0_i32_0 : i32, i32, i32
  }
  func.func @transform_1(%arg0: i32) -> (i32, i32) {
    %c0_i32 = arith.constant 0 : i32
    %c0_i32_0 = arith.constant 0 : i32
    %c0_i32_1 = arith.constant 0 : i32
    return %c0_i32, %c0_i32_0 : i32, i32
  }
  func.func @transform_2(%arg0: i32) -> (i32, i32) {
    %c0_i32 = arith.constant 0 : i32
    %c0_i32_0 = arith.constant 0 : i32
    %c0_i32_1 = arith.constant 0 : i32
    return %c0_i32, %c0_i32_0 : i32, i32
  }
  func.func @transform_3(%arg0: i32) -> (i32, i32) {
    %c0_i32 = arith.constant 0 : i32
    %c0_i32_0 = arith.constant 0 : i32
    %c0_i32_1 = arith.constant 0 : i32
    return %c0_i32, %c0_i32_0 : i32, i32
  }
  func.func @transform_4(%arg0: i32) -> (i32, i32, i32) {
    %c0_i32 = arith.constant 0 : i32
    %c0_i32_0 = arith.constant 0 : i32
    %c0_i32_1 = arith.constant 0 : i32
    return %arg0, %c0_i32, %c0_i32_0 : i32, i32, i32
  }
}

module attributes {stable_mosaic.version = 11 : i64} {
  func.func @kernel(%arg0: i32, %arg1: memref<1x432x64xbf16, #tpu.memory_space<vmem>>, %arg2: memref<16x432xbf16, #tpu.memory_space<vmem>>, %arg3: memref<16x1xf32, #tpu.memory_space<vmem>>, %arg4: memref<16x1xf32, #tpu.memory_space<vmem>>, %arg5: memref<1x16x64xf32, #tpu.memory_space<vmem>>, %arg6: memref<1x16x64xf32, #tpu.memory_space<vmem>>) attributes {dimension_semantics = [#tpu.dimension_semantics<parallel>], iteration_bounds = array<i64: 3>, scalar_prefetch = 0 : i64, scratch_operands = 0 : i64, tpu.core_type = #tpu.core_type<tc>, window_params = [{transform_indices = @transform_0, window_bounds = array<i64: 1, 432, 64>}, {pipeline_mode = #tpu.pipeline_mode<synchronous>, transform_indices = @transform_1, window_bounds = array<i64: 16, 432>}, {pipeline_mode = #tpu.pipeline_mode<synchronous>, transform_indices = @transform_2, window_bounds = array<i64: 16, 1>}, {pipeline_mode = #tpu.pipeline_mode<synchronous>, transform_indices = @transform_3, window_bounds = array<i64: 16, 1>}, {transform_indices = @transform_4, window_bounds = array<i64: 1, 16, 64>}, {transform_indices = @transform_5, window_bounds = array<i64: 1, 16, 64>}]} {
    %c0 = arith.constant 0 : index
    %c0_0 = arith.constant 0 : index
    %c0_1 = arith.constant 0 : index
    %0 = vector.load %arg1[%c0, %c0_0, %c0_1] : memref<1x432x64xbf16, #tpu.memory_space<vmem>>, vector<1x432x64xbf16>
    %1 = vector.shape_cast %0 : vector<1x432x64xbf16> to vector<432x64xbf16>
    %c0_2 = arith.constant 0 : index
    %c0_3 = arith.constant 0 : index
    %2 = vector.load %arg2[%c0_2, %c0_3] : memref<16x432xbf16, #tpu.memory_space<vmem>>, vector<16x432xbf16>
    %cst = arith.constant dense<0.000000e+00> : vector<16x64xf32>
    %3 = tpu.matmul %2, %1, %cst {dimension_numbers = #tpu.dot_dimension_numbers<[1], [0], [0], [1], [0, 0, 1, 1], [], []>} : vector<16x432xbf16>, vector<432x64xbf16>, vector<16x64xf32> -> vector<16x64xf32>
    %c0_4 = arith.constant 0 : index
    %c0_5 = arith.constant 0 : index
    %4 = vector.load %arg3[%c0_4, %c0_5] : memref<16x1xf32, #tpu.memory_space<vmem>>, vector<16x1xf32>
    %c0_6 = arith.constant 0 : index
    %c0_7 = arith.constant 0 : index
    %5 = vector.load %arg4[%c0_6, %c0_7] : memref<16x1xf32, #tpu.memory_space<vmem>>, vector<16x1xf32>
    %cst_8 = arith.constant dense<0.000000e+00> : vector<16xf32>
    %6 = vector.multi_reduction <add>, %3, %cst_8 [1] : vector<16x64xf32> to vector<16xf32>
    %7 = vector.shape_cast %6 : vector<16xf32> to vector<16x1xf32>
    %cst_9 = arith.constant 6.400000e+01 : f32
    %8 = vector.broadcast %cst_9 : f32 to vector<16x1xf32>
    %9 = arith.divf %7, %8 : vector<16x1xf32>
    %10 = vector.broadcast %9 : vector<16x1xf32> to vector<16x64xf32>
    %11 = arith.subf %3, %10 : vector<16x64xf32>
    %12 = arith.mulf %11, %11 : vector<16x64xf32>
    %cst_10 = arith.constant dense<0.000000e+00> : vector<16xf32>
    %13 = vector.multi_reduction <add>, %12, %cst_10 [1] : vector<16x64xf32> to vector<16xf32>
    %14 = vector.shape_cast %13 : vector<16xf32> to vector<16x1xf32>
    %cst_11 = arith.constant 6.400000e+01 : f32
    %15 = vector.broadcast %cst_11 : f32 to vector<16x1xf32>
    %16 = arith.divf %14, %15 : vector<16x1xf32>
    %17 = vector.broadcast %9 : vector<16x1xf32> to vector<16x64xf32>
    %18 = arith.subf %3, %17 : vector<16x64xf32>
    %cst_12 = arith.constant 9.99999974E-6 : f32
    %19 = vector.broadcast %cst_12 : f32 to vector<16x1xf32>
    %20 = arith.addf %16, %19 : vector<16x1xf32>
    %21 = math.rsqrt %20 : vector<16x1xf32>
    %22 = vector.broadcast %21 : vector<16x1xf32> to vector<16x64xf32>
    %23 = arith.mulf %18, %22 : vector<16x64xf32>
    %24 = vector.broadcast %4 : vector<16x1xf32> to vector<16x64xf32>
    %25 = arith.mulf %23, %24 : vector<16x64xf32>
    %26 = vector.broadcast %5 : vector<16x1xf32> to vector<16x64xf32>
    %27 = arith.addf %25, %26 : vector<16x64xf32>
    %c0_13 = arith.constant 0 : index
    %c0_14 = arith.constant 0 : index
    %c0_15 = arith.constant 0 : index
    %28 = vector.load %arg5[%c0_13, %c0_14, %c0_15] : memref<1x16x64xf32, #tpu.memory_space<vmem>>, vector<1x16x64xf32>
    %29 = vector.shape_cast %28 : vector<1x16x64xf32> to vector<16x64xf32>
    %30 = arith.addf %27, %29 : vector<16x64xf32>
    %cst_16 = arith.constant 0.000000e+00 : f32
    %31 = vector.broadcast %cst_16 : f32 to vector<16x64xf32>
    %32 = arith.cmpf ogt, %30, %31 : vector<16x64xf32>
    %cst_17 = arith.constant 0.00999999977 : f32
    %33 = vector.broadcast %cst_17 : f32 to vector<16x64xf32>
    %34 = arith.mulf %33, %30 : vector<16x64xf32>
    %35 = arith.select %32, %30, %34 : vector<16x64xi1>, vector<16x64xf32>
    %c0_18 = arith.constant 0 : index
    %c0_19 = arith.constant 0 : index
    %c0_20 = arith.constant 0 : index
    %36 = vector.load %arg6[%c0_18, %c0_19, %c0_20] : memref<1x16x64xf32, #tpu.memory_space<vmem>>, vector<1x16x64xf32>
    %37 = vector.shape_cast %36 : vector<1x16x64xf32> to vector<16x64xf32>
    %38 = vector.shape_cast %35 : vector<16x64xf32> to vector<1x16x64xf32>
    tpu.vector_store %arg6[%c0_18, %c0_19, %c0_20], %38 {strides = array<i32>} : memref<1x16x64xf32, #tpu.memory_space<vmem>>, vector<1x16x64xf32>,
    return
  }
  func.func @transform_0(%arg0: i32) -> (i32, i32, i32) {
    %c0_i32 = arith.constant 0 : i32
    %c0_i32_0 = arith.constant 0 : i32
    %c0_i32_1 = arith.constant 0 : i32
    return %arg0, %c0_i32, %c0_i32_0 : i32, i32, i32
  }
  func.func @transform_1(%arg0: i32) -> (i32, i32) {
    %c0_i32 = arith.constant 0 : i32
    %c0_i32_0 = arith.constant 0 : i32
    %c0_i32_1 = arith.constant 0 : i32
    return %c0_i32, %c0_i32_0 : i32, i32
  }
  func.func @transform_2(%arg0: i32) -> (i32, i32) {
    %c0_i32 = arith.constant 0 : i32
    %c0_i32_0 = arith.constant 0 : i32
    %c0_i32_1 = arith.constant 0 : i32
    return %c0_i32, %c0_i32_0 : i32, i32
  }
  func.func @transform_3(%arg0: i32) -> (i32, i32) {
    %c0_i32 = arith.constant 0 : i32
    %c0_i32_0 = arith.constant 0 : i32
    %c0_i32_1 = arith.constant 0 : i32
    return %c0_i32, %c0_i32_0 : i32, i32
  }
  func.func @transform_4(%arg0: i32) -> (i32, i32, i32) {
    %c0_i32 = arith.constant 0 : i32
    %c0_i32_0 = arith.constant 0 : i32
    %c0_i32_1 = arith.constant 0 : i32
    return %arg0, %c0_i32, %c0_i32_0 : i32, i32, i32
  }
  func.func @transform_5(%arg0: i32) -> (i32, i32, i32) {
    %c0_i32 = arith.constant 0 : i32
    %c0_i32_0 = arith.constant 0 : i32
    %c0_i32_1 = arith.constant 0 : i32
    return %arg0, %c0_i32, %c0_i32_0 : i32, i32, i32
  }
}

module attributes {stable_mosaic.version = 11 : i64} {
  func.func @kernel(%arg0: i32, %arg1: memref<1x432x8xbf16, #tpu.memory_space<vmem>>, %arg2: memref<32x432xbf16, #tpu.memory_space<vmem>>, %arg3: memref<32x1xf32, #tpu.memory_space<vmem>>, %arg4: memref<32x1xf32, #tpu.memory_space<vmem>>, %arg5: memref<1x32x8xf32, #tpu.memory_space<vmem>>) attributes {dimension_semantics = [#tpu.dimension_semantics<parallel>], iteration_bounds = array<i64: 3>, scalar_prefetch = 0 : i64, scratch_operands = 0 : i64, tpu.core_type = #tpu.core_type<tc>, window_params = [{transform_indices = @transform_0, window_bounds = array<i64: 1, 432, 8>}, {pipeline_mode = #tpu.pipeline_mode<synchronous>, transform_indices = @transform_1, window_bounds = array<i64: 32, 432>}, {pipeline_mode = #tpu.pipeline_mode<synchronous>, transform_indices = @transform_2, window_bounds = array<i64: 32, 1>}, {pipeline_mode = #tpu.pipeline_mode<synchronous>, transform_indices = @transform_3, window_bounds = array<i64: 32, 1>}, {transform_indices = @transform_4, window_bounds = array<i64: 1, 32, 8>}]} {
    %c0 = arith.constant 0 : index
    %c0_0 = arith.constant 0 : index
    %c0_1 = arith.constant 0 : index
    %0 = vector.load %arg1[%c0, %c0_0, %c0_1] : memref<1x432x8xbf16, #tpu.memory_space<vmem>>, vector<1x432x8xbf16>
    %1 = vector.shape_cast %0 : vector<1x432x8xbf16> to vector<432x8xbf16>
    %c0_2 = arith.constant 0 : index
    %c0_3 = arith.constant 0 : index
    %2 = vector.load %arg2[%c0_2, %c0_3] : memref<32x432xbf16, #tpu.memory_space<vmem>>, vector<32x432xbf16>
    %cst = arith.constant dense<0.000000e+00> : vector<32x8xf32>
    %3 = tpu.matmul %2, %1, %cst {dimension_numbers = #tpu.dot_dimension_numbers<[1], [0], [0], [1], [0, 0, 1, 1], [], []>} : vector<32x432xbf16>, vector<432x8xbf16>, vector<32x8xf32> -> vector<32x8xf32>
    %c0_4 = arith.constant 0 : index
    %c0_5 = arith.constant 0 : index
    %4 = vector.load %arg3[%c0_4, %c0_5] : memref<32x1xf32, #tpu.memory_space<vmem>>, vector<32x1xf32>
    %c0_6 = arith.constant 0 : index
    %c0_7 = arith.constant 0 : index
    %5 = vector.load %arg4[%c0_6, %c0_7] : memref<32x1xf32, #tpu.memory_space<vmem>>, vector<32x1xf32>
    %cst_8 = arith.constant dense<0.000000e+00> : vector<32xf32>
    %6 = vector.multi_reduction <add>, %3, %cst_8 [1] : vector<32x8xf32> to vector<32xf32>
    %7 = vector.shape_cast %6 : vector<32xf32> to vector<32x1xf32>
    %cst_9 = arith.constant 8.000000e+00 : f32
    %8 = vector.broadcast %cst_9 : f32 to vector<32x1xf32>
    %9 = arith.divf %7, %8 : vector<32x1xf32>
    %10 = vector.broadcast %9 : vector<32x1xf32> to vector<32x8xf32>
    %11 = arith.subf %3, %10 : vector<32x8xf32>
    %12 = arith.mulf %11, %11 : vector<32x8xf32>
    %cst_10 = arith.constant dense<0.000000e+00> : vector<32xf32>
    %13 = vector.multi_reduction <add>, %12, %cst_10 [1] : vector<32x8xf32> to vector<32xf32>
    %14 = vector.shape_cast %13 : vector<32xf32> to vector<32x1xf32>
    %cst_11 = arith.constant 8.000000e+00 : f32
    %15 = vector.broadcast %cst_11 : f32 to vector<32x1xf32>
    %16 = arith.divf %14, %15 : vector<32x1xf32>
    %17 = vector.broadcast %9 : vector<32x1xf32> to vector<32x8xf32>
    %18 = arith.subf %3, %17 : vector<32x8xf32>
    %cst_12 = arith.constant 9.99999974E-6 : f32
    %19 = vector.broadcast %cst_12 : f32 to vector<32x1xf32>
    %20 = arith.addf %16, %19 : vector<32x1xf32>
    %21 = math.rsqrt %20 : vector<32x1xf32>
    %22 = vector.broadcast %21 : vector<32x1xf32> to vector<32x8xf32>
    %23 = arith.mulf %18, %22 : vector<32x8xf32>
    %24 = vector.broadcast %4 : vector<32x1xf32> to vector<32x8xf32>
    %25 = arith.mulf %23, %24 : vector<32x8xf32>
    %26 = vector.broadcast %5 : vector<32x1xf32> to vector<32x8xf32>
    %27 = arith.addf %25, %26 : vector<32x8xf32>
    %cst_13 = arith.constant 0.000000e+00 : f32
    %28 = vector.broadcast %cst_13 : f32 to vector<32x8xf32>
    %29 = arith.cmpf ogt, %27, %28 : vector<32x8xf32>
    %cst_14 = arith.constant 0.00999999977 : f32
    %30 = vector.broadcast %cst_14 : f32 to vector<32x8xf32>
    %31 = arith.mulf %30, %27 : vector<32x8xf32>
    %32 = arith.select %29, %27, %31 : vector<32x8xi1>, vector<32x8xf32>
    %c0_15 = arith.constant 0 : index
    %c0_16 = arith.constant 0 : index
    %c0_17 = arith.constant 0 : index
    %33 = vector.load %arg5[%c0_15, %c0_16, %c0_17] : memref<1x32x8xf32, #tpu.memory_space<vmem>>, vector<1x32x8xf32>
    %34 = vector.shape_cast %33 : vector<1x32x8xf32> to vector<32x8xf32>
    %35 = vector.shape_cast %32 : vector<32x8xf32> to vector<1x32x8xf32>
    tpu.vector_store %arg5[%c0_15, %c0_16, %c0_17], %35 {strides = array<i32>} : memref<1x32x8xf32, #tpu.memory_space<vmem>>, vector<1x32x8xf32>,
    return
  }
  func.func @transform_0(%arg0: i32) -> (i32, i32, i32) {
    %c0_i32 = arith.constant 0 : i32
    %c0_i32_0 = arith.constant 0 : i32
    %c0_i32_1 = arith.constant 0 : i32
    return %arg0, %c0_i32, %c0_i32_0 : i32, i32, i32
  }
  func.func @transform_1(%arg0: i32) -> (i32, i32) {
    %c0_i32 = arith.constant 0 : i32
    %c0_i32_0 = arith.constant 0 : i32
    %c0_i32_1 = arith.constant 0 : i32
    return %c0_i32, %c0_i32_0 : i32, i32
  }
  func.func @transform_2(%arg0: i32) -> (i32, i32) {
    %c0_i32 = arith.constant 0 : i32
    %c0_i32_0 = arith.constant 0 : i32
    %c0_i32_1 = arith.constant 0 : i32
    return %c0_i32, %c0_i32_0 : i32, i32
  }
  func.func @transform_3(%arg0: i32) -> (i32, i32) {
    %c0_i32 = arith.constant 0 : i32
    %c0_i32_0 = arith.constant 0 : i32
    %c0_i32_1 = arith.constant 0 : i32
    return %c0_i32, %c0_i32_0 : i32, i32
  }
  func.func @transform_4(%arg0: i32) -> (i32, i32, i32) {
    %c0_i32 = arith.constant 0 : i32
    %c0_i32_0 = arith.constant 0 : i32
    %c0_i32_1 = arith.constant 0 : i32
    return %arg0, %c0_i32, %c0_i32_0 : i32, i32, i32
  }
}

module attributes {stable_mosaic.version = 11 : i64} {
  func.func @kernel(%arg0: i32, %arg1: memref<1x16x8xbf16, #tpu.memory_space<vmem>>, %arg2: memref<32x16xbf16, #tpu.memory_space<vmem>>, %arg3: memref<32x1xf32, #tpu.memory_space<vmem>>, %arg4: memref<32x1xf32, #tpu.memory_space<vmem>>, %arg5: memref<1x32x8xf32, #tpu.memory_space<vmem>>) attributes {dimension_semantics = [#tpu.dimension_semantics<parallel>], iteration_bounds = array<i64: 3>, scalar_prefetch = 0 : i64, scratch_operands = 0 : i64, tpu.core_type = #tpu.core_type<tc>, window_params = [{transform_indices = @transform_0, window_bounds = array<i64: 1, 16, 8>}, {pipeline_mode = #tpu.pipeline_mode<synchronous>, transform_indices = @transform_1, window_bounds = array<i64: 32, 16>}, {pipeline_mode = #tpu.pipeline_mode<synchronous>, transform_indices = @transform_2, window_bounds = array<i64: 32, 1>}, {pipeline_mode = #tpu.pipeline_mode<synchronous>, transform_indices = @transform_3, window_bounds = array<i64: 32, 1>}, {transform_indices = @transform_4, window_bounds = array<i64: 1, 32, 8>}]} {
    %c0 = arith.constant 0 : index
    %c0_0 = arith.constant 0 : index
    %c0_1 = arith.constant 0 : index
    %0 = vector.load %arg1[%c0, %c0_0, %c0_1] : memref<1x16x8xbf16, #tpu.memory_space<vmem>>, vector<1x16x8xbf16>
    %1 = vector.shape_cast %0 : vector<1x16x8xbf16> to vector<16x8xbf16>
    %c0_2 = arith.constant 0 : index
    %c0_3 = arith.constant 0 : index
    %2 = vector.load %arg2[%c0_2, %c0_3] : memref<32x16xbf16, #tpu.memory_space<vmem>>, vector<32x16xbf16>
    %cst = arith.constant dense<0.000000e+00> : vector<32x8xf32>
    %3 = tpu.matmul %2, %1, %cst {dimension_numbers = #tpu.dot_dimension_numbers<[1], [0], [0], [1], [0, 0, 1, 1], [], []>} : vector<32x16xbf16>, vector<16x8xbf16>, vector<32x8xf32> -> vector<32x8xf32>
    %c0_4 = arith.constant 0 : index
    %c0_5 = arith.constant 0 : index
    %4 = vector.load %arg3[%c0_4, %c0_5] : memref<32x1xf32, #tpu.memory_space<vmem>>, vector<32x1xf32>
    %c0_6 = arith.constant 0 : index
    %c0_7 = arith.constant 0 : index
    %5 = vector.load %arg4[%c0_6, %c0_7] : memref<32x1xf32, #tpu.memory_space<vmem>>, vector<32x1xf32>
    %cst_8 = arith.constant dense<0.000000e+00> : vector<32xf32>
    %6 = vector.multi_reduction <add>, %3, %cst_8 [1] : vector<32x8xf32> to vector<32xf32>
    %7 = vector.shape_cast %6 : vector<32xf32> to vector<32x1xf32>
    %cst_9 = arith.constant 8.000000e+00 : f32
    %8 = vector.broadcast %cst_9 : f32 to vector<32x1xf32>
    %9 = arith.divf %7, %8 : vector<32x1xf32>
    %10 = vector.broadcast %9 : vector<32x1xf32> to vector<32x8xf32>
    %11 = arith.subf %3, %10 : vector<32x8xf32>
    %12 = arith.mulf %11, %11 : vector<32x8xf32>
    %cst_10 = arith.constant dense<0.000000e+00> : vector<32xf32>
    %13 = vector.multi_reduction <add>, %12, %cst_10 [1] : vector<32x8xf32> to vector<32xf32>
    %14 = vector.shape_cast %13 : vector<32xf32> to vector<32x1xf32>
    %cst_11 = arith.constant 8.000000e+00 : f32
    %15 = vector.broadcast %cst_11 : f32 to vector<32x1xf32>
    %16 = arith.divf %14, %15 : vector<32x1xf32>
    %17 = vector.broadcast %9 : vector<32x1xf32> to vector<32x8xf32>
    %18 = arith.subf %3, %17 : vector<32x8xf32>
    %cst_12 = arith.constant 9.99999974E-6 : f32
    %19 = vector.broadcast %cst_12 : f32 to vector<32x1xf32>
    %20 = arith.addf %16, %19 : vector<32x1xf32>
    %21 = math.rsqrt %20 : vector<32x1xf32>
    %22 = vector.broadcast %21 : vector<32x1xf32> to vector<32x8xf32>
    %23 = arith.mulf %18, %22 : vector<32x8xf32>
    %24 = vector.broadcast %4 : vector<32x1xf32> to vector<32x8xf32>
    %25 = arith.mulf %23, %24 : vector<32x8xf32>
    %26 = vector.broadcast %5 : vector<32x1xf32> to vector<32x8xf32>
    %27 = arith.addf %25, %26 : vector<32x8xf32>
    %c0_13 = arith.constant 0 : index
    %c0_14 = arith.constant 0 : index
    %c0_15 = arith.constant 0 : index
    %28 = vector.load %arg5[%c0_13, %c0_14, %c0_15] : memref<1x32x8xf32, #tpu.memory_space<vmem>>, vector<1x32x8xf32>
    %29 = vector.shape_cast %28 : vector<1x32x8xf32> to vector<32x8xf32>
    %30 = vector.shape_cast %27 : vector<32x8xf32> to vector<1x32x8xf32>
    tpu.vector_store %arg5[%c0_13, %c0_14, %c0_15], %30 {strides = array<i32>} : memref<1x32x8xf32, #tpu.memory_space<vmem>>, vector<1x32x8xf32>,
    return
  }
  func.func @transform_0(%arg0: i32) -> (i32, i32, i32) {
    %c0_i32 = arith.constant 0 : i32
    %c0_i32_0 = arith.constant 0 : i32
    %c0_i32_1 = arith.constant 0 : i32
    return %arg0, %c0_i32, %c0_i32_0 : i32, i32, i32
  }
  func.func @transform_1(%arg0: i32) -> (i32, i32) {
    %c0_i32 = arith.constant 0 : i32
    %c0_i32_0 = arith.constant 0 : i32
    %c0_i32_1 = arith.constant 0 : i32
    return %c0_i32, %c0_i32_0 : i32, i32
  }
  func.func @transform_2(%arg0: i32) -> (i32, i32) {
    %c0_i32 = arith.constant 0 : i32
    %c0_i32_0 = arith.constant 0 : i32
    %c0_i32_1 = arith.constant 0 : i32
    return %c0_i32, %c0_i32_0 : i32, i32
  }
  func.func @transform_3(%arg0: i32) -> (i32, i32) {
    %c0_i32 = arith.constant 0 : i32
    %c0_i32_0 = arith.constant 0 : i32
    %c0_i32_1 = arith.constant 0 : i32
    return %c0_i32, %c0_i32_0 : i32, i32
  }
  func.func @transform_4(%arg0: i32) -> (i32, i32, i32) {
    %c0_i32 = arith.constant 0 : i32
    %c0_i32_0 = arith.constant 0 : i32
    %c0_i32_1 = arith.constant 0 : i32
    return %arg0, %c0_i32, %c0_i32_0 : i32, i32, i32
  }
}

module attributes {stable_mosaic.version = 11 : i64} {
  func.func @kernel(%arg0: i32, %arg1: memref<1x864x8xbf16, #tpu.memory_space<vmem>>, %arg2: memref<32x864xbf16, #tpu.memory_space<vmem>>, %arg3: memref<32x1xf32, #tpu.memory_space<vmem>>, %arg4: memref<32x1xf32, #tpu.memory_space<vmem>>, %arg5: memref<1x32x8xf32, #tpu.memory_space<vmem>>, %arg6: memref<1x32x8xf32, #tpu.memory_space<vmem>>) attributes {dimension_semantics = [#tpu.dimension_semantics<parallel>], iteration_bounds = array<i64: 3>, scalar_prefetch = 0 : i64, scratch_operands = 0 : i64, tpu.core_type = #tpu.core_type<tc>, window_params = [{transform_indices = @transform_0, window_bounds = array<i64: 1, 864, 8>}, {pipeline_mode = #tpu.pipeline_mode<synchronous>, transform_indices = @transform_1, window_bounds = array<i64: 32, 864>}, {pipeline_mode = #tpu.pipeline_mode<synchronous>, transform_indices = @transform_2, window_bounds = array<i64: 32, 1>}, {pipeline_mode = #tpu.pipeline_mode<synchronous>, transform_indices = @transform_3, window_bounds = array<i64: 32, 1>}, {transform_indices = @transform_4, window_bounds = array<i64: 1, 32, 8>}, {transform_indices = @transform_5, window_bounds = array<i64: 1, 32, 8>}]} {
    %c0 = arith.constant 0 : index
    %c0_0 = arith.constant 0 : index
    %c0_1 = arith.constant 0 : index
    %0 = vector.load %arg1[%c0, %c0_0, %c0_1] : memref<1x864x8xbf16, #tpu.memory_space<vmem>>, vector<1x864x8xbf16>
    %1 = vector.shape_cast %0 : vector<1x864x8xbf16> to vector<864x8xbf16>
    %c0_2 = arith.constant 0 : index
    %c0_3 = arith.constant 0 : index
    %2 = vector.load %arg2[%c0_2, %c0_3] : memref<32x864xbf16, #tpu.memory_space<vmem>>, vector<32x864xbf16>
    %cst = arith.constant dense<0.000000e+00> : vector<32x8xf32>
    %3 = tpu.matmul %2, %1, %cst {dimension_numbers = #tpu.dot_dimension_numbers<[1], [0], [0], [1], [0, 0, 1, 1], [], []>} : vector<32x864xbf16>, vector<864x8xbf16>, vector<32x8xf32> -> vector<32x8xf32>
    %c0_4 = arith.constant 0 : index
    %c0_5 = arith.constant 0 : index
    %4 = vector.load %arg3[%c0_4, %c0_5] : memref<32x1xf32, #tpu.memory_space<vmem>>, vector<32x1xf32>
    %c0_6 = arith.constant 0 : index
    %c0_7 = arith.constant 0 : index
    %5 = vector.load %arg4[%c0_6, %c0_7] : memref<32x1xf32, #tpu.memory_space<vmem>>, vector<32x1xf32>
    %cst_8 = arith.constant dense<0.000000e+00> : vector<32xf32>
    %6 = vector.multi_reduction <add>, %3, %cst_8 [1] : vector<32x8xf32> to vector<32xf32>
    %7 = vector.shape_cast %6 : vector<32xf32> to vector<32x1xf32>
    %cst_9 = arith.constant 8.000000e+00 : f32
    %8 = vector.broadcast %cst_9 : f32 to vector<32x1xf32>
    %9 = arith.divf %7, %8 : vector<32x1xf32>
    %10 = vector.broadcast %9 : vector<32x1xf32> to vector<32x8xf32>
    %11 = arith.subf %3, %10 : vector<32x8xf32>
    %12 = arith.mulf %11, %11 : vector<32x8xf32>
    %cst_10 = arith.constant dense<0.000000e+00> : vector<32xf32>
    %13 = vector.multi_reduction <add>, %12, %cst_10 [1] : vector<32x8xf32> to vector<32xf32>
    %14 = vector.shape_cast %13 : vector<32xf32> to vector<32x1xf32>
    %cst_11 = arith.constant 8.000000e+00 : f32
    %15 = vector.broadcast %cst_11 : f32 to vector<32x1xf32>
    %16 = arith.divf %14, %15 : vector<32x1xf32>
    %17 = vector.broadcast %9 : vector<32x1xf32> to vector<32x8xf32>
    %18 = arith.subf %3, %17 : vector<32x8xf32>
    %cst_12 = arith.constant 9.99999974E-6 : f32
    %19 = vector.broadcast %cst_12 : f32 to vector<32x1xf32>
    %20 = arith.addf %16, %19 : vector<32x1xf32>
    %21 = math.rsqrt %20 : vector<32x1xf32>
    %22 = vector.broadcast %21 : vector<32x1xf32> to vector<32x8xf32>
    %23 = arith.mulf %18, %22 : vector<32x8xf32>
    %24 = vector.broadcast %4 : vector<32x1xf32> to vector<32x8xf32>
    %25 = arith.mulf %23, %24 : vector<32x8xf32>
    %26 = vector.broadcast %5 : vector<32x1xf32> to vector<32x8xf32>
    %27 = arith.addf %25, %26 : vector<32x8xf32>
    %c0_13 = arith.constant 0 : index
    %c0_14 = arith.constant 0 : index
    %c0_15 = arith.constant 0 : index
    %28 = vector.load %arg5[%c0_13, %c0_14, %c0_15] : memref<1x32x8xf32, #tpu.memory_space<vmem>>, vector<1x32x8xf32>
    %29 = vector.shape_cast %28 : vector<1x32x8xf32> to vector<32x8xf32>
    %30 = arith.addf %27, %29 : vector<32x8xf32>
    %cst_16 = arith.constant 0.000000e+00 : f32
    %31 = vector.broadcast %cst_16 : f32 to vector<32x8xf32>
    %32 = arith.cmpf ogt, %30, %31 : vector<32x8xf32>
    %cst_17 = arith.constant 0.00999999977 : f32
    %33 = vector.broadcast %cst_17 : f32 to vector<32x8xf32>
    %34 = arith.mulf %33, %30 : vector<32x8xf32>
    %35 = arith.select %32, %30, %34 : vector<32x8xi1>, vector<32x8xf32>
    %c0_18 = arith.constant 0 : index
    %c0_19 = arith.constant 0 : index
    %c0_20 = arith.constant 0 : index
    %36 = vector.load %arg6[%c0_18, %c0_19, %c0_20] : memref<1x32x8xf32, #tpu.memory_space<vmem>>, vector<1x32x8xf32>
    %37 = vector.shape_cast %36 : vector<1x32x8xf32> to vector<32x8xf32>
    %38 = vector.shape_cast %35 : vector<32x8xf32> to vector<1x32x8xf32>
    tpu.vector_store %arg6[%c0_18, %c0_19, %c0_20], %38 {strides = array<i32>} : memref<1x32x8xf32, #tpu.memory_space<vmem>>, vector<1x32x8xf32>,
    return
  }
  func.func @transform_0(%arg0: i32) -> (i32, i32, i32) {
    %c0_i32 = arith.constant 0 : i32
    %c0_i32_0 = arith.constant 0 : i32
    %c0_i32_1 = arith.constant 0 : i32
    return %arg0, %c0_i32, %c0_i32_0 : i32, i32, i32
  }
  func.func @transform_1(%arg0: i32) -> (i32, i32) {
    %c0_i32 = arith.constant 0 : i32
    %c0_i32_0 = arith.constant 0 : i32
    %c0_i32_1 = arith.constant 0 : i32
    return %c0_i32, %c0_i32_0 : i32, i32
  }
  func.func @transform_2(%arg0: i32) -> (i32, i32) {
    %c0_i32 = arith.constant 0 : i32
    %c0_i32_0 = arith.constant 0 : i32
    %c0_i32_1 = arith.constant 0 : i32
    return %c0_i32, %c0_i32_0 : i32, i32
  }
  func.func @transform_3(%arg0: i32) -> (i32, i32) {
    %c0_i32 = arith.constant 0 : i32
    %c0_i32_0 = arith.constant 0 : i32
    %c0_i32_1 = arith.constant 0 : i32
    return %c0_i32, %c0_i32_0 : i32, i32
  }
  func.func @transform_4(%arg0: i32) -> (i32, i32, i32) {
    %c0_i32 = arith.constant 0 : i32
    %c0_i32_0 = arith.constant 0 : i32
    %c0_i32_1 = arith.constant 0 : i32
    return %arg0, %c0_i32, %c0_i32_0 : i32, i32, i32
  }
  func.func @transform_5(%arg0: i32) -> (i32, i32, i32) {
    %c0_i32 = arith.constant 0 : i32
    %c0_i32_0 = arith.constant 0 : i32
    %c0_i32_1 = arith.constant 0 : i32
    return %arg0, %c0_i32, %c0_i32_0 : i32, i32, i32
  }
}

module attributes {stable_mosaic.version = 11 : i64} {
  func.func @kernel(%arg0: i32, %arg1: memref<1x32x8xbf16, #tpu.memory_space<vmem>>, %arg2: memref<128x32xbf16, #tpu.memory_space<vmem>>, %arg3: memref<1x128x8xf32, #tpu.memory_space<vmem>>) attributes {dimension_semantics = [#tpu.dimension_semantics<parallel>], iteration_bounds = array<i64: 3>, scalar_prefetch = 0 : i64, scratch_operands = 0 : i64, tpu.core_type = #tpu.core_type<tc>, window_params = [{transform_indices = @transform_0, window_bounds = array<i64: 1, 32, 8>}, {pipeline_mode = #tpu.pipeline_mode<synchronous>, transform_indices = @transform_1, window_bounds = array<i64: 128, 32>}, {transform_indices = @transform_2, window_bounds = array<i64: 1, 128, 8>}]} {
    %c0 = arith.constant 0 : index
    %c0_0 = arith.constant 0 : index
    %c0_1 = arith.constant 0 : index
    %0 = vector.load %arg1[%c0, %c0_0, %c0_1] : memref<1x32x8xbf16, #tpu.memory_space<vmem>>, vector<1x32x8xbf16>
    %1 = vector.shape_cast %0 : vector<1x32x8xbf16> to vector<32x8xbf16>
    %c0_2 = arith.constant 0 : index
    %c0_3 = arith.constant 0 : index
    %2 = vector.load %arg2[%c0_2, %c0_3] : memref<128x32xbf16, #tpu.memory_space<vmem>>, vector<128x32xbf16>
    %cst = arith.constant dense<0.000000e+00> : vector<128x8xf32>
    %3 = tpu.matmul %2, %1, %cst {dimension_numbers = #tpu.dot_dimension_numbers<[1], [0], [0], [1], [0, 0, 1, 1], [], []>} : vector<128x32xbf16>, vector<32x8xbf16>, vector<128x8xf32> -> vector<128x8xf32>
    %c0_4 = arith.constant 0 : index
    %c0_5 = arith.constant 0 : index
    %c0_6 = arith.constant 0 : index
    %4 = vector.load %arg3[%c0_4, %c0_5, %c0_6] : memref<1x128x8xf32, #tpu.memory_space<vmem>>, vector<1x128x8xf32>
    %5 = vector.shape_cast %4 : vector<1x128x8xf32> to vector<128x8xf32>
    %6 = vector.shape_cast %3 : vector<128x8xf32> to vector<1x128x8xf32>
    tpu.vector_store %arg3[%c0_4, %c0_5, %c0_6], %6 {strides = array<i32>} : memref<1x128x8xf32, #tpu.memory_space<vmem>>, vector<1x128x8xf32>,
    return
  }
  func.func @transform_0(%arg0: i32) -> (i32, i32, i32) {
    %c0_i32 = arith.constant 0 : i32
    %c0_i32_0 = arith.constant 0 : i32
    %c0_i32_1 = arith.constant 0 : i32
    return %arg0, %c0_i32, %c0_i32_0 : i32, i32, i32
  }
  func.func @transform_1(%arg0: i32) -> (i32, i32) {
    %c0_i32 = arith.constant 0 : i32
    %c0_i32_0 = arith.constant 0 : i32
    %c0_i32_1 = arith.constant 0 : i32
    return %c0_i32, %c0_i32_0 : i32, i32
  }
  func.func @transform_2(%arg0: i32) -> (i32, i32, i32) {
    %c0_i32 = arith.constant 0 : i32
    %c0_i32_0 = arith.constant 0 : i32
    %c0_i32_1 = arith.constant 0 : i32
    return %arg0, %c0_i32, %c0_i32_0 : i32, i32, i32
  }
}

module attributes {stable_mosaic.version = 11 : i64} {
  func.func @kernel(%arg0: i32, %arg1: memref<1x432x64xbf16, #tpu.memory_space<vmem>>, %arg2: memref<16x432xbf16, #tpu.memory_space<vmem>>, %arg3: memref<1x432x64xbf16, #tpu.memory_space<vmem>>, %arg4: memref<16x432xbf16, #tpu.memory_space<vmem>>, %arg5: memref<16x1xf32, #tpu.memory_space<vmem>>, %arg6: memref<16x1xf32, #tpu.memory_space<vmem>>, %arg7: memref<1x16x64xf32, #tpu.memory_space<vmem>>) attributes {dimension_semantics = [#tpu.dimension_semantics<parallel>], iteration_bounds = array<i64: 3>, scalar_prefetch = 0 : i64, scratch_operands = 0 : i64, tpu.core_type = #tpu.core_type<tc>, window_params = [{transform_indices = @transform_0, window_bounds = array<i64: 1, 432, 64>}, {pipeline_mode = #tpu.pipeline_mode<synchronous>, transform_indices = @transform_1, window_bounds = array<i64: 16, 432>}, {transform_indices = @transform_2, window_bounds = array<i64: 1, 432, 64>}, {pipeline_mode = #tpu.pipeline_mode<synchronous>, transform_indices = @transform_3, window_bounds = array<i64: 16, 432>}, {pipeline_mode = #tpu.pipeline_mode<synchronous>, transform_indices = @transform_4, window_bounds = array<i64: 16, 1>}, {pipeline_mode = #tpu.pipeline_mode<synchronous>, transform_indices = @transform_5, window_bounds = array<i64: 16, 1>}, {transform_indices = @transform_6, window_bounds = array<i64: 1, 16, 64>}]} {
    %c0 = arith.constant 0 : index
    %c0_0 = arith.constant 0 : index
    %c0_1 = arith.constant 0 : index
    %0 = vector.load %arg1[%c0, %c0_0, %c0_1] : memref<1x432x64xbf16, #tpu.memory_space<vmem>>, vector<1x432x64xbf16>
    %1 = vector.shape_cast %0 : vector<1x432x64xbf16> to vector<432x64xbf16>
    %c0_2 = arith.constant 0 : index
    %c0_3 = arith.constant 0 : index
    %2 = vector.load %arg2[%c0_2, %c0_3] : memref<16x432xbf16, #tpu.memory_space<vmem>>, vector<16x432xbf16>
    %cst = arith.constant dense<0.000000e+00> : vector<16x64xf32>
    %3 = tpu.matmul %2, %1, %cst {dimension_numbers = #tpu.dot_dimension_numbers<[1], [0], [0], [1], [0, 0, 1, 1], [], []>} : vector<16x432xbf16>, vector<432x64xbf16>, vector<16x64xf32> -> vector<16x64xf32>
    %c0_4 = arith.constant 0 : index
    %c0_5 = arith.constant 0 : index
    %c0_6 = arith.constant 0 : index
    %4 = vector.load %arg3[%c0_4, %c0_5, %c0_6] : memref<1x432x64xbf16, #tpu.memory_space<vmem>>, vector<1x432x64xbf16>
    %5 = vector.shape_cast %4 : vector<1x432x64xbf16> to vector<432x64xbf16>
    %c0_7 = arith.constant 0 : index
    %c0_8 = arith.constant 0 : index
    %6 = vector.load %arg4[%c0_7, %c0_8] : memref<16x432xbf16, #tpu.memory_space<vmem>>, vector<16x432xbf16>
    %cst_9 = arith.constant dense<0.000000e+00> : vector<16x64xf32>
    %7 = tpu.matmul %6, %5, %cst_9 {dimension_numbers = #tpu.dot_dimension_numbers<[1], [0], [0], [1], [0, 0, 1, 1], [], []>} : vector<16x432xbf16>, vector<432x64xbf16>, vector<16x64xf32> -> vector<16x64xf32>
    %8 = arith.addf %3, %7 : vector<16x64xf32>
    %c0_10 = arith.constant 0 : index
    %c0_11 = arith.constant 0 : index
    %9 = vector.load %arg5[%c0_10, %c0_11] : memref<16x1xf32, #tpu.memory_space<vmem>>, vector<16x1xf32>
    %c0_12 = arith.constant 0 : index
    %c0_13 = arith.constant 0 : index
    %10 = vector.load %arg6[%c0_12, %c0_13] : memref<16x1xf32, #tpu.memory_space<vmem>>, vector<16x1xf32>
    %cst_14 = arith.constant dense<0.000000e+00> : vector<16xf32>
    %11 = vector.multi_reduction <add>, %8, %cst_14 [1] : vector<16x64xf32> to vector<16xf32>
    %12 = vector.shape_cast %11 : vector<16xf32> to vector<16x1xf32>
    %cst_15 = arith.constant 6.400000e+01 : f32
    %13 = vector.broadcast %cst_15 : f32 to vector<16x1xf32>
    %14 = arith.divf %12, %13 : vector<16x1xf32>
    %15 = vector.broadcast %14 : vector<16x1xf32> to vector<16x64xf32>
    %16 = arith.subf %8, %15 : vector<16x64xf32>
    %17 = arith.mulf %16, %16 : vector<16x64xf32>
    %cst_16 = arith.constant dense<0.000000e+00> : vector<16xf32>
    %18 = vector.multi_reduction <add>, %17, %cst_16 [1] : vector<16x64xf32> to vector<16xf32>
    %19 = vector.shape_cast %18 : vector<16xf32> to vector<16x1xf32>
    %cst_17 = arith.constant 6.400000e+01 : f32
    %20 = vector.broadcast %cst_17 : f32 to vector<16x1xf32>
    %21 = arith.divf %19, %20 : vector<16x1xf32>
    %22 = vector.broadcast %14 : vector<16x1xf32> to vector<16x64xf32>
    %23 = arith.subf %8, %22 : vector<16x64xf32>
    %cst_18 = arith.constant 9.99999974E-6 : f32
    %24 = vector.broadcast %cst_18 : f32 to vector<16x1xf32>
    %25 = arith.addf %21, %24 : vector<16x1xf32>
    %26 = math.rsqrt %25 : vector<16x1xf32>
    %27 = vector.broadcast %26 : vector<16x1xf32> to vector<16x64xf32>
    %28 = arith.mulf %23, %27 : vector<16x64xf32>
    %29 = vector.broadcast %9 : vector<16x1xf32> to vector<16x64xf32>
    %30 = arith.mulf %28, %29 : vector<16x64xf32>
    %31 = vector.broadcast %10 : vector<16x1xf32> to vector<16x64xf32>
    %32 = arith.addf %30, %31 : vector<16x64xf32>
    %cst_19 = arith.constant 0.000000e+00 : f32
    %33 = vector.broadcast %cst_19 : f32 to vector<16x64xf32>
    %34 = arith.cmpf ogt, %32, %33 : vector<16x64xf32>
    %cst_20 = arith.constant 0.00999999977 : f32
    %35 = vector.broadcast %cst_20 : f32 to vector<16x64xf32>
    %36 = arith.mulf %35, %32 : vector<16x64xf32>
    %37 = arith.select %34, %32, %36 : vector<16x64xi1>, vector<16x64xf32>
    %c0_21 = arith.constant 0 : index
    %c0_22 = arith.constant 0 : index
    %c0_23 = arith.constant 0 : index
    %38 = vector.load %arg7[%c0_21, %c0_22, %c0_23] : memref<1x16x64xf32, #tpu.memory_space<vmem>>, vector<1x16x64xf32>
    %39 = vector.shape_cast %38 : vector<1x16x64xf32> to vector<16x64xf32>
    %40 = vector.shape_cast %37 : vector<16x64xf32> to vector<1x16x64xf32>
    tpu.vector_store %arg7[%c0_21, %c0_22, %c0_23], %40 {strides = array<i32>} : memref<1x16x64xf32, #tpu.memory_space<vmem>>, vector<1x16x64xf32>,
    return
  }
  func.func @transform_0(%arg0: i32) -> (i32, i32, i32) {
    %c0_i32 = arith.constant 0 : i32
    %c0_i32_0 = arith.constant 0 : i32
    %c0_i32_1 = arith.constant 0 : i32
    return %arg0, %c0_i32, %c0_i32_0 : i32, i32, i32
  }
  func.func @transform_1(%arg0: i32) -> (i32, i32) {
    %c0_i32 = arith.constant 0 : i32
    %c0_i32_0 = arith.constant 0 : i32
    %c0_i32_1 = arith.constant 0 : i32
    return %c0_i32, %c0_i32_0 : i32, i32
  }
  func.func @transform_2(%arg0: i32) -> (i32, i32, i32) {
    %c0_i32 = arith.constant 0 : i32
    %c0_i32_0 = arith.constant 0 : i32
    %c0_i32_1 = arith.constant 0 : i32
    return %arg0, %c0_i32, %c0_i32_0 : i32, i32, i32
  }
  func.func @transform_3(%arg0: i32) -> (i32, i32) {
    %c0_i32 = arith.constant 0 : i32
    %c0_i32_0 = arith.constant 0 : i32
    %c0_i32_1 = arith.constant 0 : i32
    return %c0_i32, %c0_i32_0 : i32, i32
  }
  func.func @transform_4(%arg0: i32) -> (i32, i32) {
    %c0_i32 = arith.constant 0 : i32
    %c0_i32_0 = arith.constant 0 : i32
    %c0_i32_1 = arith.constant 0 : i32
    return %c0_i32, %c0_i32_0 : i32, i32
  }
  func.func @transform_5(%arg0: i32) -> (i32, i32) {
    %c0_i32 = arith.constant 0 : i32
    %c0_i32_0 = arith.constant 0 : i32
    %c0_i32_1 = arith.constant 0 : i32
    return %c0_i32, %c0_i32_0 : i32, i32
  }
  func.func @transform_6(%arg0: i32) -> (i32, i32, i32) {
    %c0_i32 = arith.constant 0 : i32
    %c0_i32_0 = arith.constant 0 : i32
    %c0_i32_1 = arith.constant 0 : i32
    return %arg0, %c0_i32, %c0_i32_0 : i32, i32, i32
  }
}

module attributes {stable_mosaic.version = 11 : i64} {
  func.func @kernel(%arg0: i32, %arg1: memref<1x432x64xbf16, #tpu.memory_space<vmem>>, %arg2: memref<16x432xbf16, #tpu.memory_space<vmem>>, %arg3: memref<16x1xf32, #tpu.memory_space<vmem>>, %arg4: memref<16x1xf32, #tpu.memory_space<vmem>>, %arg5: memref<1x16x64xf32, #tpu.memory_space<vmem>>) attributes {dimension_semantics = [#tpu.dimension_semantics<parallel>], iteration_bounds = array<i64: 3>, scalar_prefetch = 0 : i64, scratch_operands = 0 : i64, tpu.core_type = #tpu.core_type<tc>, window_params = [{transform_indices = @transform_0, window_bounds = array<i64: 1, 432, 64>}, {pipeline_mode = #tpu.pipeline_mode<synchronous>, transform_indices = @transform_1, window_bounds = array<i64: 16, 432>}, {pipeline_mode = #tpu.pipeline_mode<synchronous>, transform_indices = @transform_2, window_bounds = array<i64: 16, 1>}, {pipeline_mode = #tpu.pipeline_mode<synchronous>, transform_indices = @transform_3, window_bounds = array<i64: 16, 1>}, {transform_indices = @transform_4, window_bounds = array<i64: 1, 16, 64>}]} {
    %c0 = arith.constant 0 : index
    %c0_0 = arith.constant 0 : index
    %c0_1 = arith.constant 0 : index
    %0 = vector.load %arg1[%c0, %c0_0, %c0_1] : memref<1x432x64xbf16, #tpu.memory_space<vmem>>, vector<1x432x64xbf16>
    %1 = vector.shape_cast %0 : vector<1x432x64xbf16> to vector<432x64xbf16>
    %c0_2 = arith.constant 0 : index
    %c0_3 = arith.constant 0 : index
    %2 = vector.load %arg2[%c0_2, %c0_3] : memref<16x432xbf16, #tpu.memory_space<vmem>>, vector<16x432xbf16>
    %cst = arith.constant dense<0.000000e+00> : vector<16x64xf32>
    %3 = tpu.matmul %2, %1, %cst {dimension_numbers = #tpu.dot_dimension_numbers<[1], [0], [0], [1], [0, 0, 1, 1], [], []>} : vector<16x432xbf16>, vector<432x64xbf16>, vector<16x64xf32> -> vector<16x64xf32>
    %c0_4 = arith.constant 0 : index
    %c0_5 = arith.constant 0 : index
    %4 = vector.load %arg3[%c0_4, %c0_5] : memref<16x1xf32, #tpu.memory_space<vmem>>, vector<16x1xf32>
    %c0_6 = arith.constant 0 : index
    %c0_7 = arith.constant 0 : index
    %5 = vector.load %arg4[%c0_6, %c0_7] : memref<16x1xf32, #tpu.memory_space<vmem>>, vector<16x1xf32>
    %cst_8 = arith.constant dense<0.000000e+00> : vector<16xf32>
    %6 = vector.multi_reduction <add>, %3, %cst_8 [1] : vector<16x64xf32> to vector<16xf32>
    %7 = vector.shape_cast %6 : vector<16xf32> to vector<16x1xf32>
    %cst_9 = arith.constant 6.400000e+01 : f32
    %8 = vector.broadcast %cst_9 : f32 to vector<16x1xf32>
    %9 = arith.divf %7, %8 : vector<16x1xf32>
    %10 = vector.broadcast %9 : vector<16x1xf32> to vector<16x64xf32>
    %11 = arith.subf %3, %10 : vector<16x64xf32>
    %12 = arith.mulf %11, %11 : vector<16x64xf32>
    %cst_10 = arith.constant dense<0.000000e+00> : vector<16xf32>
    %13 = vector.multi_reduction <add>, %12, %cst_10 [1] : vector<16x64xf32> to vector<16xf32>
    %14 = vector.shape_cast %13 : vector<16xf32> to vector<16x1xf32>
    %cst_11 = arith.constant 6.400000e+01 : f32
    %15 = vector.broadcast %cst_11 : f32 to vector<16x1xf32>
    %16 = arith.divf %14, %15 : vector<16x1xf32>
    %17 = vector.broadcast %9 : vector<16x1xf32> to vector<16x64xf32>
    %18 = arith.subf %3, %17 : vector<16x64xf32>
    %cst_12 = arith.constant 9.99999974E-6 : f32
    %19 = vector.broadcast %cst_12 : f32 to vector<16x1xf32>
    %20 = arith.addf %16, %19 : vector<16x1xf32>
    %21 = math.rsqrt %20 : vector<16x1xf32>
    %22 = vector.broadcast %21 : vector<16x1xf32> to vector<16x64xf32>
    %23 = arith.mulf %18, %22 : vector<16x64xf32>
    %24 = vector.broadcast %4 : vector<16x1xf32> to vector<16x64xf32>
    %25 = arith.mulf %23, %24 : vector<16x64xf32>
    %26 = vector.broadcast %5 : vector<16x1xf32> to vector<16x64xf32>
    %27 = arith.addf %25, %26 : vector<16x64xf32>
    %cst_13 = arith.constant 0.000000e+00 : f32
    %28 = vector.broadcast %cst_13 : f32 to vector<16x64xf32>
    %29 = arith.cmpf ogt, %27, %28 : vector<16x64xf32>
    %cst_14 = arith.constant 0.00999999977 : f32
    %30 = vector.broadcast %cst_14 : f32 to vector<16x64xf32>
    %31 = arith.mulf %30, %27 : vector<16x64xf32>
    %32 = arith.select %29, %27, %31 : vector<16x64xi1>, vector<16x64xf32>
    %c0_15 = arith.constant 0 : index
    %c0_16 = arith.constant 0 : index
    %c0_17 = arith.constant 0 : index
    %33 = vector.load %arg5[%c0_15, %c0_16, %c0_17] : memref<1x16x64xf32, #tpu.memory_space<vmem>>, vector<1x16x64xf32>
    %34 = vector.shape_cast %33 : vector<1x16x64xf32> to vector<16x64xf32>
    %35 = vector.shape_cast %32 : vector<16x64xf32> to vector<1x16x64xf32>
    tpu.vector_store %arg5[%c0_15, %c0_16, %c0_17], %35 {strides = array<i32>} : memref<1x16x64xf32, #tpu.memory_space<vmem>>, vector<1x16x64xf32>,
    return
  }
  func.func @transform_0(%arg0: i32) -> (i32, i32, i32) {
    %c0_i32 = arith.constant 0 : i32
    %c0_i32_0 = arith.constant 0 : i32
    %c0_i32_1 = arith.constant 0 : i32
    return %arg0, %c0_i32, %c0_i32_0 : i32, i32, i32
  }
  func.func @transform_1(%arg0: i32) -> (i32, i32) {
    %c0_i32 = arith.constant 0 : i32
    %c0_i32_0 = arith.constant 0 : i32
    %c0_i32_1 = arith.constant 0 : i32
    return %c0_i32, %c0_i32_0 : i32, i32
  }
  func.func @transform_2(%arg0: i32) -> (i32, i32) {
    %c0_i32 = arith.constant 0 : i32
    %c0_i32_0 = arith.constant 0 : i32
    %c0_i32_1 = arith.constant 0 : i32
    return %c0_i32, %c0_i32_0 : i32, i32
  }
  func.func @transform_3(%arg0: i32) -> (i32, i32) {
    %c0_i32 = arith.constant 0 : i32
    %c0_i32_0 = arith.constant 0 : i32
    %c0_i32_1 = arith.constant 0 : i32
    return %c0_i32, %c0_i32_0 : i32, i32
  }
  func.func @transform_4(%arg0: i32) -> (i32, i32, i32) {
    %c0_i32 = arith.constant 0 : i32
    %c0_i32_0 = arith.constant 0 : i32
    %c0_i32_1 = arith.constant 0 : i32
    return %arg0, %c0_i32, %c0_i32_0 : i32, i32, i32
  }
}

module attributes {stable_mosaic.version = 11 : i64} {
  func.func @kernel(%arg0: i32, %arg1: memref<1x16x64xbf16, #tpu.memory_space<vmem>>, %arg2: memref<64x16xbf16, #tpu.memory_space<vmem>>, %arg3: memref<1x64x64xf32, #tpu.memory_space<vmem>>) attributes {dimension_semantics = [#tpu.dimension_semantics<parallel>], iteration_bounds = array<i64: 3>, scalar_prefetch = 0 : i64, scratch_operands = 0 : i64, tpu.core_type = #tpu.core_type<tc>, window_params = [{transform_indices = @transform_0, window_bounds = array<i64: 1, 16, 64>}, {pipeline_mode = #tpu.pipeline_mode<synchronous>, transform_indices = @transform_1, window_bounds = array<i64: 64, 16>}, {transform_indices = @transform_2, window_bounds = array<i64: 1, 64, 64>}]} {
    %c0 = arith.constant 0 : index
    %c0_0 = arith.constant 0 : index
    %c0_1 = arith.constant 0 : index
    %0 = vector.load %arg1[%c0, %c0_0, %c0_1] : memref<1x16x64xbf16, #tpu.memory_space<vmem>>, vector<1x16x64xbf16>
    %1 = vector.shape_cast %0 : vector<1x16x64xbf16> to vector<16x64xbf16>
    %c0_2 = arith.constant 0 : index
    %c0_3 = arith.constant 0 : index
    %2 = vector.load %arg2[%c0_2, %c0_3] : memref<64x16xbf16, #tpu.memory_space<vmem>>, vector<64x16xbf16>
    %cst = arith.constant dense<0.000000e+00> : vector<64x64xf32>
    %3 = tpu.matmul %2, %1, %cst {dimension_numbers = #tpu.dot_dimension_numbers<[1], [0], [0], [1], [0, 0, 1, 1], [], []>} : vector<64x16xbf16>, vector<16x64xbf16>, vector<64x64xf32> -> vector<64x64xf32>
    %c0_4 = arith.constant 0 : index
    %c0_5 = arith.constant 0 : index
    %c0_6 = arith.constant 0 : index
    %4 = vector.load %arg3[%c0_4, %c0_5, %c0_6] : memref<1x64x64xf32, #tpu.memory_space<vmem>>, vector<1x64x64xf32>
    %5 = vector.shape_cast %4 : vector<1x64x64xf32> to vector<64x64xf32>
    %6 = vector.shape_cast %3 : vector<64x64xf32> to vector<1x64x64xf32>
    tpu.vector_store %arg3[%c0_4, %c0_5, %c0_6], %6 {strides = array<i32>} : memref<1x64x64xf32, #tpu.memory_space<vmem>>, vector<1x64x64xf32>,
    return
  }
  func.func @transform_0(%arg0: i32) -> (i32, i32, i32) {
    %c0_i32 = arith.constant 0 : i32
    %c0_i32_0 = arith.constant 0 : i32
    %c0_i32_1 = arith.constant 0 : i32
    return %arg0, %c0_i32, %c0_i32_0 : i32, i32, i32
  }
  func.func @transform_1(%arg0: i32) -> (i32, i32) {
    %c0_i32 = arith.constant 0 : i32
    %c0_i32_0 = arith.constant 0 : i32
    %c0_i32_1 = arith.constant 0 : i32
    return %c0_i32, %c0_i32_0 : i32, i32
  }
  func.func @transform_2(%arg0: i32) -> (i32, i32, i32) {
    %c0_i32 = arith.constant 0 : i32
    %c0_i32_0 = arith.constant 0 : i32
    %c0_i32_1 = arith.constant 0 : i32
    return %arg0, %c0_i32, %c0_i32_0 : i32, i32, i32
  }
}

module attributes {stable_mosaic.version = 11 : i64} {
  func.func @kernel(%arg0: i32, %arg1: memref<1x216x512xbf16, #tpu.memory_space<vmem>>, %arg2: memref<8x216xbf16, #tpu.memory_space<vmem>>, %arg3: memref<8x1xf32, #tpu.memory_space<vmem>>, %arg4: memref<8x1xf32, #tpu.memory_space<vmem>>, %arg5: memref<1x8x512xf32, #tpu.memory_space<vmem>>) attributes {dimension_semantics = [#tpu.dimension_semantics<parallel>], iteration_bounds = array<i64: 3>, scalar_prefetch = 0 : i64, scratch_operands = 0 : i64, tpu.core_type = #tpu.core_type<tc>, window_params = [{transform_indices = @transform_0, window_bounds = array<i64: 1, 216, 512>}, {pipeline_mode = #tpu.pipeline_mode<synchronous>, transform_indices = @transform_1, window_bounds = array<i64: 8, 216>}, {pipeline_mode = #tpu.pipeline_mode<synchronous>, transform_indices = @transform_2, window_bounds = array<i64: 8, 1>}, {pipeline_mode = #tpu.pipeline_mode<synchronous>, transform_indices = @transform_3, window_bounds = array<i64: 8, 1>}, {transform_indices = @transform_4, window_bounds = array<i64: 1, 8, 512>}]} {
    %c0 = arith.constant 0 : index
    %c0_0 = arith.constant 0 : index
    %c0_1 = arith.constant 0 : index
    %0 = vector.load %arg1[%c0, %c0_0, %c0_1] : memref<1x216x512xbf16, #tpu.memory_space<vmem>>, vector<1x216x512xbf16>
    %1 = vector.shape_cast %0 : vector<1x216x512xbf16> to vector<216x512xbf16>
    %c0_2 = arith.constant 0 : index
    %c0_3 = arith.constant 0 : index
    %2 = vector.load %arg2[%c0_2, %c0_3] : memref<8x216xbf16, #tpu.memory_space<vmem>>, vector<8x216xbf16>
    %cst = arith.constant dense<0.000000e+00> : vector<8x512xf32>
    %3 = tpu.matmul %2, %1, %cst {dimension_numbers = #tpu.dot_dimension_numbers<[1], [0], [0], [1], [0, 0, 1, 1], [], []>} : vector<8x216xbf16>, vector<216x512xbf16>, vector<8x512xf32> -> vector<8x512xf32>
    %c0_4 = arith.constant 0 : index
    %c0_5 = arith.constant 0 : index
    %4 = vector.load %arg3[%c0_4, %c0_5] : memref<8x1xf32, #tpu.memory_space<vmem>>, vector<8x1xf32>
    %c0_6 = arith.constant 0 : index
    %c0_7 = arith.constant 0 : index
    %5 = vector.load %arg4[%c0_6, %c0_7] : memref<8x1xf32, #tpu.memory_space<vmem>>, vector<8x1xf32>
    %cst_8 = arith.constant dense<0.000000e+00> : vector<8xf32>
    %6 = vector.multi_reduction <add>, %3, %cst_8 [1] : vector<8x512xf32> to vector<8xf32>
    %7 = vector.shape_cast %6 : vector<8xf32> to vector<8x1xf32>
    %cst_9 = arith.constant 5.120000e+02 : f32
    %8 = vector.broadcast %cst_9 : f32 to vector<8x1xf32>
    %9 = arith.divf %7, %8 : vector<8x1xf32>
    %10 = vector.broadcast %9 : vector<8x1xf32> to vector<8x512xf32>
    %11 = arith.subf %3, %10 : vector<8x512xf32>
    %12 = arith.mulf %11, %11 : vector<8x512xf32>
    %cst_10 = arith.constant dense<0.000000e+00> : vector<8xf32>
    %13 = vector.multi_reduction <add>, %12, %cst_10 [1] : vector<8x512xf32> to vector<8xf32>
    %14 = vector.shape_cast %13 : vector<8xf32> to vector<8x1xf32>
    %cst_11 = arith.constant 5.120000e+02 : f32
    %15 = vector.broadcast %cst_11 : f32 to vector<8x1xf32>
    %16 = arith.divf %14, %15 : vector<8x1xf32>
    %17 = vector.broadcast %9 : vector<8x1xf32> to vector<8x512xf32>
    %18 = arith.subf %3, %17 : vector<8x512xf32>
    %cst_12 = arith.constant 9.99999974E-6 : f32
    %19 = vector.broadcast %cst_12 : f32 to vector<8x1xf32>
    %20 = arith.addf %16, %19 : vector<8x1xf32>
    %21 = math.rsqrt %20 : vector<8x1xf32>
    %22 = vector.broadcast %21 : vector<8x1xf32> to vector<8x512xf32>
    %23 = arith.mulf %18, %22 : vector<8x512xf32>
    %24 = vector.broadcast %4 : vector<8x1xf32> to vector<8x512xf32>
    %25 = arith.mulf %23, %24 : vector<8x512xf32>
    %26 = vector.broadcast %5 : vector<8x1xf32> to vector<8x512xf32>
    %27 = arith.addf %25, %26 : vector<8x512xf32>
    %cst_13 = arith.constant 0.000000e+00 : f32
    %28 = vector.broadcast %cst_13 : f32 to vector<8x512xf32>
    %29 = arith.cmpf ogt, %27, %28 : vector<8x512xf32>
    %cst_14 = arith.constant 0.00999999977 : f32
    %30 = vector.broadcast %cst_14 : f32 to vector<8x512xf32>
    %31 = arith.mulf %30, %27 : vector<8x512xf32>
    %32 = arith.select %29, %27, %31 : vector<8x512xi1>, vector<8x512xf32>
    %c0_15 = arith.constant 0 : index
    %c0_16 = arith.constant 0 : index
    %c0_17 = arith.constant 0 : index
    %33 = vector.load %arg5[%c0_15, %c0_16, %c0_17] : memref<1x8x512xf32, #tpu.memory_space<vmem>>, vector<1x8x512xf32>
    %34 = vector.shape_cast %33 : vector<1x8x512xf32> to vector<8x512xf32>
    %35 = vector.shape_cast %32 : vector<8x512xf32> to vector<1x8x512xf32>
    tpu.vector_store %arg5[%c0_15, %c0_16, %c0_17], %35 {strides = array<i32>} : memref<1x8x512xf32, #tpu.memory_space<vmem>>, vector<1x8x512xf32>,
    return
  }
  func.func @transform_0(%arg0: i32) -> (i32, i32, i32) {
    %c0_i32 = arith.constant 0 : i32
    %c0_i32_0 = arith.constant 0 : i32
    %c0_i32_1 = arith.constant 0 : i32
    return %arg0, %c0_i32, %c0_i32_0 : i32, i32, i32
  }
  func.func @transform_1(%arg0: i32) -> (i32, i32) {
    %c0_i32 = arith.constant 0 : i32
    %c0_i32_0 = arith.constant 0 : i32
    %c0_i32_1 = arith.constant 0 : i32
    return %c0_i32, %c0_i32_0 : i32, i32
  }
  func.func @transform_2(%arg0: i32) -> (i32, i32) {
    %c0_i32 = arith.constant 0 : i32
    %c0_i32_0 = arith.constant 0 : i32
    %c0_i32_1 = arith.constant 0 : i32
    return %c0_i32, %c0_i32_0 : i32, i32
  }
  func.func @transform_3(%arg0: i32) -> (i32, i32) {
    %c0_i32 = arith.constant 0 : i32
    %c0_i32_0 = arith.constant 0 : i32
    %c0_i32_1 = arith.constant 0 : i32
    return %c0_i32, %c0_i32_0 : i32, i32
  }
  func.func @transform_4(%arg0: i32) -> (i32, i32, i32) {
    %c0_i32 = arith.constant 0 : i32
    %c0_i32_0 = arith.constant 0 : i32
    %c0_i32_1 = arith.constant 0 : i32
    return %arg0, %c0_i32, %c0_i32_0 : i32, i32, i32
  }
}

module attributes {stable_mosaic.version = 11 : i64} {
  func.func @kernel(%arg0: i32, %arg1: memref<1x216x512xbf16, #tpu.memory_space<vmem>>, %arg2: memref<8x216xbf16, #tpu.memory_space<vmem>>, %arg3: memref<1x216x512xbf16, #tpu.memory_space<vmem>>, %arg4: memref<8x216xbf16, #tpu.memory_space<vmem>>, %arg5: memref<8x1xf32, #tpu.memory_space<vmem>>, %arg6: memref<8x1xf32, #tpu.memory_space<vmem>>, %arg7: memref<1x8x512xf32, #tpu.memory_space<vmem>>) attributes {dimension_semantics = [#tpu.dimension_semantics<parallel>], iteration_bounds = array<i64: 3>, scalar_prefetch = 0 : i64, scratch_operands = 0 : i64, tpu.core_type = #tpu.core_type<tc>, window_params = [{transform_indices = @transform_0, window_bounds = array<i64: 1, 216, 512>}, {pipeline_mode = #tpu.pipeline_mode<synchronous>, transform_indices = @transform_1, window_bounds = array<i64: 8, 216>}, {transform_indices = @transform_2, window_bounds = array<i64: 1, 216, 512>}, {pipeline_mode = #tpu.pipeline_mode<synchronous>, transform_indices = @transform_3, window_bounds = array<i64: 8, 216>}, {pipeline_mode = #tpu.pipeline_mode<synchronous>, transform_indices = @transform_4, window_bounds = array<i64: 8, 1>}, {pipeline_mode = #tpu.pipeline_mode<synchronous>, transform_indices = @transform_5, window_bounds = array<i64: 8, 1>}, {transform_indices = @transform_6, window_bounds = array<i64: 1, 8, 512>}]} {
    %c0 = arith.constant 0 : index
    %c0_0 = arith.constant 0 : index
    %c0_1 = arith.constant 0 : index
    %0 = vector.load %arg1[%c0, %c0_0, %c0_1] : memref<1x216x512xbf16, #tpu.memory_space<vmem>>, vector<1x216x512xbf16>
    %1 = vector.shape_cast %0 : vector<1x216x512xbf16> to vector<216x512xbf16>
    %c0_2 = arith.constant 0 : index
    %c0_3 = arith.constant 0 : index
    %2 = vector.load %arg2[%c0_2, %c0_3] : memref<8x216xbf16, #tpu.memory_space<vmem>>, vector<8x216xbf16>
    %cst = arith.constant dense<0.000000e+00> : vector<8x512xf32>
    %3 = tpu.matmul %2, %1, %cst {dimension_numbers = #tpu.dot_dimension_numbers<[1], [0], [0], [1], [0, 0, 1, 1], [], []>} : vector<8x216xbf16>, vector<216x512xbf16>, vector<8x512xf32> -> vector<8x512xf32>
    %c0_4 = arith.constant 0 : index
    %c0_5 = arith.constant 0 : index
    %c0_6 = arith.constant 0 : index
    %4 = vector.load %arg3[%c0_4, %c0_5, %c0_6] : memref<1x216x512xbf16, #tpu.memory_space<vmem>>, vector<1x216x512xbf16>
    %5 = vector.shape_cast %4 : vector<1x216x512xbf16> to vector<216x512xbf16>
    %c0_7 = arith.constant 0 : index
    %c0_8 = arith.constant 0 : index
    %6 = vector.load %arg4[%c0_7, %c0_8] : memref<8x216xbf16, #tpu.memory_space<vmem>>, vector<8x216xbf16>
    %cst_9 = arith.constant dense<0.000000e+00> : vector<8x512xf32>
    %7 = tpu.matmul %6, %5, %cst_9 {dimension_numbers = #tpu.dot_dimension_numbers<[1], [0], [0], [1], [0, 0, 1, 1], [], []>} : vector<8x216xbf16>, vector<216x512xbf16>, vector<8x512xf32> -> vector<8x512xf32>
    %8 = arith.addf %3, %7 : vector<8x512xf32>
    %c0_10 = arith.constant 0 : index
    %c0_11 = arith.constant 0 : index
    %9 = vector.load %arg5[%c0_10, %c0_11] : memref<8x1xf32, #tpu.memory_space<vmem>>, vector<8x1xf32>
    %c0_12 = arith.constant 0 : index
    %c0_13 = arith.constant 0 : index
    %10 = vector.load %arg6[%c0_12, %c0_13] : memref<8x1xf32, #tpu.memory_space<vmem>>, vector<8x1xf32>
    %cst_14 = arith.constant dense<0.000000e+00> : vector<8xf32>
    %11 = vector.multi_reduction <add>, %8, %cst_14 [1] : vector<8x512xf32> to vector<8xf32>
    %12 = vector.shape_cast %11 : vector<8xf32> to vector<8x1xf32>
    %cst_15 = arith.constant 5.120000e+02 : f32
    %13 = vector.broadcast %cst_15 : f32 to vector<8x1xf32>
    %14 = arith.divf %12, %13 : vector<8x1xf32>
    %15 = vector.broadcast %14 : vector<8x1xf32> to vector<8x512xf32>
    %16 = arith.subf %8, %15 : vector<8x512xf32>
    %17 = arith.mulf %16, %16 : vector<8x512xf32>
    %cst_16 = arith.constant dense<0.000000e+00> : vector<8xf32>
    %18 = vector.multi_reduction <add>, %17, %cst_16 [1] : vector<8x512xf32> to vector<8xf32>
    %19 = vector.shape_cast %18 : vector<8xf32> to vector<8x1xf32>
    %cst_17 = arith.constant 5.120000e+02 : f32
    %20 = vector.broadcast %cst_17 : f32 to vector<8x1xf32>
    %21 = arith.divf %19, %20 : vector<8x1xf32>
    %22 = vector.broadcast %14 : vector<8x1xf32> to vector<8x512xf32>
    %23 = arith.subf %8, %22 : vector<8x512xf32>
    %cst_18 = arith.constant 9.99999974E-6 : f32
    %24 = vector.broadcast %cst_18 : f32 to vector<8x1xf32>
    %25 = arith.addf %21, %24 : vector<8x1xf32>
    %26 = math.rsqrt %25 : vector<8x1xf32>
    %27 = vector.broadcast %26 : vector<8x1xf32> to vector<8x512xf32>
    %28 = arith.mulf %23, %27 : vector<8x512xf32>
    %29 = vector.broadcast %9 : vector<8x1xf32> to vector<8x512xf32>
    %30 = arith.mulf %28, %29 : vector<8x512xf32>
    %31 = vector.broadcast %10 : vector<8x1xf32> to vector<8x512xf32>
    %32 = arith.addf %30, %31 : vector<8x512xf32>
    %cst_19 = arith.constant 0.000000e+00 : f32
    %33 = vector.broadcast %cst_19 : f32 to vector<8x512xf32>
    %34 = arith.cmpf ogt, %32, %33 : vector<8x512xf32>
    %cst_20 = arith.constant 0.00999999977 : f32
    %35 = vector.broadcast %cst_20 : f32 to vector<8x512xf32>
    %36 = arith.mulf %35, %32 : vector<8x512xf32>
    %37 = arith.select %34, %32, %36 : vector<8x512xi1>, vector<8x512xf32>
    %c0_21 = arith.constant 0 : index
    %c0_22 = arith.constant 0 : index
    %c0_23 = arith.constant 0 : index
    %38 = vector.load %arg7[%c0_21, %c0_22, %c0_23] : memref<1x8x512xf32, #tpu.memory_space<vmem>>, vector<1x8x512xf32>
    %39 = vector.shape_cast %38 : vector<1x8x512xf32> to vector<8x512xf32>
    %40 = vector.shape_cast %37 : vector<8x512xf32> to vector<1x8x512xf32>
    tpu.vector_store %arg7[%c0_21, %c0_22, %c0_23], %40 {strides = array<i32>} : memref<1x8x512xf32, #tpu.memory_space<vmem>>, vector<1x8x512xf32>,
    return
  }
  func.func @transform_0(%arg0: i32) -> (i32, i32, i32) {
    %c0_i32 = arith.constant 0 : i32
    %c0_i32_0 = arith.constant 0 : i32
    %c0_i32_1 = arith.constant 0 : i32
    return %arg0, %c0_i32, %c0_i32_0 : i32, i32, i32
  }
  func.func @transform_1(%arg0: i32) -> (i32, i32) {
    %c0_i32 = arith.constant 0 : i32
    %c0_i32_0 = arith.constant 0 : i32
    %c0_i32_1 = arith.constant 0 : i32
    return %c0_i32, %c0_i32_0 : i32, i32
  }
  func.func @transform_2(%arg0: i32) -> (i32, i32, i32) {
    %c0_i32 = arith.constant 0 : i32
    %c0_i32_0 = arith.constant 0 : i32
    %c0_i32_1 = arith.constant 0 : i32
    return %arg0, %c0_i32, %c0_i32_0 : i32, i32, i32
  }
  func.func @transform_3(%arg0: i32) -> (i32, i32) {
    %c0_i32 = arith.constant 0 : i32
    %c0_i32_0 = arith.constant 0 : i32
    %c0_i32_1 = arith.constant 0 : i32
    return %c0_i32, %c0_i32_0 : i32, i32
  }
  func.func @transform_4(%arg0: i32) -> (i32, i32) {
    %c0_i32 = arith.constant 0 : i32
    %c0_i32_0 = arith.constant 0 : i32
    %c0_i32_1 = arith.constant 0 : i32
    return %c0_i32, %c0_i32_0 : i32, i32
  }
  func.func @transform_5(%arg0: i32) -> (i32, i32) {
    %c0_i32 = arith.constant 0 : i32
    %c0_i32_0 = arith.constant 0 : i32
    %c0_i32_1 = arith.constant 0 : i32
    return %c0_i32, %c0_i32_0 : i32, i32
  }
  func.func @transform_6(%arg0: i32) -> (i32, i32, i32) {
    %c0_i32 = arith.constant 0 : i32
    %c0_i32_0 = arith.constant 0 : i32
    %c0_i32_1 = arith.constant 0 : i32
    return %arg0, %c0_i32, %c0_i32_0 : i32, i32, i32
  }
}

module attributes {stable_mosaic.version = 11 : i64} {
  func.func @kernel(%arg0: i32, %arg1: memref<1x8x512xbf16, #tpu.memory_space<vmem>>, %arg2: memref<2x8xbf16, #tpu.memory_space<vmem>>, %arg3: memref<2x1xf32, #tpu.memory_space<vmem>>, %arg4: memref<1x2x512xf32, #tpu.memory_space<vmem>>) attributes {dimension_semantics = [#tpu.dimension_semantics<parallel>], iteration_bounds = array<i64: 3>, scalar_prefetch = 0 : i64, scratch_operands = 0 : i64, tpu.core_type = #tpu.core_type<tc>, window_params = [{transform_indices = @transform_0, window_bounds = array<i64: 1, 8, 512>}, {pipeline_mode = #tpu.pipeline_mode<synchronous>, transform_indices = @transform_1, window_bounds = array<i64: 2, 8>}, {pipeline_mode = #tpu.pipeline_mode<synchronous>, transform_indices = @transform_2, window_bounds = array<i64: 2, 1>}, {transform_indices = @transform_3, window_bounds = array<i64: 1, 2, 512>}]} {
    %c0 = arith.constant 0 : index
    %c0_0 = arith.constant 0 : index
    %c0_1 = arith.constant 0 : index
    %0 = vector.load %arg1[%c0, %c0_0, %c0_1] : memref<1x8x512xbf16, #tpu.memory_space<vmem>>, vector<1x8x512xbf16>
    %1 = vector.shape_cast %0 : vector<1x8x512xbf16> to vector<8x512xbf16>
    %c0_2 = arith.constant 0 : index
    %c0_3 = arith.constant 0 : index
    %2 = vector.load %arg2[%c0_2, %c0_3] : memref<2x8xbf16, #tpu.memory_space<vmem>>, vector<2x8xbf16>
    %cst = arith.constant dense<0.000000e+00> : vector<2x512xf32>
    %3 = tpu.matmul %2, %1, %cst {dimension_numbers = #tpu.dot_dimension_numbers<[1], [0], [0], [1], [0, 0, 1, 1], [], []>} : vector<2x8xbf16>, vector<8x512xbf16>, vector<2x512xf32> -> vector<2x512xf32>
    %c0_4 = arith.constant 0 : index
    %c0_5 = arith.constant 0 : index
    %4 = vector.load %arg3[%c0_4, %c0_5] : memref<2x1xf32, #tpu.memory_space<vmem>>, vector<2x1xf32>
    %5 = vector.broadcast %4 : vector<2x1xf32> to vector<2x512xf32>
    %6 = arith.addf %3, %5 : vector<2x512xf32>
    %c0_6 = arith.constant 0 : index
    %c0_7 = arith.constant 0 : index
    %c0_8 = arith.constant 0 : index
    %7 = vector.load %arg4[%c0_6, %c0_7, %c0_8] : memref<1x2x512xf32, #tpu.memory_space<vmem>>, vector<1x2x512xf32>
    %8 = vector.shape_cast %7 : vector<1x2x512xf32> to vector<2x512xf32>
    %9 = vector.shape_cast %6 : vector<2x512xf32> to vector<1x2x512xf32>
    tpu.vector_store %arg4[%c0_6, %c0_7, %c0_8], %9 {strides = array<i32>} : memref<1x2x512xf32, #tpu.memory_space<vmem>>, vector<1x2x512xf32>,
    return
  }
  func.func @transform_0(%arg0: i32) -> (i32, i32, i32) {
    %c0_i32 = arith.constant 0 : i32
    %c0_i32_0 = arith.constant 0 : i32
    %c0_i32_1 = arith.constant 0 : i32
    return %arg0, %c0_i32, %c0_i32_0 : i32, i32, i32
  }
  func.func @transform_1(%arg0: i32) -> (i32, i32) {
    %c0_i32 = arith.constant 0 : i32
    %c0_i32_0 = arith.constant 0 : i32
    %c0_i32_1 = arith.constant 0 : i32
    return %c0_i32, %c0_i32_0 : i32, i32
  }
  func.func @transform_2(%arg0: i32) -> (i32, i32) {
    %c0_i32 = arith.constant 0 : i32
    %c0_i32_0 = arith.constant 0 : i32
    %c0_i32_1 = arith.constant 0 : i32
    return %c0_i32, %c0_i32_0 : i32, i32
  }
  func.func @transform_3(%arg0: i32) -> (i32, i32, i32) {
    %c0_i32 = arith.constant 0 : i32
    %c0_i32_0 = arith.constant 0 : i32
    %c0_i32_1 = arith.constant 0 : i32
    return %arg0, %c0_i32, %c0_i32_0 : i32, i32, i32
  }
}

</mosaic_0001>

<bundles_post_ra>
// kernel: gate_dyn_unet_forward.16
= control target key start
LH: loop header
LB: loop body
LE: loop exit
PB: predicated region body
PF: predicated region fallthrough
CT: control target
= control target key end

     0   :  { %s548_s15 = smov 0   ;;  %s578_s0 = inlined_call_operand.vmem [shape: bf16[3,27,512], index: 0, kind: input, shape index: {}]   ;;  %s579_s1 = inlined_call_operand.vmem [shape: bf16[8,27], index: 1, kind: input, shape index: {}]   ;;  %s580_s2 = inlined_call_operand.vmem [shape: f32[8,1], index: 2, kind: input, shape index: {}]   ;;  %s581_s3 = inlined_call_operand.vmem [shape: f32[8,1], index: 3, kind: input, shape index: {}]   ;;  %s582_s4 = inlined_call_operand.vmem [shape: f32[3,8,512], index: 4, kind: output, shape index: {}]  }
   0x1 LB: > { %s464_s16 = sadd.s32 4294967295, %s519_s15   ;;  %p468_p0 = scmp.ge.s32.totalorder %s519_s15, 1  ;;  %s519_s15 = sphi %s548_s15, %s14_s15  }
   0x2   : > { %p162_p1 = scmp.lt.s32.totalorder %s519_s15, 4 }
   0x4   : > { %p163_p2 = pnand %p468_p0, %p162_p1 }
   0x5   : > { %p188_p3 = scmp.lt.s32.totalorder (!%p163_p2), %s464_s16, 2 }
   0x6   : > { %166 = sbr.rel (%p163_p2) target bundleno = 544 (0x220), region = 36 }
   0xb   : > { %vm248_vm0 = vcmask 1044480   ;;  %v521_v0 = vmov 0   ;;  %s584_s16 = smov (!%p188_p3, %s464_s16), 2  ;;  %vm249_vm1 = vcmask 1045504   ;;  %v522_v1 = vmov 65535   ;;  %v346_v28 = vld [vmem:[%s580_s2] sm:$0xff] }
   0xc   : > { %296 = vmatprep.mubr.bf16.mxu0 %v521_v0  ;;  %337 = vmatprep.mubr.bf16.mxu1 %v521_v0  ;;  %v250_v2 = vsel %vm248_vm0, 4294967295, %v522_v1  ;;  %s485_s17 = sshll.u32 %s584_s16, 6  ;;  %v207_v16 = vld [vmem:[%s579_s1] sm:$0xf]  ;;  %vm244_vm2 = vcmask 220160   ;;  %s486_s27 = sshll.u32 %s584_s16, 5 }
   0xd   : > { %497 = vset.pattern.permute.xlu1 %v521_v0  ;;  %498 = vset.pattern.permute.xlu0 %v521_v0  ;;  %s192_s20 = scalar_lea.vmem %s578_s0, %s485_s17  ;;  %v251_v3 = vsel %vm249_vm1, %v250_v2, 0  ;;  %v347_v29 = vld [vmem:[%s581_s3] sm:$0xff]  ;;  %s197_s30 = scalar_lea.vmem %s582_s4, %s486_s27 }
   0xe   : > { %v499_v4 = vld [vmem:[%s192_s20 + $0x24] ss:$16 sps:$4 sm:$0x3f]   ;;  %v501_v5 = vld [vmem:[%s192_s20 + $0x2c] ss:$16 sps:$4 sm:$0x3f]   ;;  %377 = vperm.xlu1 %497, %v346_v28  }
   0xf   : > { %v256_v6 = vand.u32 %v499_v4, %v251_v3  ;;  %v503_v7 = vld [vmem:[%s192_s20 + $0x20] ss:$16 sps:$4 sm:$0x3f]   ;;  %v504_v8 = vld [vmem:[%s192_s20 + $0x28] ss:$16 sps:$4 sm:$0x3f]   ;;  %v262_v9 = vand.u32 %v501_v5, %v251_v3 }
  0x10   : > { %v505_v10 = vld [vmem:[%s192_s20 + $0x4] ss:$16 sps:$4 sm:$0xff]   ;;  %v253_v11 = vand.u32 %v503_v7, %v251_v3  ;;  %v259_v12 = vand.u32 %v504_v8, %v251_v3  ;;  %v507_v13 = vld [vmem:[%s192_s20 + $0xc] ss:$16 sps:$4 sm:$0xff]   ;;  %v509_v14 = vld [vmem:[%s192_s20] ss:$16 sps:$4 sm:$0xff]  }
  0x11   : > { %276 = vmatprep.subr.bf16.mxu0 %v256_v6  ;;  %317 = vmatprep.subr.bf16.mxu1 %v262_v9  ;;  %v510_v15 = vld [vmem:[%s192_s20 + $0x8] ss:$16 sps:$4 sm:$0xff]  }
  0x12   : > { %277 = vmatpush1.bf16.msra.mxu0 %v253_v11  ;;  %318 = vmatpush1.bf16.msra.mxu1 %v259_v12 }
  0x13   : > { %278 = vmatprep.subr.bf16.mxu0 %v505_v10  ;;  %319 = vmatprep.subr.bf16.mxu1 %v507_v13 }
  0x14   : > { %386 = vperm.xlu1 %497, %v347_v29  }
  0x16   : > { %279 = vmatpush1.bf16.msra.mxu0 %v509_v14  ;;  %320 = vmatpush1.bf16.msra.mxu1 %v510_v15 }
  0x19   : > { %481 = vmatmul.mubr.msk.bf16.vlgmr.msra.gmra.mxu0 %vm244_vm2, %v207_v16  ;;  %482 = vmatmul.mubr.msk.bf16.vlgmr.msra.gmra.mxu1 %vm244_vm2, %v207_v16 }
  0x89   : > { %v378_v46 = vpop.permute.xlu1 %377 }
  0x8f   : > { %v387_v56 = vpop.permute.xlu1 %386 }
  0xd9   : > { %v298_v17 = vpop.f32.mrf.mxu0  ;;  %v339_v18 = vpop.f32.mrf.mxu1 }
  0xdb   : > { %v300_v19 = vpop.f32.mrf.mxu0  ;;  %v341_v20 = vpop.f32.mrf.mxu1 }
  0xdc   : > { %v348_v21 = vadd.f32 %v300_v19, %v298_v17 }
  0xdd   : > { %v302_v22 = vpop.f32.mrf.mxu0  ;;  %v343_v23 = vpop.f32.mrf.mxu1 }
  0xde   : > { %v349_v24 = vadd.f32 %v348_v21, %v339_v18 }
  0xdf   : > { %v303_v25 = vpop.f32.mrf.mxu0  ;;  %v344_v26 = vpop.f32.mrf.mxu1 }
  0xe0   : > { %v350_v27 = vadd.f32 %v349_v24, %v341_v20 }
  0xe2   : > { %351 = vadd.xlane.f32.xlu0 %v350_v27 }
 0x16b   : > { %v352_v30 = vpop.xlane.xlu0 %351 }
 0x16c   : > { %v354_v31 = vmul.f32 0.001953125, %v352_v30 }
 0x16e   : > { %v355_v32 = vsub.f32 %v298_v17, %v354_v31  ;;  %v356_v33 = vsub.f32 %v300_v19, %v354_v31  ;;  %v357_v34 = vsub.f32 %v339_v18, %v354_v31  ;;  %v358_v35 = vsub.f32 %v341_v20, %v354_v31 }
 0x170   : > { %v359_v36 = vmul.f32 %v355_v32, %v355_v32  ;;  %v360_v37 = vmul.f32 %v356_v33, %v356_v33  ;;  %v361_v38 = vmul.f32 %v357_v34, %v357_v34  ;;  %v362_v40 = vmul.f32 %v358_v35, %v358_v35 }
 0x172   : > { %v363_v39 = vadd.f32 %v360_v37, %v359_v36 }
 0x174   : > { %v364_v41 = vadd.f32 %v363_v39, %v361_v38 }
 0x176   : > { %v365_v42 = vadd.f32 %v364_v41, %v362_v40 }
 0x178   : > { %366 = vadd.xlane.f32.xlu0 %v365_v42 }
 0x201   : > { %v367_v43 = vpop.xlane.xlu0 %366 }
 0x202   : > { %v368_v44 = vmul.f32 0.001953125, %v367_v43 }
 0x204   : > { %v369_v45 = vadd.f32 1e-05, %v368_v44 }
 0x206   : > { %511 = vrsqrt.f32 %v369_v45 }
 0x213   : > { %v512_v47 = vpop.eup %511 }
 0x214   : > { %v371_v48 = vmul.f32 %v512_v47, %v355_v32  ;;  %v372_v49 = vmul.f32 %v512_v47, %v356_v33  ;;  %v373_v50 = vmul.f32 %v512_v47, %v357_v34  ;;  %v374_v51 = vmul.f32 %v512_v47, %v358_v35 }
 0x216   : > { %v380_v52 = vmul.f32 %v378_v46, %v371_v48  ;;  %v381_v53 = vmul.f32 %v378_v46, %v372_v49  ;;  %v382_v54 = vmul.f32 %v378_v46, %v373_v50  ;;  %v383_v55 = vmul.f32 %v378_v46, %v374_v51 }
 0x218   : > { %v389_v57 = vadd.f32 %v387_v56, %v380_v52  ;;  %v390_v58 = vadd.f32 %v387_v56, %v381_v53  ;;  %v391_v59 = vadd.f32 %v387_v56, %v382_v54  ;;  %v392_v60 = vadd.f32 %v387_v56, %v383_v55 }
 0x21a   : > { %vm393_vm3 = vcmp.gt.f32.partialorder %v389_v57, 0.0  ;;  %vm394_vm4 = vcmp.gt.f32.partialorder %v390_v58, 0.0  ;;  %vm395_vm5 = vcmp.gt.f32.partialorder %v391_v59, 0.0  ;;  %vm396_vm6 = vcmp.gt.f32.partialorder %v392_v60, 0.0 }
 0x21b   : > { %v397_v61 = vmul.f32 0.01, %v389_v57  ;;  %v398_v62 = vmul.f32 0.01, %v390_v58  ;;  %v399_v63 = vmul.f32 0.01, %v391_v59 }
 0x21c   : > { %v400_v0 = vmul.f32 0.01, %v392_v60 }
 0x21d   : > { %v401_v1 = vsel %vm393_vm3, %v389_v57, %v397_v61  ;;  %v402_v2 = vsel %vm394_vm4, %v390_v58, %v398_v62  ;;  %v403_v3 = vsel %vm395_vm5, %v391_v59, %v399_v63 }
 0x21e   : > { %v404_v4 = vsel %vm396_vm6, %v392_v60, %v400_v0  ;;  %405 = vst [vmem:[%s197_s30] sm:$0xff] %v401_v1  ;;  %406 = vst [vmem:[%s197_s30 + $0x8] sm:$0xff] %v402_v2 }
 0x21f   : > { %407 = vst [vmem:[%s197_s30 + $0x10] sm:$0xff] %v403_v3  ;;  %408 = vst [vmem:[%s197_s30 + $0x18] sm:$0xff] %v404_v4 }
 0x220 PF: > { %s14_s15 = sadd.s32 1, %s519_s15  }
 0x221   : > { %p11_p4 = scmp.ge.s32.totalorder %s14_s15, 5  }
 0x223   :  { %13 = sbr.rel (!%p11_p4) target bundleno = 1 (0x1), region = 66 }

// kernel: gate_dyn_unet_forward.17
= control target key start
LH: loop header
LB: loop body
LE: loop exit
PB: predicated region body
PF: predicated region fallthrough
CT: control target
= control target key end

     0   :  { %s493_s15 = smov 0   ;;  %s523_s0 = inlined_call_operand.vmem [shape: bf16[3,1,512], index: 0, kind: input, shape index: {}]   ;;  %s524_s1 = inlined_call_operand.vmem [shape: bf16[8,1], index: 1, kind: input, shape index: {}]   ;;  %s525_s2 = inlined_call_operand.vmem [shape: f32[8,1], index: 2, kind: input, shape index: {}]   ;;  %s526_s3 = inlined_call_operand.vmem [shape: f32[8,1], index: 3, kind: input, shape index: {}]   ;;  %s527_s4 = inlined_call_operand.vmem [shape: f32[3,8,512], index: 4, kind: output, shape index: {}]  }
   0x1 LB: > { %s430_s16 = sadd.s32 4294967295, %s464_s15   ;;  %p434_p0 = scmp.ge.s32.totalorder %s464_s15, 1  ;;  %s464_s15 = sphi %s493_s15, %s14_s15  }
   0x2   : > { %p161_p1 = scmp.lt.s32.totalorder %s464_s15, 4 }
   0x4   : > { %p162_p2 = pnand %p434_p0, %p161_p1 }
   0x5   : > { %p186_p3 = scmp.lt.s32.totalorder (!%p162_p2), %s430_s16, 2 }
   0x6   : > { %165 = sbr.rel (%p162_p2) target bundleno = 541 (0x21d), region = 36 }
   0xb   : > { %v210_v0 = vlaneseq  ;;  %v466_v1 = vmov 1966171168   ;;  %v467_v3 = vmov 0   ;;  %s529_s16 = smov (!%p186_p3, %s430_s16), 2  ;;  %vm227_vm0 = vcmask 1040384   ;;  %v324_v30 = vld [vmem:[%s525_s2] sm:$0xff] }
   0xc   : > { %v208_v2 = vunpack.c.l.s4 %v466_v1  ;;  %274 = vmatprep.mubr.bf16.mxu0 %v467_v3  ;;  %315 = vmatprep.mubr.bf16.mxu1 %v467_v3  ;;  %s435_s17 = sshll.u32 %s529_s16, 2  ;;  %v229_v9 = vsel %vm227_vm0, 65535, %v467_v3  ;;  %v197_v18 = vld [vmem:[%s524_s1] sm:$0xf]  ;;  %vm223_vm1 = vcmask 7168   ;;  %s443_s27 = sshll.u32 %s529_s16, 5 }
   0xd   : > { %v211_v4 = vshrl.u32 %v210_v0, 7  ;;  %454 = vset.pattern.permute.xlu1 %v467_v3  ;;  %455 = vset.pattern.permute.xlu0 %v467_v3  ;;  %s189_s20 = scalar_lea.vmem %s523_s0, %s435_s17  ;;  %v325_v31 = vld [vmem:[%s526_s3] sm:$0xff]  ;;  %s194_s30 = scalar_lea.vmem %s527_s4, %s443_s27 }
   0xe   : > { %v209_v5 = vunpack.c.0.s8 %v208_v2  ;;  %v438_v7 = vld.sshfl [vmem:[%s189_s20] sm:$0x33 pattern:$0x75316420]  ;;  %355 = vperm.xlu1 %454, %v324_v30  }
   0xf   : > { %v206_v8 = vcombine.high %v438_v7, %v438_v7 }
  0x10   : > { %v212_v6 = vsub.s32 %v209_v5, %v211_v4 }
  0x12   : > { %v213_v10 = vrot.slane %v438_v7, %v212_v6  ;;  %v220_v11 = vrot.slane %v206_v8, %v212_v6  ;;  %364 = vperm.xlu1 %454, %v325_v31  }
  0x14   : > { %v221_v12 = vcombine.high %v213_v10, %v213_v10  ;;  %v231_v13 = vand.u32 %v229_v9, %v213_v10  ;;  %v234_v14 = vand.u32 %v229_v9, %v220_v11  ;;  %v222_v15 = vcombine.high %v220_v11, %v220_v11 }
  0x16   : > { %v237_v16 = vand.u32 %v229_v9, %v221_v12  ;;  %256 = vmatprep.subr.bf16.mxu0 %v234_v14  ;;  %v240_v17 = vand.u32 %v229_v9, %v222_v15 }
  0x17   : > { %257 = vmatpush1.bf16.msra.mxu0 %v231_v13 }
  0x18   : > { %297 = vmatprep.subr.bf16.mxu1 %v240_v17 }
  0x19   : > { %298 = vmatpush1.bf16.msra.mxu1 %v237_v16 }
  0x1a   : > { %439 = vmatmul.mubr.msk.bf16.vlgmr.msra.gmra.mxu0 %vm223_vm1, %v197_v18 }
  0x1c   : > { %440 = vmatmul.mubr.msk.bf16.vlgmr.msra.gmra.mxu1 %vm223_vm1, %v197_v18 }
  0x89   : > { %v356_v48 = vpop.permute.xlu1 %355 }
  0x8d   : > { %v365_v58 = vpop.permute.xlu1 %364 }
  0xda   : > { %v276_v19 = vpop.f32.mrf.mxu0 }
  0xdc   : > { %v278_v20 = vpop.f32.mrf.mxu0  ;;  %v317_v21 = vpop.f32.mrf.mxu1 }
  0xdd   : > { %v326_v22 = vadd.f32 %v278_v20, %v276_v19 }
  0xde   : > { %v280_v23 = vpop.f32.mrf.mxu0  ;;  %v319_v24 = vpop.f32.mrf.mxu1 }
  0xdf   : > { %v327_v25 = vadd.f32 %v326_v22, %v317_v21 }
  0xe0   : > { %v281_v26 = vpop.f32.mrf.mxu0  ;;  %v321_v27 = vpop.f32.mrf.mxu1 }
  0xe1   : > { %v328_v28 = vadd.f32 %v327_v25, %v319_v24 }
  0xe2   : > { %v322_v29 = vpop.f32.mrf.mxu1 }
  0xe3   : > { %329 = vadd.xlane.f32.xlu0 %v328_v28 }
 0x16c   : > { %v330_v32 = vpop.xlane.xlu0 %329 }
 0x16d   : > { %v332_v33 = vmul.f32 0.001953125, %v330_v32 }
 0x16f   : > { %v333_v34 = vsub.f32 %v276_v19, %v332_v33  ;;  %v334_v35 = vsub.f32 %v278_v20, %v332_v33  ;;  %v335_v36 = vsub.f32 %v317_v21, %v332_v33  ;;  %v336_v37 = vsub.f32 %v319_v24, %v332_v33 }
 0x171   : > { %v337_v38 = vmul.f32 %v333_v34, %v333_v34  ;;  %v338_v39 = vmul.f32 %v334_v35, %v334_v35  ;;  %v339_v40 = vmul.f32 %v335_v36, %v335_v36  ;;  %v340_v42 = vmul.f32 %v336_v37, %v336_v37 }
 0x173   : > { %v341_v41 = vadd.f32 %v338_v39, %v337_v38 }
 0x175   : > { %v342_v43 = vadd.f32 %v341_v41, %v339_v40 }
 0x177   : > { %v343_v44 = vadd.f32 %v342_v43, %v340_v42 }
 0x179   : > { %344 = vadd.xlane.f32.xlu0 %v343_v44 }
 0x202   : > { %v345_v45 = vpop.xlane.xlu0 %344 }
 0x203   : > { %v346_v46 = vmul.f32 0.001953125, %v345_v45 }
 0x205   : > { %v347_v47 = vadd.f32 1e-05, %v346_v46 }
 0x207   : > { %456 = vrsqrt.f32 %v347_v47 }
 0x214   : > { %v457_v49 = vpop.eup %456 }
 0x215   : > { %v349_v50 = vmul.f32 %v457_v49, %v333_v34  ;;  %v350_v51 = vmul.f32 %v457_v49, %v334_v35  ;;  %v351_v52 = vmul.f32 %v457_v49, %v335_v36  ;;  %v352_v53 = vmul.f32 %v457_v49, %v336_v37 }
 0x217   : > { %v358_v54 = vmul.f32 %v356_v48, %v349_v50  ;;  %v359_v55 = vmul.f32 %v356_v48, %v350_v51  ;;  %v360_v56 = vmul.f32 %v356_v48, %v351_v52  ;;  %v361_v57 = vmul.f32 %v356_v48, %v352_v53 }
 0x219   : > { %v367_v59 = vadd.f32 %v365_v58, %v358_v54  ;;  %v368_v60 = vadd.f32 %v365_v58, %v359_v55  ;;  %v369_v61 = vadd.f32 %v365_v58, %v360_v56  ;;  %v370_v62 = vadd.f32 %v365_v58, %v361_v57 }
 0x21b   : > { %371 = vst [vmem:[%s194_s30] sm:$0xff] %v367_v59  ;;  %372 = vst [vmem:[%s194_s30 + $0x8] sm:$0xff] %v368_v60 }
 0x21c   : > { %373 = vst [vmem:[%s194_s30 + $0x10] sm:$0xff] %v369_v61  ;;  %374 = vst [vmem:[%s194_s30 + $0x18] sm:$0xff] %v370_v62 }
 0x21d PF: > { %s14_s15 = sadd.s32 1, %s464_s15  }
 0x21e   : > { %p11_p4 = scmp.ge.s32.totalorder %s14_s15, 5  }
 0x220   :  { %13 = sbr.rel (!%p11_p4) target bundleno = 1 (0x1), region = 66 }

// kernel: gate_dyn_unet_forward.18
= control target key start
LH: loop header
LB: loop body
LE: loop exit
PB: predicated region body
PF: predicated region fallthrough
CT: control target
= control target key end

     0   :  { %s1027_s18 = smov 0   ;;  %s1126_s0 = inlined_call_operand.vmem [shape: bf16[3,216,512], index: 0, kind: input, shape index: {}]   ;;  %s1127_s1 = inlined_call_operand.vmem [shape: bf16[8,216], index: 1, kind: input, shape index: {}]   ;;  %s1128_s2 = inlined_call_operand.vmem [shape: f32[8,1], index: 2, kind: input, shape index: {}]   ;;  %s1129_s3 = inlined_call_operand.vmem [shape: f32[8,1], index: 3, kind: input, shape index: {}]   ;;  %s1130_s4 = inlined_call_operand.vmem [shape: f32[3,8,512], index: 4, kind: input, shape index: {}]   ;;  %s1131_s5 = inlined_call_operand.vmem [shape: f32[3,8,512], index: 5, kind: output, shape index: {}]  }
   0x1 LB: > { %s814_s19 = sadd.s32 4294967295, %s994_s18   ;;  %p818_p0 = scmp.ge.s32.totalorder %s994_s18, 1  ;;  %s994_s18 = sphi %s1027_s18, %s15_s18  }
   0x2   : > { %p197_p1 = scmp.lt.s32.totalorder %s994_s18, 4 }
   0x4   : > { %p198_p2 = pnand %p818_p0, %p197_p1 }
   0x5   : > { %p230_p3 = scmp.lt.s32.totalorder (!%p198_p2), %s814_s19, 2 }
   0x6   : > { %201 = sbr.rel (%p198_p2) target bundleno = 593 (0x251), region = 40 }
   0xb   : > { %v1038_v0 = vld [vmem:[%s1127_s1] sm:$0xff]  ;;  %vm577_vm0 = vcmask 719872   ;;  %s1133_s19 = smov (!%p230_p3, %s814_s19), 2  ;;  %vm581_vm1 = vcmask 1043456  }
   0xc   : > { %v825_v1 = vcombine.high %v1038_v0, %v1038_v0  ;;  %s890_s22 = smul.u32 432, %s1133_s19  ;;  %v824_v62 = vcombine.low %v1038_v0, %v1038_v0  ;;  %v676_v0 = vld [vmem:[%s1128_s2] sm:$0xff]  ;;  %s888_s30 = sshll.u32 %s1133_s19, 5 }
   0xd   : > { %s239_s8 = scalar_lea.vmem %s1130_s4, %s888_s30  ;;  %s244_s11 = scalar_lea.vmem %s1131_s5, %s888_s30 }
   0xe   : > { %883 = vmatprep.mubr.msk.bf16.mxu0 %vm577_vm0, %v825_v1  ;;  %885 = vmatprep.mubr.msk.bf16.mxu1 %vm577_vm0, %v825_v1  ;;  %s1048_s25 = scalar_lea.vmem %s1126_s0, %s890_s22 }
   0xf   : > { %v902_v2 = vld [vmem:[%s1048_s25 + $0xe4] ss:$16 sps:$4 sm:$0xff]   ;;  %v904_v3 = vld [vmem:[%s1048_s25 + $0xec] ss:$16 sps:$4 sm:$0xff]   ;;  %v906_v4 = vld [vmem:[%s1048_s25 + $0xe0] ss:$16 sps:$4 sm:$0xff]  }
  0x10   : > { %594 = vmatprep.subr.bf16.mxu0 %v902_v2  ;;  %v907_v5 = vld [vmem:[%s1048_s25 + $0xe8] ss:$16 sps:$4 sm:$0xff]   ;;  %635 = vmatprep.subr.bf16.mxu1 %v904_v3  ;;  %v908_v6 = vld [vmem:[%s1048_s25 + $0xc4] ss:$16 sps:$4 sm:$0xff]   ;;  %v910_v7 = vld [vmem:[%s1048_s25 + $0xcc] ss:$16 sps:$4 sm:$0xff]  }
  0x11   : > { %595 = vmatpush1.bf16.msra.mxu0 %v906_v4  ;;  %636 = vmatpush1.bf16.msra.mxu1 %v907_v5  ;;  %v912_v8 = vld [vmem:[%s1048_s25 + $0xc0] ss:$16 sps:$4 sm:$0xff]   ;;  %v913_v9 = vld [vmem:[%s1048_s25 + $0xc8] ss:$16 sps:$4 sm:$0xff]   ;;  %v914_v10 = vld [vmem:[%s1048_s25 + $0xa4] ss:$16 sps:$4 sm:$0xff]  }
  0x12   : > { %596 = vmatprep.subr.bf16.mxu0 %v908_v6  ;;  %637 = vmatprep.subr.bf16.mxu1 %v910_v7  ;;  %v916_v11 = vld [vmem:[%s1048_s25 + $0xac] ss:$16 sps:$4 sm:$0xff]   ;;  %v918_v12 = vld [vmem:[%s1048_s25 + $0xa0] ss:$16 sps:$4 sm:$0xff]   ;;  %v919_v13 = vld [vmem:[%s1048_s25 + $0xa8] ss:$16 sps:$4 sm:$0xff]  }
  0x13   : > { %v920_v14 = vld [vmem:[%s1048_s25 + $0x84] ss:$16 sps:$4 sm:$0xff]   ;;  %v922_v15 = vld [vmem:[%s1048_s25 + $0x8c] ss:$16 sps:$4 sm:$0xff]   ;;  %v924_v16 = vld [vmem:[%s1048_s25 + $0x80] ss:$16 sps:$4 sm:$0xff]  }
  0x14   : > { %v925_v17 = vld [vmem:[%s1048_s25 + $0x88] ss:$16 sps:$4 sm:$0xff]   ;;  %v926_v18 = vld [vmem:[%s1048_s25 + $0x64] ss:$16 sps:$4 sm:$0xff]   ;;  %v928_v19 = vld [vmem:[%s1048_s25 + $0x6c] ss:$16 sps:$4 sm:$0xff]  }
  0x15   : > { %597 = vmatpush1.bf16.msra.mxu0 %v912_v8  ;;  %638 = vmatpush1.bf16.msra.mxu1 %v913_v9  ;;  %v930_v20 = vld [vmem:[%s1048_s25 + $0x60] ss:$16 sps:$4 sm:$0xff]   ;;  %v931_v21 = vld [vmem:[%s1048_s25 + $0x68] ss:$16 sps:$4 sm:$0xff]   ;;  %v932_v22 = vld [vmem:[%s1048_s25 + $0x44] ss:$16 sps:$4 sm:$0xff]  }
  0x16   : > { %598 = vmatprep.subr.bf16.mxu0 %v914_v10  ;;  %639 = vmatprep.subr.bf16.mxu1 %v916_v11  ;;  %v934_v23 = vld [vmem:[%s1048_s25 + $0x4c] ss:$16 sps:$4 sm:$0xff]   ;;  %v936_v24 = vld [vmem:[%s1048_s25 + $0x40] ss:$16 sps:$4 sm:$0xff]   ;;  %v937_v25 = vld [vmem:[%s1048_s25 + $0x48] ss:$16 sps:$4 sm:$0xff]  }
  0x17   : > { %v938_v26 = vld [vmem:[%s1048_s25 + $0x24] ss:$16 sps:$4 sm:$0xff]   ;;  %v940_v27 = vld [vmem:[%s1048_s25 + $0x2c] ss:$16 sps:$4 sm:$0xff]   ;;  %v942_v28 = vld [vmem:[%s1048_s25 + $0x20] ss:$16 sps:$4 sm:$0xff]  }
  0x18   : > { %v943_v29 = vld [vmem:[%s1048_s25 + $0x28] ss:$16 sps:$4 sm:$0xff]   ;;  %v944_v30 = vld [vmem:[%s1048_s25 + $0x4] ss:$16 sps:$4 sm:$0xff]   ;;  %v946_v31 = vld [vmem:[%s1048_s25 + $0xc] ss:$16 sps:$4 sm:$0xff]  }
  0x19   : > { %599 = vmatpush1.bf16.msra.mxu0 %v918_v12  ;;  %640 = vmatpush1.bf16.msra.mxu1 %v919_v13  ;;  %v298_v32 = vld [vmem:[%s1048_s25 + $0x1a0] sm:$0xff]  ;;  %v299_v33 = vld [vmem:[%s1048_s25 + $0x1a8] sm:$0xff]  ;;  %v996_v11 = vmov 0  }
  0x1a   : > { %600 = vmatprep.subr.bf16.mxu0 %v920_v14  ;;  %641 = vmatprep.subr.bf16.mxu1 %v922_v15  ;;  %v948_v34 = vld [vmem:[%s1048_s25] ss:$16 sps:$4 sm:$0xff]   ;;  %v949_v35 = vld [vmem:[%s1048_s25 + $0x8] ss:$16 sps:$4 sm:$0xff]   ;;  %v879_v36 = vcombine.high %v298_v32, %v298_v32  ;;  %v881_v37 = vcombine.high %v299_v33, %v299_v33  ;;  %v878_v38 = vcombine.low %v298_v32, %v298_v32  ;;  %v954_v40 = vld [vmem:[%s1048_s25 + $0x184] ss:$16 sps:$4 sm:$0xff]  }
  0x1b   : > { %v880_v39 = vcombine.low %v299_v33, %v299_v33  ;;  %v956_v43 = vld [vmem:[%s1048_s25 + $0x18c] ss:$16 sps:$4 sm:$0xff]   ;;  %v958_v44 = vld [vmem:[%s1048_s25 + $0x180] ss:$16 sps:$4 sm:$0xff]   ;;  %v959_v45 = vld [vmem:[%s1048_s25 + $0x188] ss:$16 sps:$4 sm:$0xff]   ;;  %900 = vset.pattern.permute.xlu1 %v996_v11  ;;  %901 = vset.pattern.permute.xlu0 %v996_v11 }
  0x1c   : > { %v583_v41 = vsel %vm581_vm1, %v878_v38, 0  ;;  %v960_v46 = vld [vmem:[%s1048_s25 + $0x164] ss:$16 sps:$4 sm:$0xff]   ;;  %v962_v47 = vld [vmem:[%s1048_s25 + $0x16c] ss:$16 sps:$4 sm:$0xff]   ;;  %707 = vperm.xlu1 %900, %v676_v0  }
  0x1d   : > { %601 = vmatpush1.bf16.msra.mxu0 %v924_v16  ;;  %642 = vmatpush1.bf16.msra.mxu1 %v925_v17  ;;  %v589_v42 = vsel %vm581_vm1, %v880_v39, 0  ;;  %v964_v48 = vld [vmem:[%s1048_s25 + $0x160] ss:$16 sps:$4 sm:$0xff]   ;;  %v965_v49 = vld [vmem:[%s1048_s25 + $0x168] ss:$16 sps:$4 sm:$0xff]  }
  0x1e   : > { %602 = vmatprep.subr.bf16.mxu0 %v926_v18  ;;  %643 = vmatprep.subr.bf16.mxu1 %v928_v19  ;;  %v966_v50 = vld [vmem:[%s1048_s25 + $0x144] ss:$16 sps:$4 sm:$0xff]   ;;  %v968_v51 = vld [vmem:[%s1048_s25 + $0x14c] ss:$16 sps:$4 sm:$0xff]   ;;  %v970_v52 = vld [vmem:[%s1048_s25 + $0x140] ss:$16 sps:$4 sm:$0xff]  }
  0x1f   : > { %v971_v53 = vld [vmem:[%s1048_s25 + $0x148] ss:$16 sps:$4 sm:$0xff]   ;;  %v972_v54 = vld [vmem:[%s1048_s25 + $0x124] ss:$16 sps:$4 sm:$0xff]   ;;  %v974_v55 = vld [vmem:[%s1048_s25 + $0x12c] ss:$16 sps:$4 sm:$0xff]  }
  0x20   : > { %v976_v56 = vld [vmem:[%s1048_s25 + $0x120] ss:$16 sps:$4 sm:$0xff]   ;;  %v977_v57 = vld [vmem:[%s1048_s25 + $0x128] ss:$16 sps:$4 sm:$0xff]   ;;  %v978_v58 = vld [vmem:[%s1048_s25 + $0x104] ss:$16 sps:$4 sm:$0xff]  }
  0x21   : > { %603 = vmatpush1.bf16.msra.mxu0 %v930_v20  ;;  %644 = vmatpush1.bf16.msra.mxu1 %v931_v21  ;;  %v980_v59 = vld [vmem:[%s1048_s25 + $0x10c] ss:$16 sps:$4 sm:$0xff]   ;;  %v982_v60 = vld [vmem:[%s1048_s25 + $0x100] ss:$16 sps:$4 sm:$0xff]   ;;  %v983_v61 = vld [vmem:[%s1048_s25 + $0x108] ss:$16 sps:$4 sm:$0xff]  }
  0x22   : > { %604 = vmatprep.subr.bf16.mxu0 %v932_v22  ;;  %645 = vmatprep.subr.bf16.mxu1 %v934_v23  ;;  %v677_v12 = vld [vmem:[%s1129_s3] sm:$0xff] }
  0x23   : > { %716 = vperm.xlu1 %900, %v677_v12   ;;  %v723_v39 = vld [vmem:[%s239_s8] sm:$0xff] }
  0x25   : > { %605 = vmatpush1.bf16.msra.mxu0 %v936_v24  ;;  %646 = vmatpush1.bf16.msra.mxu1 %v937_v25 }
  0x26   : > { %606 = vmatprep.subr.bf16.mxu0 %v938_v26  ;;  %647 = vmatprep.subr.bf16.mxu1 %v940_v27 }
  0x29   : > { %607 = vmatpush1.bf16.msra.mxu0 %v942_v28  ;;  %648 = vmatpush1.bf16.msra.mxu1 %v943_v29 }
  0x2a   : > { %608 = vmatprep.subr.bf16.mxu0 %v944_v30  ;;  %649 = vmatprep.subr.bf16.mxu1 %v946_v31 }
  0x2d   : > { %609 = vmatpush1.bf16.msra.mxu0 %v948_v34  ;;  %650 = vmatpush1.bf16.msra.mxu1 %v949_v35 }
  0x2e   : > { %882 = vmatprep.subr.msk.bf16.mxu0 %vm581_vm1, %v879_v36  ;;  %884 = vmatprep.subr.msk.bf16.mxu1 %vm581_vm1, %v881_v37 }
  0x31   : > { %615 = vmatpush2.bf16.msra.mxu0 %v583_v41  ;;  %656 = vmatpush2.bf16.msra.mxu1 %v589_v42  ;;  %v724_v41 = vld [vmem:[%s239_s8 + $0x8] sm:$0xff]  ;;  %v725_v42 = vld [vmem:[%s239_s8 + $0x10] sm:$0xff] }
  0x32   : > { %616 = vmatprep.subr.bf16.mxu0 %v954_v40  ;;  %657 = vmatprep.subr.bf16.mxu1 %v956_v43  ;;  %v726_v43 = vld [vmem:[%s239_s8 + $0x18] sm:$0xff] }
  0x35   : > { %617 = vmatpush2.bf16.msra.mxu0 %v958_v44  ;;  %658 = vmatpush2.bf16.msra.mxu1 %v959_v45 }
  0x36   : > { %618 = vmatprep.subr.bf16.mxu0 %v960_v46  ;;  %659 = vmatprep.subr.bf16.mxu1 %v962_v47 }
  0x39   : > { %619 = vmatpush2.bf16.msra.mxu0 %v964_v48  ;;  %660 = vmatpush2.bf16.msra.mxu1 %v965_v49 }
  0x3a   : > { %620 = vmatprep.subr.bf16.mxu0 %v966_v50  ;;  %661 = vmatprep.subr.bf16.mxu1 %v968_v51 }
  0x3d   : > { %621 = vmatpush2.bf16.msra.mxu0 %v970_v52  ;;  %662 = vmatpush2.bf16.msra.mxu1 %v971_v53 }
  0x3e   : > { %622 = vmatprep.subr.bf16.mxu0 %v972_v54  ;;  %663 = vmatprep.subr.bf16.mxu1 %v974_v55 }
  0x41   : > { %623 = vmatpush2.bf16.msra.mxu0 %v976_v56  ;;  %664 = vmatpush2.bf16.msra.mxu1 %v977_v57 }
  0x42   : > { %624 = vmatprep.subr.bf16.mxu0 %v978_v58  ;;  %665 = vmatprep.subr.bf16.mxu1 %v980_v59 }
  0x45   : > { %625 = vmatpush2.bf16.msra.mxu0 %v982_v60  ;;  %666 = vmatpush2.bf16.msra.mxu1 %v983_v61 }
  0x48   : > { %627 = vmatmul.mubr.bf16.vlgmr.msra.gmra.mxu0 %v824_v62  ;;  %668 = vmatmul.mubr.bf16.vlgmr.msra.gmra.mxu1 %v824_v62 }
  0x97   : > { %v708_v29 = vpop.permute.xlu1 %707 }
  0x9e   : > { %v717_v40 = vpop.permute.xlu1 %716 }
 0x108   : > { %v628_v63 = vpop.f32.mrf.mxu0  ;;  %v669_v1 = vpop.f32.mrf.mxu1 }
 0x10a   : > { %v630_v2 = vpop.f32.mrf.mxu0  ;;  %v671_v3 = vpop.f32.mrf.mxu1 }
 0x10b   : > { %v678_v4 = vadd.f32 %v630_v2, %v628_v63 }
 0x10c   : > { %v632_v5 = vpop.f32.mrf.mxu0  ;;  %v673_v6 = vpop.f32.mrf.mxu1 }
 0x10d   : > { %v679_v7 = vadd.f32 %v678_v4, %v669_v1 }
 0x10e   : > { %v633_v8 = vpop.f32.mrf.mxu0  ;;  %v674_v9 = vpop.f32.mrf.mxu1 }
 0x10f   : > { %v680_v10 = vadd.f32 %v679_v7, %v671_v3 }
 0x111   : > { %681 = vadd.xlane.f32.xlu0 %v680_v10 }
 0x19a   : > { %v682_v13 = vpop.xlane.xlu0 %681 }
 0x19b   : > { %v684_v14 = vmul.f32 0.001953125, %v682_v13 }
 0x19d   : > { %v685_v15 = vsub.f32 %v628_v63, %v684_v14  ;;  %v686_v16 = vsub.f32 %v630_v2, %v684_v14  ;;  %v687_v17 = vsub.f32 %v669_v1, %v684_v14  ;;  %v688_v18 = vsub.f32 %v671_v3, %v684_v14 }
 0x19f   : > { %v689_v19 = vmul.f32 %v685_v15, %v685_v15  ;;  %v690_v20 = vmul.f32 %v686_v16, %v686_v16  ;;  %v691_v21 = vmul.f32 %v687_v17, %v687_v17  ;;  %v692_v23 = vmul.f32 %v688_v18, %v688_v18 }
 0x1a1   : > { %v693_v22 = vadd.f32 %v690_v20, %v689_v19 }
 0x1a3   : > { %v694_v24 = vadd.f32 %v693_v22, %v691_v21 }
 0x1a5   : > { %v695_v25 = vadd.f32 %v694_v24, %v692_v23 }
 0x1a7   : > { %696 = vadd.xlane.f32.xlu0 %v695_v25 }
 0x230   : > { %v697_v26 = vpop.xlane.xlu0 %696 }
 0x231   : > { %v698_v27 = vmul.f32 0.001953125, %v697_v26 }
 0x233   : > { %v699_v28 = vadd.f32 1e-05, %v698_v27 }
 0x235   : > { %986 = vrsqrt.f32 %v699_v28 }
 0x242   : > { %v987_v30 = vpop.eup %986 }
 0x243   : > { %v701_v31 = vmul.f32 %v987_v30, %v685_v15  ;;  %v702_v32 = vmul.f32 %v987_v30, %v686_v16  ;;  %v703_v33 = vmul.f32 %v987_v30, %v687_v17  ;;  %v704_v34 = vmul.f32 %v987_v30, %v688_v18 }
 0x245   : > { %v710_v35 = vmul.f32 %v708_v29, %v701_v31  ;;  %v711_v36 = vmul.f32 %v708_v29, %v702_v32  ;;  %v712_v37 = vmul.f32 %v708_v29, %v703_v33  ;;  %v713_v38 = vmul.f32 %v708_v29, %v704_v34 }
 0x247   : > { %v719_v44 = vadd.f32 %v717_v40, %v710_v35  ;;  %v720_v45 = vadd.f32 %v717_v40, %v711_v36  ;;  %v721_v46 = vadd.f32 %v717_v40, %v712_v37  ;;  %v722_v47 = vadd.f32 %v717_v40, %v713_v38 }
 0x249   : > { %v727_v48 = vadd.f32 %v723_v39, %v719_v44  ;;  %v728_v49 = vadd.f32 %v724_v41, %v720_v45  ;;  %v729_v50 = vadd.f32 %v725_v42, %v721_v46  ;;  %v730_v51 = vadd.f32 %v726_v43, %v722_v47 }
 0x24b   : > { %vm731_vm2 = vcmp.gt.f32.partialorder %v727_v48, 0.0  ;;  %vm732_vm3 = vcmp.gt.f32.partialorder %v728_v49, 0.0  ;;  %vm733_vm4 = vcmp.gt.f32.partialorder %v729_v50, 0.0  ;;  %vm734_vm5 = vcmp.gt.f32.partialorder %v730_v51, 0.0 }
 0x24c   : > { %v735_v52 = vmul.f32 0.01, %v727_v48  ;;  %v736_v53 = vmul.f32 0.01, %v728_v49  ;;  %v737_v54 = vmul.f32 0.01, %v729_v50 }
 0x24d   : > { %v738_v55 = vmul.f32 0.01, %v730_v51 }
 0x24e   : > { %v739_v56 = vsel %vm731_vm2, %v727_v48, %v735_v52  ;;  %v740_v57 = vsel %vm732_vm3, %v728_v49, %v736_v53  ;;  %v741_v58 = vsel %vm733_vm4, %v729_v50, %v737_v54 }
 0x24f   : > { %v742_v59 = vsel %vm734_vm5, %v730_v51, %v738_v55  ;;  %743 = vst [vmem:[%s244_s11] sm:$0xff] %v739_v56  ;;  %744 = vst [vmem:[%s244_s11 + $0x8] sm:$0xff] %v740_v57 }
 0x250   : > { %745 = vst [vmem:[%s244_s11 + $0x10] sm:$0xff] %v741_v58  ;;  %746 = vst [vmem:[%s244_s11 + $0x18] sm:$0xff] %v742_v59 }
 0x251 PF: > { %s15_s18 = sadd.s32 1, %s994_s18  }
 0x252   : > { %p12_p4 = scmp.ge.s32.totalorder %s15_s18, 5  }
 0x254   :  { %14 = sbr.rel (!%p12_p4) target bundleno = 1 (0x1), region = 73 }

// kernel: gate_dyn_unet_forward.19
= control target key start
LH: loop header
LB: loop body
LE: loop exit
PB: predicated region body
PF: predicated region fallthrough
CT: control target
= control target key end

     0   :  { %s581_s15 = smov 0   ;;  %s642_s0 = inlined_call_operand.vmem [shape: bf16[3,216,64], index: 0, kind: input, shape index: {}]   ;;  %s643_s1 = inlined_call_operand.vmem [shape: bf16[16,216], index: 1, kind: input, shape index: {}]   ;;  %s644_s2 = inlined_call_operand.vmem [shape: f32[16,1], index: 2, kind: input, shape index: {}]   ;;  %s645_s3 = inlined_call_operand.vmem [shape: f32[16,1], index: 3, kind: input, shape index: {}]   ;;  %s646_s4 = inlined_call_operand.vmem [shape: f32[3,16,64], index: 4, kind: output, shape index: {}]  }
   0x1 LB: > { %s486_s16 = sadd.s32 4294967295, %s553_s15   ;;  %p490_p0 = scmp.ge.s32.totalorder %s553_s15, 1  ;;  %s553_s15 = sphi %s581_s15, %s14_s15  }
   0x2   : > { %p162_p1 = scmp.lt.s32.totalorder %s553_s15, 4 }
   0x4   : > { %p163_p2 = pnand %p490_p0, %p162_p1 }
   0x5   : > { %p188_p3 = scmp.lt.s32.totalorder (!%p163_p2), %s486_s16, 2 }
   0x6   : > { %166 = sbr.rel (%p163_p2) target bundleno = 580 (0x244), region = 36 }
   0xb   : > { %vm318_vm0 = vcmask 719872   ;;  %v555_v0 = vmov 0   ;;  %v542_v1 = vld [vmem:[%s643_s1 + $0x4] ss:$8 sps:$4 sm:$0xff]   ;;  %s648_s16 = smov (!%p188_p3, %s486_s16), 2  ;;  %vm322_vm1 = vcmask 1043456  }
   0xc   : > { %326 = vmatprep.subr.bf16.mxu0 %v555_v0  ;;  %525 = vset.pattern.permute.xlu1 %v555_v0  ;;  %s514_s19 = smul.u32 108, %s648_s16  ;;  %v540_v17 = vld [vmem:[%s643_s1] ss:$8 sps:$4 sm:$0xff]   ;;  %vm371_vm2 = vcmask 523264   ;;  %s513_s7 = sshll.u32 %s648_s16, 4 }
   0xd   : > { %524 = vset.pattern.permute.xlu0 %v555_v0  ;;  %510 = vmatprep.mubr.msk.bf16.mxu0 %vm318_vm0, %v542_v1  ;;  %v368_v18 = vld [vmem:[%s644_s2 + $0x8] sm:$0xff]  ;;  %v369_v19 = vld [vmem:[%s645_s3] sm:$0xff]  ;;  %s197_s10 = scalar_lea.vmem %s646_s4, %s513_s7 }
   0xe   : > { %s598_s22 = scalar_lea.vmem %s642_s0, %s514_s19  ;;  %406 = vperm.xlu1 %525, %v368_v18   ;;  %v367_v26 = vld [vmem:[%s644_s2] sm:$0xff]  ;;  %v370_v37 = vld [vmem:[%s645_s3 + $0x8] sm:$0xff] }
   0xf   : > { %v526_v2 = vld [vmem:[%s598_s22 + $0x38] sm:$0xff]   ;;  %v527_v3 = vld [vmem:[%s598_s22 + $0x30] sm:$0xff]   ;;  %v528_v4 = vld [vmem:[%s598_s22 + $0x28] sm:$0xff]  }
  0x10   : > { %327 = vmatpush1.bf16.msra.mxu0 %v526_v2  ;;  %v529_v5 = vld [vmem:[%s598_s22 + $0x20] sm:$0xff]   ;;  %v530_v6 = vld [vmem:[%s598_s22 + $0x18] sm:$0xff]   ;;  %v531_v7 = vld [vmem:[%s598_s22 + $0x10] sm:$0xff]  }
  0x11   : > { %328 = vmatprep.subr.bf16.mxu0 %v555_v0  ;;  %v532_v8 = vld [vmem:[%s598_s22 + $0x8] sm:$0xff]   ;;  %v533_v9 = vld [vmem:[%s598_s22] sm:$0xff]   ;;  %v536_v13 = vld [vmem:[%s598_s22 + $0x58] sm:$0xff]  }
  0x12   : > { %v534_v10 = vld [vmem:[%s598_s22 + $0x68] ss:$0 sps:$4 sm:$0xff]   ;;  %v535_v12 = vld [vmem:[%s598_s22 + $0x60] sm:$0xff]   ;;  %v537_v14 = vld [vmem:[%s598_s22 + $0x50] sm:$0xff]   ;;  %413 = vperm.xlu1 %525, %v369_v19  }
  0x13   : > { %v324_v11 = vsel %vm322_vm1, %v534_v10, 0  ;;  %v538_v15 = vld [vmem:[%s598_s22 + $0x48] sm:$0xff]   ;;  %v539_v16 = vld [vmem:[%s598_s22 + $0x40] sm:$0xff]  }
  0x14   : > { %329 = vmatpush1.bf16.msra.mxu0 %v527_v3 }
  0x15   : > { %330 = vmatprep.subr.bf16.mxu0 %v555_v0 }
  0x18   : > { %331 = vmatpush1.bf16.msra.mxu0 %v528_v4 }
  0x19   : > { %332 = vmatprep.subr.bf16.mxu0 %v555_v0 }
  0x1c   : > { %333 = vmatpush1.bf16.msra.mxu0 %v529_v5 }
  0x1d   : > { %334 = vmatprep.subr.bf16.mxu0 %v555_v0 }
  0x20   : > { %335 = vmatpush1.bf16.msra.mxu0 %v530_v6 }
  0x21   : > { %336 = vmatprep.subr.bf16.mxu0 %v555_v0 }
  0x24   : > { %337 = vmatpush1.bf16.msra.mxu0 %v531_v7 }
  0x25   : > { %338 = vmatprep.subr.bf16.mxu0 %v555_v0 }
  0x28   : > { %339 = vmatpush1.bf16.msra.mxu0 %v532_v8 }
  0x29   : > { %340 = vmatprep.subr.bf16.mxu0 %v555_v0 }
  0x2c   : > { %341 = vmatpush1.bf16.msra.mxu0 %v533_v9 }
  0x2d   : > { %346 = vmatprep.subr.bf16.mxu0 %v555_v0 }
  0x30   : > { %347 = vmatpush2.bf16.msra.mxu0 %v324_v11 }
  0x31   : > { %348 = vmatprep.subr.bf16.mxu0 %v555_v0 }
  0x34   : > { %349 = vmatpush2.bf16.msra.mxu0 %v535_v12 }
  0x35   : > { %350 = vmatprep.subr.bf16.mxu0 %v555_v0 }
  0x38   : > { %351 = vmatpush2.bf16.msra.mxu0 %v536_v13 }
  0x39   : > { %352 = vmatprep.subr.bf16.mxu0 %v555_v0 }
  0x3c   : > { %353 = vmatpush2.bf16.msra.mxu0 %v537_v14 }
  0x3d   : > { %354 = vmatprep.subr.bf16.mxu0 %v555_v0 }
  0x40   : > { %355 = vmatpush2.bf16.msra.mxu0 %v538_v15 }
  0x41   : > { %356 = vmatprep.subr.bf16.mxu0 %v555_v0 }
  0x44   : > { %357 = vmatpush2.bf16.msra.mxu0 %v539_v16 }
  0x47   : > { %359 = vmatmul.mubr.bf16.vlgmr.msra.gmra.mxu0 %v540_v17 }
  0x89   : > { %v407_v38 = vpop.permute.xlu1 %406 }
  0x8d   : > { %v414_v39 = vpop.permute.xlu1 %413 }
 0x107   : > { %v360_v20 = vpop.f32.mrf.mxu0 }
 0x108   : > { %v372_v21 = vsel %vm371_vm2, %v360_v20, 0.0 }
 0x109   : > { %373 = vadd.xlane.f32.xlu0 %v372_v21  ;;  %v362_v22 = vpop.f32.mrf.mxu0 }
 0x10b   : > { %v363_v23 = vpop.f32.mrf.mxu0 }
 0x10c   : > { %v375_v24 = vsel %vm371_vm2, %v363_v23, 0.0 }
 0x10d   : > { %376 = vadd.xlane.f32.xlu0 %v375_v24  ;;  %v365_v25 = vpop.f32.mrf.mxu0 }
 0x123   : > { %401 = vperm.xlu0 %524, %v367_v26  }
 0x192   : > { %v374_v27 = vpop.xlane.xlu0 %373 }
 0x193   : > { %v379_v28 = vmul.f32 0.015625, %v374_v27 }
 0x195   : > { %v381_v29 = vsub.f32 %v360_v20, %v379_v28 }
 0x196   : > { %v377_v30 = vpop.xlane.xlu0 %376 }
 0x197   : > { %v380_v31 = vmul.f32 0.015625, %v377_v30  ;;  %v383_v32 = vmul.f32 %v381_v29, %v381_v29 }
 0x199   : > { %v382_v33 = vsub.f32 %v363_v23, %v380_v31  ;;  %v385_v34 = vsel %vm371_vm2, %v383_v32, 0.0 }
 0x19a   : > { %386 = vadd.xlane.f32.xlu1 %v385_v34 }
 0x19b   : > { %v384_v35 = vmul.f32 %v382_v33, %v382_v33 }
 0x19d   : > { %v388_v36 = vsel %vm371_vm2, %v384_v35, 0.0 }
 0x19e   : > { %389 = vadd.xlane.f32.xlu1 %v388_v36  ;;  %v402_v47 = vpop.permute.xlu0 %401 }
 0x1af   : > { %418 = vperm.xlu1 %525, %v370_v37  }
 0x223   : > { %v387_v40 = vpop.xlane.xlu1 %386 }
 0x224   : > { %v391_v41 = vmul.f32 0.015625, %v387_v40 }
 0x226   : > { %v393_v42 = vadd.f32 1e-05, %v391_v41 }
 0x227   : > { %v390_v43 = vpop.xlane.xlu1 %389 }
 0x228   : > { %543 = vrsqrt.f32 %v393_v42  ;;  %v392_v44 = vmul.f32 0.015625, %v390_v43 }
 0x22a   : > { %v394_v45 = vadd.f32 1e-05, %v392_v44 }
 0x22b   : > { %v419_v55 = vpop.permute.xlu1 %418 }
 0x22c   : > { %545 = vrsqrt.f32 %v394_v45 }
 0x235   : > { %v544_v46 = vpop.eup %543 }
 0x236   : > { %v397_v48 = vmul.f32 %v544_v46, %v381_v29 }
 0x238   : > { %v409_v49 = vmul.f32 %v402_v47, %v397_v48 }
 0x239   : > { %v546_v50 = vpop.eup %545 }
 0x23a   : > { %v398_v51 = vmul.f32 %v546_v50, %v382_v33  ;;  %v421_v52 = vadd.f32 %v414_v39, %v409_v49 }
 0x23c   : > { %v410_v53 = vmul.f32 %v407_v38, %v398_v51  ;;  %vm423_vm3 = vcmp.gt.f32.partialorder %v421_v52, 0.0  ;;  %v425_v54 = vmul.f32 0.01, %v421_v52 }
 0x23e   : > { %v422_v56 = vadd.f32 %v419_v55, %v410_v53  ;;  %v427_v57 = vsel %vm423_vm3, %v421_v52, %v425_v54 }
 0x23f   : > { %429 = vst.msk [vmem:[%s197_s10] sm:$0xff] %vm371_vm2, %v427_v57 }
 0x240   : > { %vm424_vm4 = vcmp.gt.f32.partialorder %v422_v56, 0.0  ;;  %v426_v58 = vmul.f32 0.01, %v422_v56 }
 0x242   : > { %v428_v59 = vsel %vm424_vm4, %v422_v56, %v426_v58 }
 0x243   : > { %430 = vst.msk [vmem:[%s197_s10 + $0x8] sm:$0xff] %vm371_vm2, %v428_v59 }
 0x244 PF: > { %s14_s15 = sadd.s32 1, %s553_s15  }
 0x245   : > { %p11_p4 = scmp.ge.s32.totalorder %s14_s15, 5  }
 0x247   :  { %13 = sbr.rel (!%p11_p4) target bundleno = 1 (0x1), region = 66 }

// kernel: gate_dyn_unet_forward.20
= control target key start
LH: loop header
LB: loop body
LE: loop exit
PB: predicated region body
PF: predicated region fallthrough
CT: control target
= control target key end

     0   :  { %s441_s15 = smov 0   ;;  %s483_s0 = inlined_call_operand.vmem [shape: bf16[3,8,64], index: 0, kind: input, shape index: {}]   ;;  %s484_s1 = inlined_call_operand.vmem [shape: bf16[16,8], index: 1, kind: input, shape index: {}]   ;;  %s485_s2 = inlined_call_operand.vmem [shape: f32[16,1], index: 2, kind: input, shape index: {}]   ;;  %s486_s3 = inlined_call_operand.vmem [shape: f32[16,1], index: 3, kind: input, shape index: {}]   ;;  %s487_s4 = inlined_call_operand.vmem [shape: f32[3,16,64], index: 4, kind: output, shape index: {}]  }
   0x1 LB: > { %s366_s16 = sadd.s32 4294967295, %s411_s15   ;;  %p370_p0 = scmp.ge.s32.totalorder %s411_s15, 1  ;;  %s411_s15 = sphi %s441_s15, %s14_s15  }
   0x2   : > { %p161_p1 = scmp.lt.s32.totalorder %s411_s15, 4 }
   0x4   : > { %p162_p2 = pnand %p370_p0, %p161_p1 }
   0x5   : > { %p186_p3 = scmp.lt.s32.totalorder (!%p162_p2), %s366_s16, 2 }
   0x6   : > { %165 = sbr.rel (%p162_p2) target bundleno = 525 (0x20d), region = 36 }
   0xb   : > { %v413_v0 = vmov 0.0   ;;  %vm414_vm0 = vmmov 0   ;;  %s489_s16 = smov (!%p186_p3, %s366_s16), 2  ;;  %vm208_vm1 = vcmask 1043456   ;;  %v400_v3 = vld [vmem:[%s484_s1] sm:$0xff]   ;;  %vm204_vm2 = vcmask 64512  }
   0xc   : > { %381 = vmatprep.subr.bf16.mxu0 %v413_v0  ;;  %383 = vmatprep.mubr.msk.bf16.mxu0 %vm414_vm0, %v413_v0  ;;  %s371_s17 = sshll.u32 %s489_s16, 2  ;;  %v254_v4 = vld [vmem:[%s485_s2 + $0x8] sm:$0xff]  ;;  %v415_v5 = vmov 0   ;;  %v255_v6 = vld [vmem:[%s486_s3] sm:$0xff]  ;;  %vm257_vm3 = vcmask 523264   ;;  %s378_s5 = sshll.u32 %s489_s16, 4 }
   0xd   : > { %s189_s20 = scalar_lea.vmem %s483_s0, %s371_s17  ;;  %399 = vset.pattern.permute.xlu1 %v415_v5  ;;  %398 = vset.pattern.permute.xlu0 %v415_v5  ;;  %v253_v13 = vld [vmem:[%s485_s2] sm:$0xff]  ;;  %v256_v24 = vld [vmem:[%s486_s3 + $0x8] sm:$0xff]  ;;  %s194_s8 = scalar_lea.vmem %s487_s4, %s378_s5 }
   0xe   : > { %v196_v1 = vld [vmem:[%s189_s20] sm:$0xf]  ;;  %292 = vperm.xlu1 %399, %v254_v4  }
   0xf   : > { %v210_v2 = vsel %vm208_vm1, %v196_v1, 0 }
  0x10   : > { %382 = vmatpush3.bf16.msra.mxu0 %v210_v2 }
  0x12   : > { %299 = vperm.xlu1 %399, %v255_v6  }
  0x13   : > { %384 = vmatmul.mubr.msk.bf16.vlgmr.msra.gmra.mxu0 %vm204_vm2, %v400_v3 }
  0x89   : > { %v293_v25 = vpop.permute.xlu1 %292 }
  0x8d   : > { %v300_v26 = vpop.permute.xlu1 %299 }
  0xd3   : > { %v246_v7 = vpop.f32.mrf.mxu0 }
  0xd4   : > { %v258_v8 = vsel %vm257_vm3, %v246_v7, 0.0 }
  0xd5   : > { %259 = vadd.xlane.f32.xlu0 %v258_v8  ;;  %v385_v9 = vpop.f32.mrf.mxu0 }
  0xd7   : > { %v249_v10 = vpop.f32.mrf.mxu0 }
  0xd8   : > { %v261_v11 = vsel %vm257_vm3, %v249_v10, 0.0 }
  0xd9   : > { %262 = vadd.xlane.f32.xlu0 %v261_v11  ;;  %v386_v12 = vpop.f32.mrf.mxu0 }
  0xef   : > { %287 = vperm.xlu0 %398, %v253_v13  }
 0x15e   : > { %v260_v14 = vpop.xlane.xlu0 %259 }
 0x15f   : > { %v265_v15 = vmul.f32 0.015625, %v260_v14 }
 0x161   : > { %v267_v16 = vsub.f32 %v246_v7, %v265_v15 }
 0x162   : > { %v263_v17 = vpop.xlane.xlu0 %262 }
 0x163   : > { %v266_v18 = vmul.f32 0.015625, %v263_v17  ;;  %v269_v19 = vmul.f32 %v267_v16, %v267_v16 }
 0x165   : > { %v268_v20 = vsub.f32 %v249_v10, %v266_v18  ;;  %v271_v21 = vsel %vm257_vm3, %v269_v19, 0.0 }
 0x166   : > { %272 = vadd.xlane.f32.xlu1 %v271_v21 }
 0x167   : > { %v270_v22 = vmul.f32 %v268_v20, %v268_v20 }
 0x169   : > { %v274_v23 = vsel %vm257_vm3, %v270_v22, 0.0 }
 0x16a   : > { %275 = vadd.xlane.f32.xlu1 %v274_v23  ;;  %v288_v34 = vpop.permute.xlu0 %287 }
 0x17b   : > { %304 = vperm.xlu1 %399, %v256_v24  }
 0x1ef   : > { %v273_v27 = vpop.xlane.xlu1 %272 }
 0x1f0   : > { %v277_v28 = vmul.f32 0.015625, %v273_v27 }
 0x1f2   : > { %v279_v29 = vadd.f32 1e-05, %v277_v28 }
 0x1f3   : > { %v276_v30 = vpop.xlane.xlu1 %275 }
 0x1f4   : > { %401 = vrsqrt.f32 %v279_v29  ;;  %v278_v31 = vmul.f32 0.015625, %v276_v30 }
 0x1f6   : > { %v280_v32 = vadd.f32 1e-05, %v278_v31 }
 0x1f7   : > { %v305_v41 = vpop.permute.xlu1 %304 }
 0x1f8   : > { %403 = vrsqrt.f32 %v280_v32 }
 0x201   : > { %v402_v33 = vpop.eup %401 }
 0x202   : > { %v283_v35 = vmul.f32 %v402_v33, %v267_v16 }
 0x204   : > { %v295_v36 = vmul.f32 %v288_v34, %v283_v35 }
 0x205   : > { %v404_v37 = vpop.eup %403 }
 0x206   : > { %v284_v38 = vmul.f32 %v404_v37, %v268_v20  ;;  %v307_v39 = vadd.f32 %v300_v26, %v295_v36 }
 0x208   : > { %v296_v40 = vmul.f32 %v293_v25, %v284_v38  ;;  %309 = vst.msk [vmem:[%s194_s8] sm:$0xff] %vm257_vm3, %v307_v39 }
 0x20a   : > { %v308_v42 = vadd.f32 %v305_v41, %v296_v40 }
 0x20c   : > { %310 = vst.msk [vmem:[%s194_s8 + $0x8] sm:$0xff] %vm257_vm3, %v308_v42 }
 0x20d PF: > { %s14_s15 = sadd.s32 1, %s411_s15  }
 0x20e   : > { %p11_p4 = scmp.ge.s32.totalorder %s14_s15, 5  }
 0x210   :  { %13 = sbr.rel (!%p11_p4) target bundleno = 1 (0x1), region = 66 }

// kernel: gate_dyn_unet_forward.21
= control target key start
LH: loop header
LB: loop body
LE: loop exit
PB: predicated region body
PF: predicated region fallthrough
CT: control target
= control target key end

     0   :  { %s862_s18 = smov 0   ;;  %s958_s0 = inlined_call_operand.vmem [shape: bf16[3,432,64], index: 0, kind: input, shape index: {}]   ;;  %s959_s1 = inlined_call_operand.vmem [shape: bf16[16,432], index: 1, kind: input, shape index: {}]   ;;  %s960_s2 = inlined_call_operand.vmem [shape: f32[16,1], index: 2, kind: input, shape index: {}]   ;;  %s961_s3 = inlined_call_operand.vmem [shape: f32[16,1], index: 3, kind: input, shape index: {}]   ;;  %s962_s4 = inlined_call_operand.vmem [shape: f32[3,16,64], index: 4, kind: input, shape index: {}]   ;;  %s963_s5 = inlined_call_operand.vmem [shape: f32[3,16,64], index: 5, kind: output, shape index: {}]  }
   0x1 LB: > { %s706_s19 = sadd.s32 4294967295, %s829_s18   ;;  %p710_p0 = scmp.ge.s32.totalorder %s829_s18, 1  ;;  %s829_s18 = sphi %s862_s18, %s15_s18  }
   0x2   : > { %p197_p1 = scmp.lt.s32.totalorder %s829_s18, 4 }
   0x4   : > { %p198_p2 = pnand %p710_p0, %p197_p1 }
   0x5   : > { %p230_p3 = scmp.lt.s32.totalorder (!%p198_p2), %s706_s19, 2 }
   0x6   : > { %201 = sbr.rel (%p198_p2) target bundleno = 572 (0x23c), region = 40 }
   0xb   : > { %v831_v0 = vmov 0   ;;  %v812_v1 = vld [vmem:[%s959_s1 + $0x4] ss:$16 sps:$4 sm:$0xff]   ;;  %vm485_vm0 = vcmask 392192   ;;  %s965_s19 = smov (!%p230_p3, %s706_s19), 2  ;;  %v572_v32 = vld [vmem:[%s960_s2 + $0x8] sm:$0xff] }
   0xc   : > { %530 = vmatprep.subr.bf16.mxu1 %v831_v0  ;;  %785 = vset.pattern.permute.xlu1 %v831_v0  ;;  %v818_v2 = vld [vmem:[%s959_s1 + $0xc] ss:$16 sps:$4 sm:$0xff]   ;;  %s774_s24 = smul.u32 216, %s965_s19  ;;  %v810_v28 = vld [vmem:[%s959_s1] ss:$16 sps:$4 sm:$0xff]   ;;  %vm575_vm1 = vcmask 523264  }
   0xd   : > { %784 = vset.pattern.permute.xlu0 %v831_v0  ;;  %521 = vmatprep.mubr.bf16.mxu0 %v812_v1  ;;  %v816_v31 = vld [vmem:[%s959_s1 + $0x8] ss:$16 sps:$4 sm:$0xff]   ;;  %v573_v33 = vld [vmem:[%s961_s3] sm:$0xff]  ;;  %s750_s15 = sshll.u32 %s965_s19, 4 }
   0xe   : > { %747 = vmatprep.mubr.msk.bf16.mxu1 %vm485_vm0, %v818_v2  ;;  %s885_s27 = scalar_lea.vmem %s958_s0, %s774_s24  ;;  %610 = vperm.xlu1 %785, %v572_v32   ;;  %v571_v48 = vld [vmem:[%s960_s2] sm:$0xff]  ;;  %v574_v59 = vld [vmem:[%s961_s3 + $0x8] sm:$0xff]  ;;  %s239_s20 = scalar_lea.vmem %s962_s4, %s750_s15 }
   0xf   : > { %v786_v3 = vld [vmem:[%s885_s27 + $0xb8] sm:$0xff]   ;;  %v789_v6 = vld [vmem:[%s885_s27 + $0xb0] sm:$0xff]   ;;  %v792_v9 = vld [vmem:[%s885_s27 + $0xa8] sm:$0xff]   ;;  %s244_s19 = scalar_lea.vmem %s963_s5, %s750_s15 }
  0x10   : > { %v787_v4 = vld [vmem:[%s885_s27 + $0x78] sm:$0xff]   ;;  %531 = vmatpush1.bf16.msra.mxu1 %v786_v3  ;;  %v790_v7 = vld [vmem:[%s885_s27 + $0x70] sm:$0xff]   ;;  %v793_v10 = vld [vmem:[%s885_s27 + $0x68] sm:$0xff]  }
  0x11   : > { %v788_v5 = vld [vmem:[%s885_s27 + $0x38] sm:$0xff]   ;;  %752 = vmatprep.subr.bf16.mxu0 %v787_v4  ;;  %532 = vmatprep.subr.bf16.mxu1 %v831_v0  ;;  %v791_v8 = vld [vmem:[%s885_s27 + $0x30] sm:$0xff]   ;;  %v794_v11 = vld [vmem:[%s885_s27 + $0x28] sm:$0xff]  }
  0x12   : > { %753 = vmatpush3.bf16.msra.mxu0 %v788_v5  ;;  %v795_v12 = vld [vmem:[%s885_s27 + $0xa0] sm:$0xff]   ;;  %v799_v15 = vld [vmem:[%s885_s27 + $0x58] sm:$0xff]   ;;  %v802_v18 = vld [vmem:[%s885_s27 + $0x50] sm:$0xff]   ;;  %617 = vperm.xlu1 %785, %v573_v33  }
  0x13   : > { %754 = vmatprep.subr.bf16.mxu0 %v790_v7  ;;  %v796_v13 = vld [vmem:[%s885_s27 + $0x60] sm:$0xff]   ;;  %v798_v16 = vld [vmem:[%s885_s27 + $0x98] sm:$0xff]   ;;  %v801_v19 = vld [vmem:[%s885_s27 + $0x90] sm:$0xff]  }
  0x14   : > { %533 = vmatpush1.bf16.msra.mxu1 %v789_v6  ;;  %v797_v14 = vld [vmem:[%s885_s27 + $0x20] sm:$0xff]   ;;  %v800_v17 = vld [vmem:[%s885_s27 + $0x18] sm:$0xff]   ;;  %v803_v20 = vld [vmem:[%s885_s27 + $0x10] sm:$0xff]  }
  0x15   : > { %534 = vmatprep.subr.bf16.mxu1 %v831_v0  ;;  %v805_v21 = vld [vmem:[%s885_s27 + $0x48] sm:$0xff]   ;;  %v808_v24 = vld [vmem:[%s885_s27 + $0x40] sm:$0xff]   ;;  %v813_v27 = vld [vmem:[%s885_s27 + $0xd0] sm:$0xff]  }
  0x16   : > { %755 = vmatpush3.bf16.msra.mxu0 %v791_v8  ;;  %v804_v22 = vld [vmem:[%s885_s27 + $0x88] sm:$0xff]   ;;  %v807_v25 = vld [vmem:[%s885_s27 + $0x80] sm:$0xff]  }
  0x17   : > { %756 = vmatprep.subr.bf16.mxu0 %v793_v10  ;;  %v806_v23 = vld [vmem:[%s885_s27 + $0x8] sm:$0xff]   ;;  %v809_v26 = vld [vmem:[%s885_s27] sm:$0xff]  }
  0x18   : > { %535 = vmatpush1.bf16.msra.mxu1 %v792_v9  ;;  %v814_v29 = vld [vmem:[%s885_s27 + $0xc8] sm:$0xff]   ;;  %v815_v30 = vld [vmem:[%s885_s27 + $0xc0] sm:$0xff]  }
  0x19   : > { %536 = vmatprep.subr.bf16.mxu1 %v831_v0  ;;  %v627_v9 = vld [vmem:[%s239_s20] sm:$0xff] }
  0x1a   : > { %757 = vmatpush3.bf16.msra.mxu0 %v794_v11 }
  0x1b   : > { %758 = vmatprep.subr.bf16.mxu0 %v796_v13 }
  0x1c   : > { %537 = vmatpush1.bf16.msra.mxu1 %v795_v12 }
  0x1d   : > { %538 = vmatprep.subr.bf16.mxu1 %v831_v0 }
  0x1e   : > { %759 = vmatpush3.bf16.msra.mxu0 %v797_v14  ;;  %v628_v14 = vld [vmem:[%s239_s20 + $0x8] sm:$0xff] }
  0x1f   : > { %760 = vmatprep.subr.bf16.mxu0 %v799_v15 }
  0x20   : > { %539 = vmatpush1.bf16.msra.mxu1 %v798_v16 }
  0x21   : > { %540 = vmatprep.subr.bf16.mxu1 %v831_v0 }
  0x22   : > { %761 = vmatpush3.bf16.msra.mxu0 %v800_v17 }
  0x23   : > { %762 = vmatprep.subr.bf16.mxu0 %v802_v18 }
  0x24   : > { %541 = vmatpush1.bf16.msra.mxu1 %v801_v19 }
  0x25   : > { %542 = vmatprep.subr.bf16.mxu1 %v831_v0 }
  0x26   : > { %763 = vmatpush3.bf16.msra.mxu0 %v803_v20 }
  0x27   : > { %764 = vmatprep.subr.bf16.mxu0 %v805_v21 }
  0x28   : > { %543 = vmatpush1.bf16.msra.mxu1 %v804_v22 }
  0x29   : > { %544 = vmatprep.subr.bf16.mxu1 %v831_v0 }
  0x2a   : > { %765 = vmatpush3.bf16.msra.mxu0 %v806_v23 }
  0x2b   : > { %766 = vmatprep.subr.bf16.mxu0 %v808_v24 }
  0x2c   : > { %545 = vmatpush1.bf16.msra.mxu1 %v807_v25 }
  0x2d   : > { %556 = vmatprep.subr.bf16.mxu1 %v831_v0 }
  0x2e   : > { %767 = vmatpush3.bf16.msra.mxu0 %v809_v26 }
  0x30   : > { %557 = vmatpush2.bf16.msra.mxu1 %v813_v27 }
  0x31   : > { %522 = vmatmul.mubr.bf16.vlgmr.msra.gmra.mxu0 %v810_v28  ;;  %558 = vmatprep.subr.bf16.mxu1 %v831_v0 }
  0x34   : > { %559 = vmatpush2.bf16.msra.mxu1 %v814_v29 }
  0x35   : > { %560 = vmatprep.subr.bf16.mxu1 %v831_v0 }
  0x38   : > { %561 = vmatpush2.bf16.msra.mxu1 %v815_v30 }
  0x3b   : > { %563 = vmatmul.mubr.bf16.vlgmr.msra.gmra.mxu1 %v816_v31 }
  0x89   : > { %v611_v60 = vpop.permute.xlu1 %610 }
  0x8d   : > { %v618_v61 = vpop.permute.xlu1 %617 }
  0xf1   : > { %v768_v34 = vpop.f32.mrf.mxu0 }
  0xf3   : > { %v769_v35 = vpop.f32.mrf.mxu0 }
  0xf4   : > { %v770_v37 = vadd.f32 %v769_v35, %v768_v34 }
  0xf5   : > { %v771_v36 = vpop.f32.mrf.mxu0 }
  0xf7   : > { %v772_v38 = vpop.f32.mrf.mxu0 }
  0xf8   : > { %v773_v42 = vadd.f32 %v772_v38, %v771_v36 }
  0xfb   : > { %v564_v39 = vpop.f32.mrf.mxu1 }
  0xfc   : > { %v565_v40 = vadd.f32 %v770_v37, %v564_v39 }
  0xfd   : > { %v566_v41 = vpop.f32.mrf.mxu1 }
  0xfe   : > { %v576_v43 = vsel %vm575_vm1, %v565_v40, 0.0 }
  0xff   : > { %v567_v44 = vpop.f32.mrf.mxu1  ;;  %577 = vadd.xlane.f32.xlu0 %v576_v43 }
 0x100   : > { %v568_v45 = vadd.f32 %v773_v42, %v567_v44 }
 0x101   : > { %v569_v46 = vpop.f32.mrf.mxu1 }
 0x102   : > { %v579_v47 = vsel %vm575_vm1, %v568_v45, 0.0 }
 0x103   : > { %580 = vadd.xlane.f32.xlu0 %v579_v47 }
 0x119   : > { %605 = vperm.xlu0 %784, %v571_v48  }
 0x188   : > { %v578_v49 = vpop.xlane.xlu0 %577 }
 0x189   : > { %v583_v50 = vmul.f32 0.015625, %v578_v49 }
 0x18b   : > { %v585_v51 = vsub.f32 %v565_v40, %v583_v50 }
 0x18c   : > { %v581_v52 = vpop.xlane.xlu0 %580 }
 0x18d   : > { %v584_v53 = vmul.f32 0.015625, %v581_v52  ;;  %v587_v54 = vmul.f32 %v585_v51, %v585_v51 }
 0x18f   : > { %v586_v55 = vsub.f32 %v568_v45, %v584_v53  ;;  %v589_v56 = vsel %vm575_vm1, %v587_v54, 0.0 }
 0x190   : > { %590 = vadd.xlane.f32.xlu1 %v589_v56 }
 0x191   : > { %v588_v57 = vmul.f32 %v586_v55, %v586_v55 }
 0x193   : > { %v592_v58 = vsel %vm575_vm1, %v588_v57, 0.0 }
 0x194   : > { %593 = vadd.xlane.f32.xlu1 %v592_v58  ;;  %v606_v5 = vpop.permute.xlu0 %605 }
 0x1a5   : > { %622 = vperm.xlu1 %785, %v574_v59  }
 0x219   : > { %v591_v62 = vpop.xlane.xlu1 %590 }
 0x21a   : > { %v595_v63 = vmul.f32 0.015625, %v591_v62 }
 0x21c   : > { %v597_v0 = vadd.f32 1e-05, %v595_v63 }
 0x21d   : > { %v594_v1 = vpop.xlane.xlu1 %593 }
 0x21e   : > { %819 = vrsqrt.f32 %v597_v0  ;;  %v596_v2 = vmul.f32 0.015625, %v594_v1 }
 0x220   : > { %v598_v3 = vadd.f32 1e-05, %v596_v2 }
 0x221   : > { %v623_v15 = vpop.permute.xlu1 %622 }
 0x222   : > { %821 = vrsqrt.f32 %v598_v3 }
 0x22b   : > { %v820_v4 = vpop.eup %819 }
 0x22c   : > { %v601_v6 = vmul.f32 %v820_v4, %v585_v51 }
 0x22e   : > { %v613_v7 = vmul.f32 %v606_v5, %v601_v6 }
 0x22f   : > { %v822_v8 = vpop.eup %821 }
 0x230   : > { %v602_v10 = vmul.f32 %v822_v8, %v586_v55  ;;  %v625_v11 = vadd.f32 %v618_v61, %v613_v7 }
 0x232   : > { %v614_v12 = vmul.f32 %v611_v60, %v602_v10  ;;  %v629_v13 = vadd.f32 %v627_v9, %v625_v11 }
 0x234   : > { %v626_v16 = vadd.f32 %v623_v15, %v614_v12  ;;  %vm631_vm2 = vcmp.gt.f32.partialorder %v629_v13, 0.0  ;;  %v633_v17 = vmul.f32 0.01, %v629_v13 }
 0x236   : > { %v630_v18 = vadd.f32 %v628_v14, %v626_v16  ;;  %v635_v19 = vsel %vm631_vm2, %v629_v13, %v633_v17 }
 0x237   : > { %637 = vst.msk [vmem:[%s244_s19] sm:$0xff] %vm575_vm1, %v635_v19 }
 0x238   : > { %vm632_vm3 = vcmp.gt.f32.partialorder %v630_v18, 0.0  ;;  %v634_v20 = vmul.f32 0.01, %v630_v18 }
 0x23a   : > { %v636_v21 = vsel %vm632_vm3, %v630_v18, %v634_v20 }
 0x23b   : > { %638 = vst.msk [vmem:[%s244_s19 + $0x8] sm:$0xff] %vm575_vm1, %v636_v21 }
 0x23c PF: > { %s15_s18 = sadd.s32 1, %s829_s18  }
 0x23d   : > { %p12_p4 = scmp.ge.s32.totalorder %s15_s18, 5  }
 0x23f   :  { %14 = sbr.rel (!%p12_p4) target bundleno = 1 (0x1), region = 73 }

// kernel: gate_dyn_unet_forward.22
= control target key start
LH: loop header
LB: loop body
LE: loop exit
PB: predicated region body
PF: predicated region fallthrough
CT: control target
= control target key end

     0   :  { %s916_s15 = smov 0   ;;  %s1047_s0 = inlined_call_operand.vmem [shape: bf16[3,432,8], index: 0, kind: input, shape index: {}]   ;;  %s1048_s1 = inlined_call_operand.vmem [shape: bf16[32,432], index: 1, kind: input, shape index: {}]   ;;  %s1049_s2 = inlined_call_operand.vmem [shape: f32[32,1], index: 2, kind: input, shape index: {}]   ;;  %s1050_s3 = inlined_call_operand.vmem [shape: f32[32,1], index: 3, kind: input, shape index: {}]   ;;  %s1051_s4 = inlined_call_operand.vmem [shape: f32[3,32,8], index: 4, kind: output, shape index: {}]  }
   0x1 LB: > { %s747_s16 = sadd.s32 4294967295, %s888_s15   ;;  %p751_p0 = scmp.ge.s32.totalorder %s888_s15, 1  ;;  %s888_s15 = sphi %s916_s15, %s14_s15  }
   0x2   : > { %p162_p1 = scmp.lt.s32.totalorder %s888_s15, 4 }
   0x4   : > { %p163_p2 = pnand %p751_p0, %p162_p1 }
   0x5   : > { %p188_p3 = scmp.lt.s32.totalorder (!%p163_p2), %s747_s16, 2 }
   0x6   : > { %166 = sbr.rel (%p163_p2) target bundleno = 643 (0x283), region = 36 }
   0xb   : > { %v890_v0 = vmov 0   ;;  %v861_v1 = vld [vmem:[%s1048_s1 + $0x4] ss:$16 sps:$4 sm:$0xff]   ;;  %vm461_vm0 = vcmask 392192   ;;  %s1053_s16 = smov (!%p188_p3, %s747_s16), 2  ;;  %vm574_vm1 = vcmask 64512  }
   0xc   : > { %517 = vmatprep.subr.bf16.mxu1 %v890_v0  ;;  %834 = vset.pattern.permute.xlu1 %v890_v0  ;;  %v867_v2 = vld [vmem:[%s1048_s1 + $0xc] ss:$16 sps:$4 sm:$0xff]   ;;  %s823_s21 = smul.u32 216, %s1053_s16  ;;  %v859_v28 = vld [vmem:[%s1048_s1] ss:$16 sps:$4 sm:$0xff]   ;;  %s794_s29 = sshll.u32 %s1053_s16, 5 }
   0xd   : > { %833 = vset.pattern.permute.xlu0 %v890_v0  ;;  %500 = vmatprep.mubr.bf16.mxu0 %v861_v1  ;;  %v868_v29 = vld [vmem:[%s1048_s1 + $0x24] ss:$16 sps:$4 sm:$0xff]   ;;  %v870_v32 = vld [vmem:[%s1048_s1 + $0x20] ss:$16 sps:$4 sm:$0xff]   ;;  %v865_v33 = vld [vmem:[%s1048_s1 + $0x8] ss:$16 sps:$4 sm:$0xff]   ;;  %s1034_s6 = scalar_lea.vmem %s1051_s4, %s794_s29 }
   0xe   : > { %790 = vmatprep.mubr.msk.bf16.mxu1 %vm461_vm0, %v867_v2  ;;  %s940_s24 = scalar_lea.vmem %s1047_s0, %s823_s21  ;;  %v871_v34 = vld [vmem:[%s1048_s1 + $0x2c] ss:$16 sps:$4 sm:$0xff]   ;;  %v873_v35 = vld [vmem:[%s1048_s1 + $0x28] ss:$16 sps:$4 sm:$0xff]  }
   0xf   : > { %v835_v3 = vld [vmem:[%s940_s24 + $0xb8] sm:$0xff]   ;;  %v838_v6 = vld [vmem:[%s940_s24 + $0xb0] sm:$0xff]   ;;  %v841_v9 = vld [vmem:[%s940_s24 + $0xa8] sm:$0xff]  }
  0x10   : > { %v836_v4 = vld [vmem:[%s940_s24 + $0x78] sm:$0xff]   ;;  %518 = vmatpush1.bf16.msra.mxu1 %v835_v3  ;;  %v839_v7 = vld [vmem:[%s940_s24 + $0x70] sm:$0xff]   ;;  %v842_v10 = vld [vmem:[%s940_s24 + $0x68] sm:$0xff]  }
  0x11   : > { %v837_v5 = vld [vmem:[%s940_s24 + $0x38] sm:$0xff]   ;;  %795 = vmatprep.subr.bf16.mxu0 %v836_v4  ;;  %519 = vmatprep.subr.bf16.mxu1 %v890_v0  ;;  %v840_v8 = vld [vmem:[%s940_s24 + $0x30] sm:$0xff]   ;;  %v843_v11 = vld [vmem:[%s940_s24 + $0x28] sm:$0xff]  }
  0x12   : > { %796 = vmatpush3.bf16.msra.mxu0 %v837_v5  ;;  %v844_v12 = vld [vmem:[%s940_s24 + $0xa0] sm:$0xff]   ;;  %v848_v15 = vld [vmem:[%s940_s24 + $0x58] sm:$0xff]   ;;  %v851_v18 = vld [vmem:[%s940_s24 + $0x50] sm:$0xff]  }
  0x13   : > { %797 = vmatprep.subr.bf16.mxu0 %v839_v7  ;;  %v845_v13 = vld [vmem:[%s940_s24 + $0x60] sm:$0xff]   ;;  %v847_v16 = vld [vmem:[%s940_s24 + $0x98] sm:$0xff]   ;;  %v850_v19 = vld [vmem:[%s940_s24 + $0x90] sm:$0xff]  }
  0x14   : > { %520 = vmatpush1.bf16.msra.mxu1 %v838_v6  ;;  %v846_v14 = vld [vmem:[%s940_s24 + $0x20] sm:$0xff]   ;;  %v849_v17 = vld [vmem:[%s940_s24 + $0x18] sm:$0xff]   ;;  %v852_v20 = vld [vmem:[%s940_s24 + $0x10] sm:$0xff]  }
  0x15   : > { %521 = vmatprep.subr.bf16.mxu1 %v890_v0  ;;  %v854_v21 = vld [vmem:[%s940_s24 + $0x48] sm:$0xff]   ;;  %v857_v24 = vld [vmem:[%s940_s24 + $0x40] sm:$0xff]   ;;  %v862_v27 = vld [vmem:[%s940_s24 + $0xd0] sm:$0xff]  }
  0x16   : > { %798 = vmatpush3.bf16.msra.mxu0 %v840_v8  ;;  %v853_v22 = vld [vmem:[%s940_s24 + $0x88] sm:$0xff]   ;;  %v856_v25 = vld [vmem:[%s940_s24 + $0x80] sm:$0xff]  }
  0x17   : > { %799 = vmatprep.subr.bf16.mxu0 %v842_v10  ;;  %v855_v23 = vld [vmem:[%s940_s24 + $0x8] sm:$0xff]   ;;  %v858_v26 = vld [vmem:[%s940_s24] sm:$0xff]  }
  0x18   : > { %522 = vmatpush1.bf16.msra.mxu1 %v841_v9  ;;  %v863_v30 = vld [vmem:[%s940_s24 + $0xc8] sm:$0xff]   ;;  %v864_v31 = vld [vmem:[%s940_s24 + $0xc0] sm:$0xff]  }
  0x19   : > { %523 = vmatprep.subr.bf16.mxu1 %v890_v0 }
  0x1a   : > { %800 = vmatpush3.bf16.msra.mxu0 %v843_v11 }
  0x1b   : > { %801 = vmatprep.subr.bf16.mxu0 %v845_v13 }
  0x1c   : > { %524 = vmatpush1.bf16.msra.mxu1 %v844_v12 }
  0x1d   : > { %525 = vmatprep.subr.bf16.mxu1 %v890_v0 }
  0x1e   : > { %802 = vmatpush3.bf16.msra.mxu0 %v846_v14 }
  0x1f   : > { %803 = vmatprep.subr.bf16.mxu0 %v848_v15  ;;  %v567_v15 = vld [vmem:[%s1049_s2 + $0x8] sm:$0xff] }
  0x20   : > { %526 = vmatpush1.bf16.msra.mxu1 %v847_v16  ;;  %v568_v16 = vld [vmem:[%s1049_s2 + $0x10] sm:$0xff] }
  0x21   : > { %527 = vmatprep.subr.bf16.mxu1 %v890_v0 }
  0x22   : > { %804 = vmatpush3.bf16.msra.mxu0 %v849_v17  ;;  %v569_v17 = vld [vmem:[%s1049_s2 + $0x18] sm:$0xff] }
  0x23   : > { %805 = vmatprep.subr.bf16.mxu0 %v851_v18  ;;  %v566_v18 = vld [vmem:[%s1049_s2] sm:$0xff] }
  0x24   : > { %528 = vmatpush1.bf16.msra.mxu1 %v850_v19  ;;  %v570_v19 = vld [vmem:[%s1050_s3] sm:$0xff] }
  0x25   : > { %529 = vmatprep.subr.bf16.mxu1 %v890_v0 }
  0x26   : > { %806 = vmatpush3.bf16.msra.mxu0 %v852_v20  ;;  %v571_v20 = vld [vmem:[%s1050_s3 + $0x8] sm:$0xff] }
  0x27   : > { %807 = vmatprep.subr.bf16.mxu0 %v854_v21  ;;  %v572_v21 = vld [vmem:[%s1050_s3 + $0x10] sm:$0xff] }
  0x28   : > { %530 = vmatpush1.bf16.msra.mxu1 %v853_v22 }
  0x29   : > { %531 = vmatprep.subr.bf16.mxu1 %v890_v0 }
  0x2a   : > { %808 = vmatpush3.bf16.msra.mxu0 %v855_v23 }
  0x2b   : > { %809 = vmatprep.subr.bf16.mxu0 %v857_v24 }
  0x2c   : > { %532 = vmatpush1.bf16.msra.mxu1 %v856_v25 }
  0x2d   : > { %543 = vmatprep.subr.bf16.mxu1 %v890_v0 }
  0x2e   : > { %810 = vmatpush3.bf16.msra.mxu0 %v858_v26 }
  0x30   : > { %544 = vmatpush2.bf16.msra.mxu1 %v862_v27  ;;  %v573_v27 = vld [vmem:[%s1050_s3 + $0x18] sm:$0xff] }
  0x31   : > { %501 = vmatmul.mubr.bf16.vlgmr.msra.gmra.mxu0 %v859_v28  ;;  %545 = vmatprep.subr.bf16.mxu1 %v890_v0 }
  0x32   : > { %508 = vmatprep.mubr.bf16.mxu0 %v868_v29 }
  0x34   : > { %546 = vmatpush2.bf16.msra.mxu1 %v863_v30 }
  0x35   : > { %547 = vmatprep.subr.bf16.mxu1 %v890_v0 }
  0x38   : > { %548 = vmatpush2.bf16.msra.mxu1 %v864_v31 }
  0x39   : > { %509 = vmatmul.mubr.bf16.gmra.mxu0 %v870_v32 }
  0x3b   : > { %550 = vmatmul.mubr.bf16.vlgmr.msra.gmra.mxu1 %v865_v33 }
  0x3c   : > { %791 = vmatprep.mubr.msk.bf16.mxu1 %vm461_vm0, %v871_v34 }
  0x43   : > { %558 = vmatmul.mubr.bf16.gmra.mxu1 %v873_v35 }
  0xf1   : > { %v811_v36 = vpop.f32.mrf.mxu0 }
  0xf3   : > { %v812_v37 = vpop.f32.mrf.mxu0 }
  0xf4   : > { %v813_v41 = vadd.f32 %v812_v37, %v811_v36 }
  0xf5   : > { %v814_v38 = vpop.f32.mrf.mxu0 }
  0xf7   : > { %v815_v39 = vpop.f32.mrf.mxu0 }
  0xf8   : > { %v816_v47 = vadd.f32 %v815_v39, %v814_v38 }
  0xf9   : > { %v817_v40 = vpop.f32.mrf.mxu0 }
  0xfb   : > { %v551_v42 = vpop.f32.mrf.mxu1  ;;  %v818_v43 = vpop.f32.mrf.mxu0 }
  0xfc   : > { %v552_v44 = vadd.f32 %v813_v41, %v551_v42  ;;  %v819_v51 = vadd.f32 %v818_v43, %v817_v40 }
  0xfd   : > { %v553_v45 = vpop.f32.mrf.mxu1  ;;  %v820_v46 = vpop.f32.mrf.mxu0 }
  0xfe   : > { %v575_v48 = vsel %vm574_vm1, %v552_v44, 0.0 }
  0xff   : > { %v554_v49 = vpop.f32.mrf.mxu1  ;;  %576 = vadd.xlane.f32.xlu0 %v575_v48  ;;  %v821_v53 = vpop.f32.mrf.mxu0 }
 0x100   : > { %v555_v50 = vadd.f32 %v816_v47, %v554_v49  ;;  %v822_v57 = vadd.f32 %v821_v53, %v820_v46 }
 0x101   : > { %v556_v52 = vpop.f32.mrf.mxu1 }
 0x102   : > { %v578_v54 = vsel %vm574_vm1, %v555_v50, 0.0 }
 0x103   : > { %v559_v55 = vpop.f32.mrf.mxu1  ;;  %579 = vadd.xlane.f32.xlu0 %v578_v54 }
 0x104   : > { %v560_v56 = vadd.f32 %v819_v51, %v559_v55 }
 0x105   : > { %v561_v58 = vpop.f32.mrf.mxu1 }
 0x106   : > { %v581_v59 = vsel %vm574_vm1, %v560_v56, 0.0 }
 0x107   : > { %v562_v60 = vpop.f32.mrf.mxu1  ;;  %582 = vadd.xlane.f32.xlu1 %v581_v59 }
 0x108   : > { %v563_v61 = vadd.f32 %v822_v57, %v562_v60 }
 0x109   : > { %v564_v62 = vpop.f32.mrf.mxu1 }
 0x10a   : > { %v584_v63 = vsel %vm574_vm1, %v563_v61, 0.0 }
 0x10b   : > { %585 = vadd.xlane.f32.xlu1 %v584_v63 }
 0x188   : > { %v577_v0 = vpop.xlane.xlu0 %576 }
 0x189   : > { %v588_v1 = vmul.f32 0.125, %v577_v0 }
 0x18b   : > { %v592_v2 = vsub.f32 %v552_v44, %v588_v1 }
 0x18c   : > { %v580_v3 = vpop.xlane.xlu0 %579 }
 0x18d   : > { %v589_v4 = vmul.f32 0.125, %v580_v3  ;;  %v596_v5 = vmul.f32 %v592_v2, %v592_v2 }
 0x18f   : > { %v593_v6 = vsub.f32 %v555_v50, %v589_v4  ;;  %v600_v7 = vsel %vm574_vm1, %v596_v5, 0.0 }
 0x190   : > { %v583_v8 = vpop.xlane.xlu1 %582  ;;  %601 = vadd.xlane.f32.xlu0 %v600_v7 }
 0x191   : > { %v590_v9 = vmul.f32 0.125, %v583_v8  ;;  %v597_v10 = vmul.f32 %v593_v6, %v593_v6 }
 0x193   : > { %v594_v11 = vsub.f32 %v560_v56, %v590_v9  ;;  %v603_v12 = vsel %vm574_vm1, %v597_v10, 0.0 }
 0x194   : > { %604 = vadd.xlane.f32.xlu1 %v603_v12  ;;  %v586_v22 = vpop.xlane.xlu1 %585 }
 0x195   : > { %v598_v13 = vmul.f32 %v594_v11, %v594_v11  ;;  %v591_v23 = vmul.f32 0.125, %v586_v22 }
 0x197   : > { %v606_v14 = vsel %vm574_vm1, %v598_v13, 0.0  ;;  %v595_v24 = vsub.f32 %v563_v61, %v591_v23 }
 0x198   : > { %607 = vadd.xlane.f32.xlu0 %v606_v14 }
 0x199   : > { %v599_v25 = vmul.f32 %v595_v24, %v595_v24 }
 0x19b   : > { %v609_v26 = vsel %vm574_vm1, %v599_v25, 0.0 }
 0x1a5   : > { %635 = vperm.xlu1 %834, %v567_v15  }
 0x1a9   : > { %640 = vperm.xlu1 %834, %v568_v16  }
 0x1ad   : > { %645 = vperm.xlu1 %834, %v569_v17  }
 0x1ae   : > { %630 = vperm.xlu0 %833, %v566_v18  }
 0x1b1   : > { %654 = vperm.xlu1 %834, %v570_v19  }
 0x1b5   : > { %659 = vperm.xlu1 %834, %v571_v20  }
 0x1b9   : > { %664 = vperm.xlu1 %834, %v572_v21  }
 0x1dd   : > { %610 = vadd.xlane.f32.xlu1 %v609_v26 }
 0x1ee   : > { %669 = vperm.xlu1 %834, %v573_v27  }
 0x219   : > { %v602_v28 = vpop.xlane.xlu0 %601 }
 0x21a   : > { %v612_v29 = vmul.f32 0.125, %v602_v28 }
 0x21c   : > { %v616_v30 = vadd.f32 1e-05, %v612_v29 }
 0x21d   : > { %v605_v31 = vpop.xlane.xlu1 %604 }
 0x21e   : > { %874 = vrsqrt.f32 %v616_v30  ;;  %v613_v32 = vmul.f32 0.125, %v605_v31 }
 0x220   : > { %v617_v33 = vadd.f32 1e-05, %v613_v32 }
 0x221   : > { %v636_v34 = vpop.permute.xlu1 %635  ;;  %v608_v35 = vpop.xlane.xlu0 %607 }
 0x222   : > { %876 = vrsqrt.f32 %v617_v33  ;;  %v614_v36 = vmul.f32 0.125, %v608_v35 }
 0x224   : > { %v618_v37 = vadd.f32 1e-05, %v614_v36 }
 0x225   : > { %v641_v38 = vpop.permute.xlu1 %640 }
 0x226   : > { %878 = vrsqrt.f32 %v618_v37 }
 0x229   : > { %v646_v39 = vpop.permute.xlu1 %645  ;;  %v631_v41 = vpop.permute.xlu0 %630 }
 0x22b   : > { %v875_v40 = vpop.eup %874 }
 0x22c   : > { %v624_v42 = vmul.f32 %v875_v40, %v592_v2 }
 0x22d   : > { %v655_v43 = vpop.permute.xlu1 %654 }
 0x22e   : > { %v648_v44 = vmul.f32 %v631_v41, %v624_v42 }
 0x22f   : > { %v877_v45 = vpop.eup %876 }
 0x230   : > { %v625_v46 = vmul.f32 %v877_v45, %v593_v6  ;;  %v672_v47 = vadd.f32 %v655_v43, %v648_v44 }
 0x231   : > { %v660_v48 = vpop.permute.xlu1 %659 }
 0x232   : > { %v649_v49 = vmul.f32 %v636_v34, %v625_v46  ;;  %vm676_vm2 = vcmp.gt.f32.partialorder %v672_v47, 0.0  ;;  %v680_v50 = vmul.f32 0.01, %v672_v47 }
 0x233   : > { %v879_v51 = vpop.eup %878 }
 0x234   : > { %v626_v52 = vmul.f32 %v879_v51, %v594_v11  ;;  %v684_v53 = vsel %vm676_vm2, %v672_v47, %v680_v50  ;;  %v673_v54 = vadd.f32 %v660_v48, %v649_v49 }
 0x235   : > { %688 = vst.msk [vmem:[%s1034_s6] sm:$0xff] %vm574_vm1, %v684_v53  ;;  %v665_v57 = vpop.permute.xlu1 %664 }
 0x236   : > { %v650_v55 = vmul.f32 %v641_v38, %v626_v52  ;;  %vm677_vm3 = vcmp.gt.f32.partialorder %v673_v54, 0.0  ;;  %v681_v56 = vmul.f32 0.01, %v673_v54 }
 0x238   : > { %v685_v58 = vsel %vm677_vm3, %v673_v54, %v681_v56  ;;  %v674_v59 = vadd.f32 %v665_v57, %v650_v55 }
 0x239   : > { %689 = vst.msk [vmem:[%s1034_s6 + $0x8] sm:$0xff] %vm574_vm1, %v685_v58 }
 0x23a   : > { %vm678_vm4 = vcmp.gt.f32.partialorder %v674_v59, 0.0  ;;  %v682_v60 = vmul.f32 0.01, %v674_v59 }
 0x23c   : > { %v686_v61 = vsel %vm678_vm4, %v674_v59, %v682_v60 }
 0x23d   : > { %690 = vst.msk [vmem:[%s1034_s6 + $0x10] sm:$0xff] %vm574_vm1, %v686_v61 }
 0x266   : > { %v611_v62 = vpop.xlane.xlu1 %610 }
 0x267   : > { %v615_v63 = vmul.f32 0.125, %v611_v62 }
 0x269   : > { %v619_v0 = vadd.f32 1e-05, %v615_v63 }
 0x26a   : > { %v670_v4 = vpop.permute.xlu1 %669 }
 0x26b   : > { %880 = vrsqrt.f32 %v619_v0 }
 0x278   : > { %v881_v1 = vpop.eup %880 }
 0x279   : > { %v627_v2 = vmul.f32 %v881_v1, %v595_v24 }
 0x27b   : > { %v651_v3 = vmul.f32 %v646_v39, %v627_v2 }
 0x27d   : > { %v675_v5 = vadd.f32 %v670_v4, %v651_v3 }
 0x27f   : > { %vm679_vm5 = vcmp.gt.f32.partialorder %v675_v5, 0.0  ;;  %v683_v6 = vmul.f32 0.01, %v675_v5 }
 0x281   : > { %v687_v7 = vsel %vm679_vm5, %v675_v5, %v683_v6 }
 0x282   : > { %691 = vst.msk [vmem:[%s1034_s6 + $0x18] sm:$0xff] %vm574_vm1, %v687_v7 }
 0x283 PF: > { %s14_s15 = sadd.s32 1, %s888_s15  }
 0x284   : > { %p11_p4 = scmp.ge.s32.totalorder %s14_s15, 5  }
 0x286   :  { %13 = sbr.rel (!%p11_p4) target bundleno = 1 (0x1), region = 66 }

// kernel: gate_dyn_unet_forward.23
= control target key start
LH: loop header
LB: loop body
LE: loop exit
PB: predicated region body
PF: predicated region fallthrough
CT: control target
= control target key end

     0   :  { %s529_s15 = smov 0   ;;  %s592_s0 = inlined_call_operand.vmem [shape: bf16[3,16,8], index: 0, kind: input, shape index: {}]   ;;  %s593_s1 = inlined_call_operand.vmem [shape: bf16[32,16], index: 1, kind: input, shape index: {}]   ;;  %s594_s2 = inlined_call_operand.vmem [shape: f32[32,1], index: 2, kind: input, shape index: {}]   ;;  %s595_s3 = inlined_call_operand.vmem [shape: f32[32,1], index: 3, kind: input, shape index: {}]   ;;  %s596_s4 = inlined_call_operand.vmem [shape: f32[3,32,8], index: 4, kind: output, shape index: {}]  }
   0x1 LB: > { %s446_s16 = sadd.s32 4294967295, %s501_s15   ;;  %p450_p0 = scmp.ge.s32.totalorder %s501_s15, 1  ;;  %s501_s15 = sphi %s529_s15, %s14_s15  }
   0x2   : > { %p162_p1 = scmp.lt.s32.totalorder %s501_s15, 4 }
   0x4   : > { %p163_p2 = pnand %p450_p0, %p162_p1 }
   0x5   : > { %p188_p3 = scmp.lt.s32.totalorder (!%p163_p2), %s446_s16, 2 }
   0x6   : > { %166 = sbr.rel (%p163_p2) target bundleno = 529 (0x211), region = 36 }
   0xb   : > { %v485_v0 = vld [vmem:[%s593_s1] sm:$0xff]   ;;  %vm221_vm0 = vcmask 130048   ;;  %s598_s16 = smov (!%p188_p3, %s446_s16), 2  ;;  %v486_v2 = vld [vmem:[%s593_s1 + $0x8] sm:$0xff]   ;;  %v503_v3 = vmov 0   ;;  %vm285_vm1 = vcmask 64512  }
   0xc   : > { %469 = vmatprep.mubr.msk.bf16.mxu0 %vm221_vm0, %v485_v0  ;;  %s462_s19 = sshll.u32 %s598_s16, 3  ;;  %483 = vset.pattern.permute.xlu1 %v503_v3  ;;  %v278_v12 = vld [vmem:[%s594_s2 + $0x8] sm:$0xff]  ;;  %v279_v13 = vld [vmem:[%s594_s2 + $0x10] sm:$0xff]  ;;  %v280_v14 = vld [vmem:[%s594_s2 + $0x18] sm:$0xff]  ;;  %s463_s17 = sshll.u32 %s598_s16, 5 }
   0xd   : > { %s192_s22 = scalar_lea.vmem %s592_s0, %s462_s19  ;;  %482 = vset.pattern.permute.xlu0 %v503_v3  ;;  %v281_v15 = vld [vmem:[%s595_s3] sm:$0xff]  ;;  %v282_v16 = vld [vmem:[%s595_s3 + $0x8] sm:$0xff]  ;;  %v283_v17 = vld [vmem:[%s595_s3 + $0x10] sm:$0xff]  ;;  %s197_s20 = scalar_lea.vmem %s596_s4, %s463_s17 }
   0xe   : > { %v484_v1 = vld [vmem:[%s192_s22] sm:$0xff]   ;;  %v284_v38 = vld [vmem:[%s595_s3 + $0x18] sm:$0xff] }
   0xf   : > { %467 = vmatprep.subr.bf16.mxu0 %v484_v1  ;;  %v277_v39 = vld [vmem:[%s594_s2] sm:$0xff] }
  0x10   : > { %468 = vmatpush3.bf16.msra.mxu0 %v484_v1 }
  0x13   : > { %470 = vmatmul.mubr.msk.bf16.vlgmr.msra.gmra.mxu0 %vm221_vm0, %v486_v2 }
  0xd3   : > { %v471_v4 = vpop.f32.mrf.mxu0 }
  0xd4   : > { %v292_v5 = vsel %vm285_vm1, %v471_v4, 0.0 }
  0xd5   : > { %293 = vadd.xlane.f32.xlu1 %v292_v5  ;;  %v262_v6 = vpop.f32.mrf.mxu0 }
  0xd6   : > { %v286_v7 = vsel %vm285_vm1, %v262_v6, 0.0 }
  0xd7   : > { %287 = vadd.xlane.f32.xlu0 %v286_v7  ;;  %v472_v8 = vpop.f32.mrf.mxu0 }
  0xd8   : > { %v295_v9 = vsel %vm285_vm1, %v472_v8, 0.0 }
  0xd9   : > { %296 = vadd.xlane.f32.xlu1 %v295_v9  ;;  %v265_v10 = vpop.f32.mrf.mxu0 }
  0xda   : > { %v289_v11 = vsel %vm285_vm1, %v265_v10, 0.0 }
  0xdb   : > { %290 = vadd.xlane.f32.xlu0 %v289_v11 }
  0xea   : > { %346 = vperm.xlu1 %483, %v278_v12  }
  0xee   : > { %351 = vperm.xlu1 %483, %v279_v13  }
  0xf2   : > { %356 = vperm.xlu1 %483, %v280_v14  }
  0xf6   : > { %365 = vperm.xlu1 %483, %v281_v15  }
  0xfa   : > { %370 = vperm.xlu1 %483, %v282_v16  }
  0xfe   : > { %375 = vperm.xlu1 %483, %v283_v17  }
 0x15e   : > { %v294_v18 = vpop.xlane.xlu1 %293 }
 0x15f   : > { %v301_v19 = vmul.f32 0.125, %v294_v18 }
 0x160   : > { %v288_v20 = vpop.xlane.xlu0 %287 }
 0x161   : > { %v305_v21 = vsub.f32 %v471_v4, %v301_v19  ;;  %v299_v22 = vmul.f32 0.125, %v288_v20 }
 0x162   : > { %v297_v23 = vpop.xlane.xlu1 %296 }
 0x163   : > { %v303_v24 = vsub.f32 %v262_v6, %v299_v22  ;;  %v302_v25 = vmul.f32 0.125, %v297_v23  ;;  %v309_v26 = vmul.f32 %v305_v21, %v305_v21 }
 0x164   : > { %v291_v27 = vpop.xlane.xlu0 %290 }
 0x165   : > { %v306_v28 = vsub.f32 %v472_v8, %v302_v25  ;;  %v300_v29 = vmul.f32 0.125, %v291_v27  ;;  %v317_v30 = vsel %vm285_vm1, %v309_v26, 0.0  ;;  %v307_v31 = vmul.f32 %v303_v24, %v303_v24 }
 0x166   : > { %318 = vadd.xlane.f32.xlu0 %v317_v30  ;;  %v347_v40 = vpop.permute.xlu1 %346 }
 0x167   : > { %v304_v32 = vsub.f32 %v265_v10, %v300_v29  ;;  %v310_v33 = vmul.f32 %v306_v28, %v306_v28  ;;  %v311_v35 = vsel %vm285_vm1, %v307_v31, 0.0 }
 0x169   : > { %v320_v34 = vsel %vm285_vm1, %v310_v33, 0.0  ;;  %v308_v36 = vmul.f32 %v304_v32, %v304_v32 }
 0x16a   : > { %321 = vadd.xlane.f32.xlu1 %v320_v34  ;;  %312 = vadd.xlane.f32.xlu0 %v311_v35  ;;  %v352_v41 = vpop.permute.xlu1 %351 }
 0x16b   : > { %v314_v37 = vsel %vm285_vm1, %v308_v36, 0.0 }
 0x16e   : > { %315 = vadd.xlane.f32.xlu1 %v314_v37  ;;  %v357_v42 = vpop.permute.xlu1 %356 }
 0x172   : > { %v366_v43 = vpop.permute.xlu1 %365 }
 0x176   : > { %v371_v44 = vpop.permute.xlu1 %370 }
 0x17a   : > { %v376_v45 = vpop.permute.xlu1 %375 }
 0x17f   : > { %380 = vperm.xlu1 %483, %v284_v38  }
 0x180   : > { %341 = vperm.xlu0 %482, %v277_v39  }
 0x1ef   : > { %v319_v46 = vpop.xlane.xlu0 %318 }
 0x1f0   : > { %v325_v47 = vmul.f32 0.125, %v319_v46 }
 0x1f2   : > { %v329_v48 = vadd.f32 1e-05, %v325_v47 }
 0x1f3   : > { %v322_v49 = vpop.xlane.xlu1 %321  ;;  %v313_v50 = vpop.xlane.xlu0 %312 }
 0x1f4   : > { %487 = vrsqrt.f32 %v329_v48  ;;  %v326_v51 = vmul.f32 0.125, %v322_v49  ;;  %v323_v52 = vmul.f32 0.125, %v313_v50 }
 0x1f6   : > { %v330_v53 = vadd.f32 1e-05, %v326_v51  ;;  %v327_v54 = vadd.f32 1e-05, %v323_v52 }
 0x1f7   : > { %v316_v55 = vpop.xlane.xlu1 %315 }
 0x1f8   : > { %489 = vrsqrt.f32 %v330_v53  ;;  %v324_v56 = vmul.f32 0.125, %v316_v55 }
 0x1f9   : > { %491 = vrsqrt.f32 %v327_v54 }
 0x1fa   : > { %v328_v57 = vadd.f32 1e-05, %v324_v56 }
 0x1fb   : > { %v342_v1 = vpop.permute.xlu0 %341  ;;  %v381_v5 = vpop.permute.xlu1 %380 }
 0x1fc   : > { %493 = vrsqrt.f32 %v328_v57 }
 0x201   : > { %v488_v58 = vpop.eup %487 }
 0x202   : > { %v337_v59 = vmul.f32 %v488_v58, %v305_v21 }
 0x204   : > { %v361_v60 = vmul.f32 %v352_v41, %v337_v59 }
 0x205   : > { %v490_v61 = vpop.eup %489 }
 0x206   : > { %v492_v62 = vpop.eup %491  ;;  %v385_v63 = vadd.f32 %v376_v45, %v361_v60  ;;  %v338_v0 = vmul.f32 %v490_v61, %v306_v28 }
 0x207   : > { %v335_v2 = vmul.f32 %v492_v62, %v303_v24 }
 0x208   : > { %389 = vst.msk [vmem:[%s197_s20 + $0x10] sm:$0xff] %vm285_vm1, %v385_v63  ;;  %v362_v3 = vmul.f32 %v357_v42, %v338_v0 }
 0x209   : > { %v494_v4 = vpop.eup %493  ;;  %v359_v6 = vmul.f32 %v342_v1, %v335_v2 }
 0x20a   : > { %v336_v7 = vmul.f32 %v494_v4, %v304_v32  ;;  %v386_v8 = vadd.f32 %v381_v5, %v362_v3 }
 0x20b   : > { %v383_v9 = vadd.f32 %v366_v43, %v359_v6 }
 0x20c   : > { %v360_v10 = vmul.f32 %v347_v40, %v336_v7  ;;  %390 = vst.msk [vmem:[%s197_s20 + $0x18] sm:$0xff] %vm285_vm1, %v386_v8 }
 0x20d   : > { %387 = vst.msk [vmem:[%s197_s20] sm:$0xff] %vm285_vm1, %v383_v9 }
 0x20e   : > { %v384_v11 = vadd.f32 %v371_v44, %v360_v10 }
 0x210   : > { %388 = vst.msk [vmem:[%s197_s20 + $0x8] sm:$0xff] %vm285_vm1, %v384_v11 }
 0x211 PF: > { %s14_s15 = sadd.s32 1, %s501_s15  }
 0x212   : > { %p11_p4 = scmp.ge.s32.totalorder %s14_s15, 5  }
 0x214   :  { %13 = sbr.rel (!%p11_p4) target bundleno = 1 (0x1), region = 66 }

// kernel: gate_dyn_unet_forward.25
= control target key start
LH: loop header
LB: loop body
LE: loop exit
PB: predicated region body
PF: predicated region fallthrough
CT: control target
= control target key end

     0   :  { %s517_s9 = smov 0   ;;  %s604_s0 = inlined_call_operand.vmem [shape: bf16[3,32,8], index: 0, kind: input, shape index: {}]   ;;  %s605_s1 = inlined_call_operand.vmem [shape: bf16[128,32], index: 1, kind: input, shape index: {}]   ;;  %s606_s2 = inlined_call_operand.vmem [shape: f32[3,128,8], index: 2, kind: output, shape index: {}]  }
   0x1 LB: > { %s411_s10 = sadd.s32 4294967295, %s500_s9   ;;  %p415_p0 = scmp.ge.s32.totalorder %s500_s9, 1  ;;  %s500_s9 = sphi %s517_s9, %s12_s9  }
   0x2   : > { %p112_p1 = scmp.lt.s32.totalorder %s500_s9, 4 }
   0x4   : > { %p113_p2 = pnand %p415_p0, %p112_p1 }
   0x5   : > { %p134_p3 = scmp.lt.s32.totalorder (!%p113_p2), %s411_s10, 2 }
   0x6   : > { %116 = sbr.rel (%p113_p2) target bundleno = 231 (0xe7), region = 28 }
   0xb   : > { %v486_v0 = vld [vmem:[%s605_s1] sm:$0xff]   ;;  %vm217_vm0 = vcmask 261120   ;;  %s608_s10 = smov (!%p134_p3, %s411_s10), 2  ;;  %v488_v4 = vld [vmem:[%s605_s1 + $0x8] sm:$0xff]   ;;  %v490_v6 = vld [vmem:[%s605_s1 + $0x10] sm:$0xff]   ;;  %vm339_vm1 = vcmask 64512  }
   0xc   : > { %v487_v1 = vld [vmem:[%s605_s1 + $0x20] sm:$0xff]   ;;  %456 = vmatprep.mubr.msk.bf16.mxu0 %vm217_vm0, %v486_v0  ;;  %s440_s15 = sshll.u32 %s608_s10, 4  ;;  %v489_v5 = vld [vmem:[%s605_s1 + $0x28] sm:$0xff]   ;;  %v491_v7 = vld [vmem:[%s605_s1 + $0x30] sm:$0xff]   ;;  %s441_s3 = sshll.u32 %s608_s10, 7 }
   0xd   : > { %464 = vmatprep.mubr.msk.bf16.mxu1 %vm217_vm0, %v487_v1  ;;  %s138_s18 = scalar_lea.vmem %s604_s0, %s440_s15  ;;  %v492_v8 = vld [vmem:[%s605_s1 + $0x18] sm:$0xff]   ;;  %s567_s6 = scalar_lea.vmem %s606_s2, %s441_s3 }
   0xe   : > { %v484_v2 = vld [vmem:[%s138_s18 + $0x8] sm:$0xff]   ;;  %v485_v3 = vld [vmem:[%s138_s18] sm:$0xff]   ;;  %v493_v9 = vld [vmem:[%s605_s1 + $0x38] sm:$0xff]  }
   0xf   : > { %452 = vmatprep.subr.bf16.mxu0 %v484_v2  ;;  %472 = vmatprep.subr.bf16.mxu1 %v484_v2 }
  0x10   : > { %453 = vmatpush3.bf16.msra.mxu0 %v484_v2  ;;  %474 = vmatpush3.bf16.msra.mxu1 %v484_v2 }
  0x11   : > { %454 = vmatprep.subr.bf16.mxu0 %v485_v3  ;;  %473 = vmatprep.subr.bf16.mxu1 %v485_v3 }
  0x14   : > { %455 = vmatpush3.bf16.msra.mxu0 %v485_v3  ;;  %475 = vmatpush3.bf16.msra.mxu1 %v485_v3 }
  0x17   : > { %457 = vmatmul.mubr.msk.bf16.vlgmr.msra.gmra.mxu0 %vm217_vm0, %v488_v4  ;;  %465 = vmatmul.mubr.msk.bf16.vlgmr.msra.gmra.mxu1 %vm217_vm0, %v489_v5 }
  0x18   : > { %460 = vmatprep.mubr.msk.bf16.mxu0 %vm217_vm0, %v490_v6  ;;  %468 = vmatprep.mubr.msk.bf16.mxu1 %vm217_vm0, %v491_v7 }
  0x1f   : > { %461 = vmatmul.mubr.msk.bf16.gmra.mxu0 %vm217_vm0, %v492_v8  ;;  %469 = vmatmul.mubr.msk.bf16.gmra.mxu1 %vm217_vm0, %v493_v9 }
  0xd7   : > { %v458_v10 = vpop.f32.mrf.mxu0  ;;  %v466_v11 = vpop.f32.mrf.mxu1 }
  0xd8   : > { %342 = vst.msk [vmem:[%s567_s6 + $0x10] sm:$0xff] %vm339_vm1, %v458_v10  ;;  %350 = vst.msk [vmem:[%s567_s6 + $0x50] sm:$0xff] %vm339_vm1, %v466_v11 }
  0xd9   : > { %v276_v12 = vpop.f32.mrf.mxu0  ;;  %v308_v13 = vpop.f32.mrf.mxu1 }
  0xda   : > { %340 = vst.msk [vmem:[%s567_s6] sm:$0xff] %vm339_vm1, %v276_v12  ;;  %348 = vst.msk [vmem:[%s567_s6 + $0x40] sm:$0xff] %vm339_vm1, %v308_v13 }
  0xdb   : > { %v459_v14 = vpop.f32.mrf.mxu0  ;;  %v467_v15 = vpop.f32.mrf.mxu1 }
  0xdc   : > { %343 = vst.msk [vmem:[%s567_s6 + $0x18] sm:$0xff] %vm339_vm1, %v459_v14  ;;  %351 = vst.msk [vmem:[%s567_s6 + $0x58] sm:$0xff] %vm339_vm1, %v467_v15 }
  0xdd   : > { %v279_v16 = vpop.f32.mrf.mxu0  ;;  %v311_v17 = vpop.f32.mrf.mxu1 }
  0xde   : > { %341 = vst.msk [vmem:[%s567_s6 + $0x8] sm:$0xff] %vm339_vm1, %v279_v16  ;;  %349 = vst.msk [vmem:[%s567_s6 + $0x48] sm:$0xff] %vm339_vm1, %v311_v17 }
  0xdf   : > { %v462_v18 = vpop.f32.mrf.mxu0  ;;  %v470_v19 = vpop.f32.mrf.mxu1 }
  0xe0   : > { %346 = vst.msk [vmem:[%s567_s6 + $0x30] sm:$0xff] %vm339_vm1, %v462_v18  ;;  %354 = vst.msk [vmem:[%s567_s6 + $0x70] sm:$0xff] %vm339_vm1, %v470_v19 }
  0xe1   : > { %v292_v20 = vpop.f32.mrf.mxu0  ;;  %v324_v21 = vpop.f32.mrf.mxu1 }
  0xe2   : > { %344 = vst.msk [vmem:[%s567_s6 + $0x20] sm:$0xff] %vm339_vm1, %v292_v20  ;;  %352 = vst.msk [vmem:[%s567_s6 + $0x60] sm:$0xff] %vm339_vm1, %v324_v21 }
  0xe3   : > { %v463_v22 = vpop.f32.mrf.mxu0  ;;  %v471_v23 = vpop.f32.mrf.mxu1 }
  0xe4   : > { %347 = vst.msk [vmem:[%s567_s6 + $0x38] sm:$0xff] %vm339_vm1, %v463_v22  ;;  %355 = vst.msk [vmem:[%s567_s6 + $0x78] sm:$0xff] %vm339_vm1, %v471_v23 }
  0xe5   : > { %v295_v24 = vpop.f32.mrf.mxu0  ;;  %v327_v25 = vpop.f32.mrf.mxu1 }
  0xe6   : > { %345 = vst.msk [vmem:[%s567_s6 + $0x28] sm:$0xff] %vm339_vm1, %v295_v24  ;;  %353 = vst.msk [vmem:[%s567_s6 + $0x68] sm:$0xff] %vm339_vm1, %v327_v25 }
  0xe7 PF: > { %s12_s9 = sadd.s32 1, %s500_s9  }
  0xe8   : > { %p9_p4 = scmp.ge.s32.totalorder %s12_s9, 5  }
  0xea   :  { %11 = sbr.rel (!%p9_p4) target bundleno = 1 (0x1), region = 58 }

// kernel: gate_dyn_unet_forward.24
= control target key start
LH: loop header
LB: loop body
LE: loop exit
PB: predicated region body
PF: predicated region fallthrough
CT: control target
= control target key end

     0   :  { %s1493_s18 = smov 0   ;;  %s1670_s0 = inlined_call_operand.vmem [shape: bf16[3,864,8], index: 0, kind: input, shape index: {}]   ;;  %s1671_s1 = inlined_call_operand.vmem [shape: bf16[32,864], index: 1, kind: input, shape index: {}]   ;;  %s1672_s2 = inlined_call_operand.vmem [shape: f32[32,1], index: 2, kind: input, shape index: {}]   ;;  %s1673_s3 = inlined_call_operand.vmem [shape: f32[32,1], index: 3, kind: input, shape index: {}]   ;;  %s1674_s4 = inlined_call_operand.vmem [shape: f32[3,32,8], index: 4, kind: input, shape index: {}]   ;;  %s1675_s5 = inlined_call_operand.vmem [shape: f32[3,32,8], index: 5, kind: output, shape index: {}]  }
   0x1 LB: > { %s1168_s19 = sadd.s32 4294967295, %s1460_s18   ;;  %p1172_p0 = scmp.ge.s32.totalorder %s1460_s18, 1  ;;  %s1460_s18 = sphi %s1493_s18, %s15_s18  }
   0x2   : > { %p197_p1 = scmp.lt.s32.totalorder %s1460_s18, 4 }
   0x4   : > { %p198_p2 = pnand %p1172_p0, %p197_p1 }
   0x5   : > { %p230_p3 = scmp.lt.s32.totalorder (!%p198_p2), %s1168_s19, 2 }
   0x6   : > { %201 = sbr.rel (%p198_p2) target bundleno = 673 (0x2a1), region = 40 }
   0xb   : > { %v1406_v0 = vld [vmem:[%s1671_s1 + $0x4] ss:$28 sps:$4 sm:$0xff]   ;;  %s1677_s19 = smov (!%p230_p3, %s1168_s19), 2  ;;  %v1409_v1 = vld [vmem:[%s1671_s1 + $0xc] ss:$28 sps:$4 sm:$0xff]   ;;  %vm764_vm0 = vcmask 785408  }
   0xc   : > { %803 = vmatprep.mubr.bf16.mxu0 %v1406_v0  ;;  %s1360_s24 = smul.u32 432, %s1677_s19  ;;  %852 = vmatprep.mubr.bf16.mxu1 %v1409_v1  ;;  %v1404_v32 = vld [vmem:[%s1671_s1] ss:$28 sps:$4 sm:$0xff]   ;;  %v1407_v34 = vld [vmem:[%s1671_s1 + $0x8] ss:$28 sps:$4 sm:$0xff]   ;;  %vm975_vm1 = vcmask 64512  }
   0xd   : > { %v1422_v36 = vld [vmem:[%s1671_s1 + $0x3c] ss:$28 sps:$4 sm:$0xff]   ;;  %v1424_v38 = vld [vmem:[%s1671_s1 + $0x44] ss:$28 sps:$4 sm:$0xff]   ;;  %v1442_v60 = vld [vmem:[%s1671_s1 + $0x14] ss:$28 sps:$4 sm:$0xff]  }
   0xe   : > { %s1513_s27 = scalar_lea.vmem %s1670_s0, %s1360_s24  ;;  %v1427_v44 = vld [vmem:[%s1671_s1 + $0x38] ss:$28 sps:$4 sm:$0xff]   ;;  %v1428_v46 = vld [vmem:[%s1671_s1 + $0x40] ss:$28 sps:$4 sm:$0xff]   ;;  %v1439_v63 = vld [vmem:[%s1671_s1 + $0x50] ss:$28 sps:$4 sm:$0xff]  }
   0xf   : > { %v1372_v2 = vld [vmem:[%s1513_s27 + $0x78] sm:$0xff]   ;;  %v1376_v6 = vld [vmem:[%s1513_s27 + $0x70] sm:$0xff]   ;;  %v1380_v10 = vld [vmem:[%s1513_s27 + $0x68] sm:$0xff]   ;;  %s1250_s22 = sshll.u32 %s1677_s19, 5 }
  0x10   : > { %v1373_v3 = vld [vmem:[%s1513_s27 + $0xf8] sm:$0xff]   ;;  %1252 = vmatprep.subr.bf16.mxu0 %v1372_v2  ;;  %v1377_v7 = vld [vmem:[%s1513_s27 + $0xf0] sm:$0xff]   ;;  %v1381_v11 = vld [vmem:[%s1513_s27 + $0xe8] sm:$0xff]   ;;  %s1647_s25 = scalar_lea.vmem %s1674_s4, %s1250_s22  ;;  %s1654_s28 = scalar_lea.vmem %s1675_s5, %s1250_s22 }
  0x11   : > { %v1374_v4 = vld [vmem:[%s1513_s27 + $0x38] sm:$0xff]   ;;  %1280 = vmatprep.subr.bf16.mxu1 %v1373_v3  ;;  %v1378_v8 = vld [vmem:[%s1513_s27 + $0x30] sm:$0xff]   ;;  %v1382_v12 = vld [vmem:[%s1513_s27 + $0x28] sm:$0xff]  }
  0x12   : > { %v1375_v5 = vld [vmem:[%s1513_s27 + $0xb8] sm:$0xff]   ;;  %1253 = vmatpush3.bf16.msra.mxu0 %v1374_v4  ;;  %v1379_v9 = vld [vmem:[%s1513_s27 + $0xb0] sm:$0xff]   ;;  %v1383_v13 = vld [vmem:[%s1513_s27 + $0xa8] sm:$0xff]  }
  0x13   : > { %1281 = vmatpush3.bf16.msra.mxu1 %v1375_v5  ;;  %1254 = vmatprep.subr.bf16.mxu0 %v1376_v6  ;;  %v1384_v14 = vld [vmem:[%s1513_s27 + $0x60] sm:$0xff]   ;;  %v1388_v18 = vld [vmem:[%s1513_s27 + $0x58] sm:$0xff]   ;;  %v1392_v22 = vld [vmem:[%s1513_s27 + $0x50] sm:$0xff]  }
  0x14   : > { %1282 = vmatprep.subr.bf16.mxu1 %v1377_v7  ;;  %v1385_v15 = vld [vmem:[%s1513_s27 + $0xe0] sm:$0xff]   ;;  %v1389_v19 = vld [vmem:[%s1513_s27 + $0xd8] sm:$0xff]   ;;  %v1393_v23 = vld [vmem:[%s1513_s27 + $0xd0] sm:$0xff]  }
  0x15   : > { %v1386_v16 = vld [vmem:[%s1513_s27 + $0x20] sm:$0xff]   ;;  %v1390_v20 = vld [vmem:[%s1513_s27 + $0x18] sm:$0xff]   ;;  %v1394_v24 = vld [vmem:[%s1513_s27 + $0x10] sm:$0xff]  }
  0x16   : > { %1255 = vmatpush3.bf16.msra.mxu0 %v1378_v8  ;;  %v1387_v17 = vld [vmem:[%s1513_s27 + $0xa0] sm:$0xff]   ;;  %v1391_v21 = vld [vmem:[%s1513_s27 + $0x98] sm:$0xff]   ;;  %v1395_v25 = vld [vmem:[%s1513_s27 + $0x90] sm:$0xff]  }
  0x17   : > { %1283 = vmatpush3.bf16.msra.mxu1 %v1379_v9  ;;  %1256 = vmatprep.subr.bf16.mxu0 %v1380_v10  ;;  %v1396_v26 = vld [vmem:[%s1513_s27 + $0x48] sm:$0xff]   ;;  %v1400_v30 = vld [vmem:[%s1513_s27 + $0x40] sm:$0xff]   ;;  %v1410_v37 = vld [vmem:[%s1513_s27 + $0x178] sm:$0xff]  }
  0x18   : > { %1284 = vmatprep.subr.bf16.mxu1 %v1381_v11  ;;  %v1397_v27 = vld [vmem:[%s1513_s27 + $0xc8] sm:$0xff]   ;;  %v1401_v31 = vld [vmem:[%s1513_s27 + $0xc0] sm:$0xff]   ;;  %v1411_v39 = vld [vmem:[%s1513_s27 + $0x138] sm:$0xff]  }
  0x19   : > { %v1398_v28 = vld [vmem:[%s1513_s27 + $0x8] sm:$0xff]   ;;  %v1402_v33 = vld [vmem:[%s1513_s27] sm:$0xff]   ;;  %v1412_v40 = vld [vmem:[%s1513_s27 + $0x170] sm:$0xff]  }
  0x1a   : > { %1257 = vmatpush3.bf16.msra.mxu0 %v1382_v12  ;;  %v1399_v29 = vld [vmem:[%s1513_s27 + $0x88] sm:$0xff]   ;;  %v1403_v35 = vld [vmem:[%s1513_s27 + $0x80] sm:$0xff]   ;;  %v1413_v41 = vld [vmem:[%s1513_s27 + $0x130] sm:$0xff]  }
  0x1b   : > { %1285 = vmatpush3.bf16.msra.mxu1 %v1383_v13  ;;  %1258 = vmatprep.subr.bf16.mxu0 %v1384_v14  ;;  %v1414_v42 = vld [vmem:[%s1513_s27 + $0x1a8] sm:$0xff]   ;;  %v1417_v45 = vld [vmem:[%s1513_s27 + $0x1a0] sm:$0xff]   ;;  %v1438_v48 = vld [vmem:[%s1671_s1 + $0x18] ss:$28 sps:$4 sm:$0xff]  }
  0x1c   : > { %1286 = vmatprep.subr.bf16.mxu1 %v1385_v15  ;;  %v1415_v43 = vld [vmem:[%s1513_s27 + $0x168] sm:$0xff]   ;;  %v1418_v49 = vld [vmem:[%s1513_s27 + $0x160] sm:$0xff]   ;;  %v1420_v50 = vld [vmem:[%s1513_s27 + $0x198] sm:$0xff]  }
  0x1d   : > { %v1416_v47 = vld [vmem:[%s1513_s27 + $0x128] sm:$0xff]   ;;  %v1419_v51 = vld [vmem:[%s1513_s27 + $0x120] sm:$0xff]   ;;  %v1421_v52 = vld [vmem:[%s1513_s27 + $0x158] sm:$0xff]  }
  0x1e   : > { %1259 = vmatpush3.bf16.msra.mxu0 %v1386_v16  ;;  %v1429_v53 = vld [vmem:[%s1513_s27 + $0x190] sm:$0xff]   ;;  %v1426_v54 = vld [vmem:[%s1513_s27 + $0x118] sm:$0xff]   ;;  %v1432_v55 = vld [vmem:[%s1513_s27 + $0x188] sm:$0xff]  }
  0x1f   : > { %1287 = vmatpush3.bf16.msra.mxu1 %v1387_v17  ;;  %1260 = vmatprep.subr.bf16.mxu0 %v1388_v18  ;;  %v1430_v56 = vld [vmem:[%s1513_s27 + $0x150] sm:$0xff]   ;;  %v1435_v58 = vld [vmem:[%s1513_s27 + $0x180] sm:$0xff]   ;;  %v1433_v59 = vld [vmem:[%s1513_s27 + $0x148] sm:$0xff]  }
  0x20   : > { %1288 = vmatprep.subr.bf16.mxu1 %v1389_v19  ;;  %v1431_v57 = vld [vmem:[%s1513_s27 + $0x110] sm:$0xff]   ;;  %v1434_v61 = vld [vmem:[%s1513_s27 + $0x108] sm:$0xff]   ;;  %v1436_v62 = vld [vmem:[%s1513_s27 + $0x140] sm:$0xff]  }
  0x21   : > { %v1437_v0 = vld [vmem:[%s1513_s27 + $0x100] sm:$0xff]   ;;  %v1440_v1 = vld [vmem:[%s1671_s1 + $0x10] ss:$28 sps:$4 sm:$0xff]  }
  0x22   : > { %1261 = vmatpush3.bf16.msra.mxu0 %v1390_v20  ;;  %v1443_v2 = vld [vmem:[%s1671_s1 + $0x4c] ss:$28 sps:$4 sm:$0xff]  }
  0x23   : > { %1289 = vmatpush3.bf16.msra.mxu1 %v1391_v21  ;;  %1262 = vmatprep.subr.bf16.mxu0 %v1392_v22  ;;  %v1445_v3 = vld [vmem:[%s1671_s1 + $0x48] ss:$28 sps:$4 sm:$0xff]  }
  0x24   : > { %1290 = vmatprep.subr.bf16.mxu1 %v1393_v23 }
  0x26   : > { %1263 = vmatpush3.bf16.msra.mxu0 %v1394_v24 }
  0x27   : > { %1291 = vmatpush3.bf16.msra.mxu1 %v1395_v25  ;;  %1264 = vmatprep.subr.bf16.mxu0 %v1396_v26 }
  0x28   : > { %1292 = vmatprep.subr.bf16.mxu1 %v1397_v27 }
  0x2a   : > { %1265 = vmatpush3.bf16.msra.mxu0 %v1398_v28 }
  0x2b   : > { %1293 = vmatpush3.bf16.msra.mxu1 %v1399_v29  ;;  %1266 = vmatprep.subr.bf16.mxu0 %v1400_v30 }
  0x2c   : > { %1294 = vmatprep.subr.bf16.mxu1 %v1401_v31 }
  0x2e   : > { %1267 = vmatpush3.bf16.msra.mxu0 %v1402_v33 }
  0x2f   : > { %1295 = vmatpush3.bf16.msra.mxu1 %v1403_v35  ;;  %1308 = vmatprep.subr.bf16.mxu0 %v1410_v37 }
  0x30   : > { %1344 = vmatprep.subr.bf16.mxu1 %v1414_v42 }
  0x31   : > { %804 = vmatmul.mubr.bf16.vlgmr.msra.gmra.mxu0 %v1404_v32 }
  0x32   : > { %853 = vmatmul.mubr.bf16.vlgmr.msra.gmra.mxu1 %v1407_v34  ;;  %1309 = vmatpush3.bf16.msra.mxu0 %v1411_v39 }
  0x33   : > { %1310 = vmatprep.subr.bf16.mxu0 %v1412_v40  ;;  %811 = vmatprep.mubr.bf16.mxu0 %v1422_v36 }
  0x34   : > { %860 = vmatprep.mubr.bf16.mxu1 %v1424_v38  ;;  %1345 = vmatpush3.bf16.msra.mxu1 %v1414_v42 }
  0x35   : > { %1346 = vmatprep.subr.bf16.mxu1 %v1417_v45 }
  0x36   : > { %1311 = vmatpush3.bf16.msra.mxu0 %v1413_v41 }
  0x37   : > { %1312 = vmatprep.subr.bf16.mxu0 %v1415_v43 }
  0x38   : > { %1347 = vmatpush3.bf16.msra.mxu1 %v1417_v45 }
  0x39   : > { %812 = vmatmul.mubr.bf16.gmra.mxu0 %v1427_v44  ;;  %1348 = vmatprep.subr.bf16.mxu1 %v1420_v50 }
  0x3a   : > { %1313 = vmatpush3.bf16.msra.mxu0 %v1416_v47  ;;  %861 = vmatmul.mubr.bf16.gmra.mxu1 %v1428_v46 }
  0x3b   : > { %1314 = vmatprep.subr.bf16.mxu0 %v1418_v49  ;;  %1356 = vmatprep.mubr.msk.bf16.mxu1 %vm764_vm0, %v1438_v48 }
  0x3c   : > { %1349 = vmatpush3.bf16.msra.mxu1 %v1420_v50  ;;  %901 = vmatprep.mubr.bf16.mxu0 %v1442_v60  ;;  %v1462_v60 = vmov 0  }
  0x3d   : > { %1350 = vmatprep.subr.bf16.mxu1 %v1429_v53  ;;  %1371 = vset.pattern.permute.xlu1 %v1462_v60 }
  0x3e   : > { %1315 = vmatpush3.bf16.msra.mxu0 %v1419_v51  ;;  %1370 = vset.pattern.permute.xlu0 %v1462_v60 }
  0x3f   : > { %1316 = vmatprep.subr.bf16.mxu0 %v1421_v52 }
  0x40   : > { %1351 = vmatpush3.bf16.msra.mxu1 %v1429_v53 }
  0x41   : > { %1352 = vmatprep.subr.bf16.mxu1 %v1432_v55 }
  0x42   : > { %1317 = vmatpush3.bf16.msra.mxu0 %v1426_v54 }
  0x43   : > { %1318 = vmatprep.subr.bf16.mxu0 %v1430_v56 }
  0x44   : > { %1353 = vmatpush3.bf16.msra.mxu1 %v1432_v55 }
  0x45   : > { %1354 = vmatprep.subr.bf16.mxu1 %v1435_v58 }
  0x46   : > { %1319 = vmatpush3.bf16.msra.mxu0 %v1431_v57 }
  0x47   : > { %1320 = vmatprep.subr.bf16.mxu0 %v1433_v59 }
  0x48   : > { %1355 = vmatpush3.bf16.msra.mxu1 %v1435_v58 }
  0x4a   : > { %1321 = vmatpush3.bf16.msra.mxu0 %v1434_v61 }
  0x4b   : > { %1322 = vmatprep.subr.bf16.mxu0 %v1436_v62  ;;  %1357 = vmatmul.mubr.msk.bf16.vlgmr.msra.gmra.mxu1 %vm764_vm0, %v1439_v63 }
  0x4e   : > { %1323 = vmatpush3.bf16.msra.mxu0 %v1437_v0 }
  0x51   : > { %902 = vmatmul.mubr.bf16.vlgmr.msra.gmra.mxu0 %v1440_v1 }
  0x52   : > { %909 = vmatprep.mubr.bf16.mxu0 %v1443_v2 }
  0x59   : > { %910 = vmatmul.mubr.bf16.gmra.mxu0 %v1445_v3 }
  0xf1   : > { %v1268_v5 = vpop.f32.mrf.mxu0 }
  0xf2   : > { %v1296_v4 = vpop.f32.mrf.mxu1 }
  0xf3   : > { %v1269_v7 = vpop.f32.mrf.mxu0 }
  0xf4   : > { %v1297_v6 = vpop.f32.mrf.mxu1  ;;  %v1270_v21 = vadd.f32 %v1269_v7, %v1268_v5 }
  0xf5   : > { %v1271_v9 = vpop.f32.mrf.mxu0  ;;  %v1298_v22 = vadd.f32 %v1297_v6, %v1296_v4 }
  0xf6   : > { %v1299_v8 = vpop.f32.mrf.mxu1 }
  0xf7   : > { %v1272_v11 = vpop.f32.mrf.mxu0  ;;  %v855_v26 = vadd.f32 %v1298_v22, %v1270_v21 }
  0xf8   : > { %v1300_v10 = vpop.f32.mrf.mxu1  ;;  %v1273_v27 = vadd.f32 %v1272_v11, %v1271_v9 }
  0xf9   : > { %v1274_v13 = vpop.f32.mrf.mxu0  ;;  %v1301_v28 = vadd.f32 %v1300_v10, %v1299_v8 }
  0xfa   : > { %v1302_v12 = vpop.f32.mrf.mxu1 }
  0xfb   : > { %v1275_v15 = vpop.f32.mrf.mxu0  ;;  %v858_v36 = vadd.f32 %v1301_v28, %v1273_v27 }
  0xfc   : > { %v1303_v14 = vpop.f32.mrf.mxu1  ;;  %v1276_v32 = vadd.f32 %v1275_v15, %v1274_v13  ;;  %v969_v13 = vld [vmem:[%s1672_s2 + $0x10] sm:$0xff]  ;;  %v967_v15 = vld [vmem:[%s1672_s2] sm:$0xff] }
  0xfd   : > { %v1277_v17 = vpop.f32.mrf.mxu0  ;;  %v1304_v33 = vadd.f32 %v1303_v14, %v1302_v12  ;;  %v968_v12 = vld [vmem:[%s1672_s2 + $0x8] sm:$0xff]  ;;  %v970_v14 = vld [vmem:[%s1672_s2 + $0x18] sm:$0xff] }
  0xfe   : > { %v1305_v16 = vpop.f32.mrf.mxu1 }
  0xff   : > { %v1278_v19 = vpop.f32.mrf.mxu0  ;;  %v863_v42 = vadd.f32 %v1304_v33, %v1276_v32 }
 0x100   : > { %v1306_v18 = vpop.f32.mrf.mxu1  ;;  %v1279_v45 = vadd.f32 %v1278_v19, %v1277_v17  ;;  %v972_v17 = vld [vmem:[%s1673_s3 + $0x8] sm:$0xff] }
 0x101   : > { %v1307_v46 = vadd.f32 %v1306_v18, %v1305_v16  ;;  %v971_v16 = vld [vmem:[%s1673_s3] sm:$0xff]  ;;  %v973_v18 = vld [vmem:[%s1673_s3 + $0x10] sm:$0xff] }
 0x103   : > { %v866_v53 = vadd.f32 %v1307_v46, %v1279_v45 }
 0x10b   : > { %v1358_v20 = vpop.f32.mrf.mxu1 }
 0x10d   : > { %v952_v24 = vpop.f32.mrf.mxu1 }
 0x10f   : > { %v1359_v34 = vpop.f32.mrf.mxu1 }
 0x111   : > { %v1324_v23 = vpop.f32.mrf.mxu0  ;;  %v955_v43 = vpop.f32.mrf.mxu1 }
 0x113   : > { %v1325_v25 = vpop.f32.mrf.mxu0 }
 0x114   : > { %v1326_v29 = vadd.f32 %v1325_v25, %v1324_v23 }
 0x115   : > { %v1327_v30 = vpop.f32.mrf.mxu0 }
 0x116   : > { %v904_v31 = vadd.f32 %v1326_v29, %v855_v26 }
 0x117   : > { %v1328_v35 = vpop.f32.mrf.mxu0 }
 0x118   : > { %v1329_v37 = vadd.f32 %v1328_v35, %v1327_v30  ;;  %v953_v38 = vadd.f32 %v952_v24, %v904_v31  ;;  %v974_v24 = vld [vmem:[%s1673_s3 + $0x18] sm:$0xff] }
 0x119   : > { %v1330_v39 = vpop.f32.mrf.mxu0 }
 0x11a   : > { %v907_v40 = vadd.f32 %v1329_v37, %v858_v36  ;;  %v976_v41 = vsel %vm975_vm1, %v953_v38, 0.0 }
 0x11b   : > { %v1331_v44 = vpop.f32.mrf.mxu0  ;;  %977 = vadd.xlane.f32.xlu0 %v976_v41 }
 0x11c   : > { %v1332_v47 = vadd.f32 %v1331_v44, %v1330_v39  ;;  %v956_v48 = vadd.f32 %v955_v43, %v907_v40  ;;  %v1077_v43 = vld [vmem:[%s1647_s25] sm:$0xff] }
 0x11d   : > { %v1333_v49 = vpop.f32.mrf.mxu0 }
 0x11e   : > { %v912_v50 = vadd.f32 %v1332_v47, %v863_v42  ;;  %v979_v51 = vsel %vm975_vm1, %v956_v48, 0.0 }
 0x11f   : > { %v1334_v52 = vpop.f32.mrf.mxu0  ;;  %980 = vadd.xlane.f32.xlu0 %v979_v51 }
 0x120   : > { %v1335_v54 = vadd.f32 %v1334_v52, %v1333_v49  ;;  %v961_v55 = vadd.f32 %v1358_v20, %v912_v50  ;;  %v1078_v50 = vld [vmem:[%s1647_s25 + $0x8] sm:$0xff] }
 0x122   : > { %v915_v56 = vadd.f32 %v1335_v54, %v866_v53  ;;  %v982_v57 = vsel %vm975_vm1, %v961_v55, 0.0 }
 0x123   : > { %983 = vadd.xlane.f32.xlu1 %v982_v57  ;;  %v1079_v57 = vld [vmem:[%s1647_s25 + $0x10] sm:$0xff] }
 0x124   : > { %v964_v58 = vadd.f32 %v1359_v34, %v915_v56 }
 0x126   : > { %v985_v59 = vsel %vm975_vm1, %v964_v58, 0.0 }
 0x127   : > { %986 = vadd.xlane.f32.xlu1 %v985_v59 }
 0x1a4   : > { %v978_v61 = vpop.xlane.xlu0 %977 }
 0x1a5   : > { %v989_v62 = vmul.f32 0.125, %v978_v61 }
 0x1a7   : > { %v993_v63 = vsub.f32 %v953_v38, %v989_v62 }
 0x1a8   : > { %v981_v0 = vpop.xlane.xlu0 %980 }
 0x1a9   : > { %v990_v1 = vmul.f32 0.125, %v981_v0  ;;  %v997_v2 = vmul.f32 %v993_v63, %v993_v63 }
 0x1ab   : > { %v994_v3 = vsub.f32 %v956_v48, %v990_v1  ;;  %v1001_v4 = vsel %vm975_vm1, %v997_v2, 0.0 }
 0x1ac   : > { %v984_v5 = vpop.xlane.xlu1 %983  ;;  %1002 = vadd.xlane.f32.xlu0 %v1001_v4 }
 0x1ad   : > { %v991_v6 = vmul.f32 0.125, %v984_v5  ;;  %v998_v7 = vmul.f32 %v994_v3, %v994_v3 }
 0x1af   : > { %v995_v8 = vsub.f32 %v961_v55, %v991_v6  ;;  %v1004_v9 = vsel %vm975_vm1, %v998_v7, 0.0  ;;  %v1080_v7 = vld [vmem:[%s1647_s25 + $0x18] sm:$0xff] }
 0x1b0   : > { %1005 = vadd.xlane.f32.xlu1 %v1004_v9  ;;  %v987_v19 = vpop.xlane.xlu1 %986 }
 0x1b1   : > { %v999_v10 = vmul.f32 %v995_v8, %v995_v8  ;;  %v992_v20 = vmul.f32 0.125, %v987_v19 }
 0x1b3   : > { %v1007_v11 = vsel %vm975_vm1, %v999_v10, 0.0  ;;  %v1635_v21 = vsub.f32 %v964_v58, %v992_v20 }
 0x1b4   : > { %1008 = vadd.xlane.f32.xlu0 %v1007_v11 }
 0x1b5   : > { %v1000_v22 = vmul.f32 %v1635_v21, %v1635_v21 }
 0x1b7   : > { %v1010_v23 = vsel %vm975_vm1, %v1000_v22, 0.0 }
 0x1c1   : > { %1036 = vperm.xlu1 %1371, %v968_v12  }
 0x1c5   : > { %1041 = vperm.xlu1 %1371, %v969_v13  }
 0x1c9   : > { %1046 = vperm.xlu1 %1371, %v970_v14  }
 0x1ca   : > { %1031 = vperm.xlu0 %1370, %v967_v15  }
 0x1cd   : > { %1055 = vperm.xlu1 %1371, %v971_v16  }
 0x1d1   : > { %1060 = vperm.xlu1 %1371, %v972_v17  }
 0x1d5   : > { %1065 = vperm.xlu1 %1371, %v973_v18  }
 0x1f9   : > { %1011 = vadd.xlane.f32.xlu1 %v1010_v23 }
 0x20a   : > { %1070 = vperm.xlu1 %1371, %v974_v24  }
 0x235   : > { %v1003_v25 = vpop.xlane.xlu0 %1002 }
 0x236   : > { %v1013_v26 = vmul.f32 0.125, %v1003_v25 }
 0x238   : > { %v1017_v27 = vadd.f32 1e-05, %v1013_v26 }
 0x239   : > { %v1006_v28 = vpop.xlane.xlu1 %1005 }
 0x23a   : > { %1446 = vrsqrt.f32 %v1017_v27  ;;  %v1014_v29 = vmul.f32 0.125, %v1006_v28 }
 0x23c   : > { %v1018_v30 = vadd.f32 1e-05, %v1014_v29 }
 0x23d   : > { %v1037_v31 = vpop.permute.xlu1 %1036  ;;  %v1009_v32 = vpop.xlane.xlu0 %1008 }
 0x23e   : > { %1448 = vrsqrt.f32 %v1018_v30  ;;  %v1015_v33 = vmul.f32 0.125, %v1009_v32 }
 0x240   : > { %v1019_v34 = vadd.f32 1e-05, %v1015_v33 }
 0x241   : > { %v1042_v35 = vpop.permute.xlu1 %1041 }
 0x242   : > { %1450 = vrsqrt.f32 %v1019_v34 }
 0x245   : > { %v1047_v36 = vpop.permute.xlu1 %1046  ;;  %v1032_v38 = vpop.permute.xlu0 %1031 }
 0x247   : > { %v1447_v37 = vpop.eup %1446 }
 0x248   : > { %v1025_v39 = vmul.f32 %v1447_v37, %v993_v63 }
 0x249   : > { %v1056_v40 = vpop.permute.xlu1 %1055 }
 0x24a   : > { %v1049_v41 = vmul.f32 %v1032_v38, %v1025_v39 }
 0x24b   : > { %v1449_v42 = vpop.eup %1448 }
 0x24c   : > { %v1026_v44 = vmul.f32 %v1449_v42, %v994_v3  ;;  %v1073_v45 = vadd.f32 %v1056_v40, %v1049_v41 }
 0x24d   : > { %v1061_v46 = vpop.permute.xlu1 %1060 }
 0x24e   : > { %v1050_v47 = vmul.f32 %v1037_v31, %v1026_v44  ;;  %v1081_v48 = vadd.f32 %v1077_v43, %v1073_v45 }
 0x24f   : > { %v1451_v49 = vpop.eup %1450 }
 0x250   : > { %v1027_v51 = vmul.f32 %v1451_v49, %v995_v8  ;;  %vm1085_vm2 = vcmp.gt.f32.partialorder %v1081_v48, 0.0  ;;  %v1089_v52 = vmul.f32 0.01, %v1081_v48  ;;  %v1074_v53 = vadd.f32 %v1061_v46, %v1050_v47 }
 0x251   : > { %v1066_v58 = vpop.permute.xlu1 %1065 }
 0x252   : > { %v1051_v54 = vmul.f32 %v1042_v35, %v1027_v51  ;;  %v1093_v55 = vsel %vm1085_vm2, %v1081_v48, %v1089_v52  ;;  %v1082_v56 = vadd.f32 %v1078_v50, %v1074_v53 }
 0x253   : > { %1097 = vst.msk [vmem:[%s1654_s28] sm:$0xff] %vm975_vm1, %v1093_v55 }
 0x254   : > { %vm1086_vm3 = vcmp.gt.f32.partialorder %v1082_v56, 0.0  ;;  %v1090_v59 = vmul.f32 0.01, %v1082_v56  ;;  %v1075_v60 = vadd.f32 %v1066_v58, %v1051_v54 }
 0x256   : > { %v1094_v61 = vsel %vm1086_vm3, %v1082_v56, %v1090_v59  ;;  %v1083_v62 = vadd.f32 %v1079_v57, %v1075_v60 }
 0x257   : > { %1098 = vst.msk [vmem:[%s1654_s28 + $0x8] sm:$0xff] %vm975_vm1, %v1094_v61 }
 0x258   : > { %vm1087_vm4 = vcmp.gt.f32.partialorder %v1083_v62, 0.0  ;;  %v1091_v63 = vmul.f32 0.01, %v1083_v62 }
 0x25a   : > { %v1095_v0 = vsel %vm1087_vm4, %v1083_v62, %v1091_v63 }
 0x25b   : > { %1099 = vst.msk [vmem:[%s1654_s28 + $0x10] sm:$0xff] %vm975_vm1, %v1095_v0 }
 0x282   : > { %v1012_v1 = vpop.xlane.xlu1 %1011 }
 0x283   : > { %v1016_v2 = vmul.f32 0.125, %v1012_v1 }
 0x285   : > { %v1020_v3 = vadd.f32 1e-05, %v1016_v2 }
 0x286   : > { %v1071_v8 = vpop.permute.xlu1 %1070 }
 0x287   : > { %1452 = vrsqrt.f32 %v1020_v3 }
 0x294   : > { %v1453_v4 = vpop.eup %1452 }
 0x295   : > { %v1028_v5 = vmul.f32 %v1453_v4, %v1635_v21 }
 0x297   : > { %v1052_v6 = vmul.f32 %v1047_v36, %v1028_v5 }
 0x299   : > { %v1076_v9 = vadd.f32 %v1071_v8, %v1052_v6 }
 0x29b   : > { %v1084_v10 = vadd.f32 %v1080_v7, %v1076_v9 }
 0x29d   : > { %vm1088_vm5 = vcmp.gt.f32.partialorder %v1084_v10, 0.0  ;;  %v1092_v11 = vmul.f32 0.01, %v1084_v10 }
 0x29f   : > { %v1096_v12 = vsel %vm1088_vm5, %v1084_v10, %v1092_v11 }
 0x2a0   : > { %1100 = vst.msk [vmem:[%s1654_s28 + $0x18] sm:$0xff] %vm975_vm1, %v1096_v12 }
 0x2a1 PF: > { %s15_s18 = sadd.s32 1, %s1460_s18  }
 0x2a2   : > { %p12_p4 = scmp.ge.s32.totalorder %s15_s18, 5  }
 0x2a4   :  { %14 = sbr.rel (!%p12_p4) target bundleno = 1 (0x1), region = 73 }

// kernel: gate_dyn_unet_forward.27
= control target key start
LH: loop header
LB: loop body
LE: loop exit
PB: predicated region body
PF: predicated region fallthrough
CT: control target
= control target key end

     0   :  { %s791_s15 = smov 0   ;;  %s884_s0 = inlined_call_operand.vmem [shape: bf16[3,432,64], index: 0, kind: input, shape index: {}]   ;;  %s885_s1 = inlined_call_operand.vmem [shape: bf16[16,432], index: 1, kind: input, shape index: {}]   ;;  %s886_s2 = inlined_call_operand.vmem [shape: f32[16,1], index: 2, kind: input, shape index: {}]   ;;  %s887_s3 = inlined_call_operand.vmem [shape: f32[16,1], index: 3, kind: input, shape index: {}]   ;;  %s888_s4 = inlined_call_operand.vmem [shape: f32[3,16,64], index: 4, kind: output, shape index: {}]  }
   0x1 LB: > { %s643_s16 = sadd.s32 4294967295, %s763_s15   ;;  %p647_p0 = scmp.ge.s32.totalorder %s763_s15, 1  ;;  %s763_s15 = sphi %s791_s15, %s14_s15  }
   0x2   : > { %p162_p1 = scmp.lt.s32.totalorder %s763_s15, 4 }
   0x4   : > { %p163_p2 = pnand %p647_p0, %p162_p1 }
   0x5   : > { %p188_p3 = scmp.lt.s32.totalorder (!%p163_p2), %s643_s16, 2 }
   0x6   : > { %166 = sbr.rel (%p163_p2) target bundleno = 570 (0x23a), region = 36 }
   0xb   : > { %v765_v0 = vmov 0   ;;  %v746_v1 = vld [vmem:[%s885_s1 + $0x4] ss:$16 sps:$4 sm:$0xff]   ;;  %vm438_vm0 = vcmask 392192   ;;  %s890_s16 = smov (!%p188_p3, %s643_s16), 2  ;;  %v525_v32 = vld [vmem:[%s886_s2 + $0x8] sm:$0xff] }
   0xc   : > { %483 = vmatprep.subr.bf16.mxu1 %v765_v0  ;;  %719 = vset.pattern.permute.xlu1 %v765_v0  ;;  %v752_v2 = vld [vmem:[%s885_s1 + $0xc] ss:$16 sps:$4 sm:$0xff]   ;;  %s708_s21 = smul.u32 216, %s890_s16  ;;  %v744_v28 = vld [vmem:[%s885_s1] ss:$16 sps:$4 sm:$0xff]   ;;  %vm528_vm1 = vcmask 523264  }
   0xd   : > { %718 = vset.pattern.permute.xlu0 %v765_v0  ;;  %474 = vmatprep.mubr.bf16.mxu0 %v746_v1  ;;  %v750_v31 = vld [vmem:[%s885_s1 + $0x8] ss:$16 sps:$4 sm:$0xff]   ;;  %v526_v33 = vld [vmem:[%s887_s3] sm:$0xff]  ;;  %s685_s11 = sshll.u32 %s890_s16, 4 }
   0xe   : > { %682 = vmatprep.mubr.msk.bf16.mxu1 %vm438_vm0, %v752_v2  ;;  %s814_s24 = scalar_lea.vmem %s884_s0, %s708_s21  ;;  %563 = vperm.xlu1 %719, %v525_v32   ;;  %v524_v48 = vld [vmem:[%s886_s2] sm:$0xff]  ;;  %v527_v59 = vld [vmem:[%s887_s3 + $0x8] sm:$0xff]  ;;  %s197_s14 = scalar_lea.vmem %s888_s4, %s685_s11 }
   0xf   : > { %v720_v3 = vld [vmem:[%s814_s24 + $0xb8] sm:$0xff]   ;;  %v723_v6 = vld [vmem:[%s814_s24 + $0xb0] sm:$0xff]   ;;  %v726_v9 = vld [vmem:[%s814_s24 + $0xa8] sm:$0xff]  }
  0x10   : > { %v721_v4 = vld [vmem:[%s814_s24 + $0x78] sm:$0xff]   ;;  %484 = vmatpush1.bf16.msra.mxu1 %v720_v3  ;;  %v724_v7 = vld [vmem:[%s814_s24 + $0x70] sm:$0xff]   ;;  %v727_v10 = vld [vmem:[%s814_s24 + $0x68] sm:$0xff]  }
  0x11   : > { %v722_v5 = vld [vmem:[%s814_s24 + $0x38] sm:$0xff]   ;;  %686 = vmatprep.subr.bf16.mxu0 %v721_v4  ;;  %485 = vmatprep.subr.bf16.mxu1 %v765_v0  ;;  %v725_v8 = vld [vmem:[%s814_s24 + $0x30] sm:$0xff]   ;;  %v728_v11 = vld [vmem:[%s814_s24 + $0x28] sm:$0xff]  }
  0x12   : > { %687 = vmatpush3.bf16.msra.mxu0 %v722_v5  ;;  %v729_v12 = vld [vmem:[%s814_s24 + $0xa0] sm:$0xff]   ;;  %v733_v15 = vld [vmem:[%s814_s24 + $0x58] sm:$0xff]   ;;  %v736_v18 = vld [vmem:[%s814_s24 + $0x50] sm:$0xff]   ;;  %570 = vperm.xlu1 %719, %v526_v33  }
  0x13   : > { %688 = vmatprep.subr.bf16.mxu0 %v724_v7  ;;  %v730_v13 = vld [vmem:[%s814_s24 + $0x60] sm:$0xff]   ;;  %v732_v16 = vld [vmem:[%s814_s24 + $0x98] sm:$0xff]   ;;  %v735_v19 = vld [vmem:[%s814_s24 + $0x90] sm:$0xff]  }
  0x14   : > { %486 = vmatpush1.bf16.msra.mxu1 %v723_v6  ;;  %v731_v14 = vld [vmem:[%s814_s24 + $0x20] sm:$0xff]   ;;  %v734_v17 = vld [vmem:[%s814_s24 + $0x18] sm:$0xff]   ;;  %v737_v20 = vld [vmem:[%s814_s24 + $0x10] sm:$0xff]  }
  0x15   : > { %487 = vmatprep.subr.bf16.mxu1 %v765_v0  ;;  %v739_v21 = vld [vmem:[%s814_s24 + $0x48] sm:$0xff]   ;;  %v742_v24 = vld [vmem:[%s814_s24 + $0x40] sm:$0xff]   ;;  %v747_v27 = vld [vmem:[%s814_s24 + $0xd0] sm:$0xff]  }
  0x16   : > { %689 = vmatpush3.bf16.msra.mxu0 %v725_v8  ;;  %v738_v22 = vld [vmem:[%s814_s24 + $0x88] sm:$0xff]   ;;  %v741_v25 = vld [vmem:[%s814_s24 + $0x80] sm:$0xff]  }
  0x17   : > { %690 = vmatprep.subr.bf16.mxu0 %v727_v10  ;;  %v740_v23 = vld [vmem:[%s814_s24 + $0x8] sm:$0xff]   ;;  %v743_v26 = vld [vmem:[%s814_s24] sm:$0xff]  }
  0x18   : > { %488 = vmatpush1.bf16.msra.mxu1 %v726_v9  ;;  %v748_v29 = vld [vmem:[%s814_s24 + $0xc8] sm:$0xff]   ;;  %v749_v30 = vld [vmem:[%s814_s24 + $0xc0] sm:$0xff]  }
  0x19   : > { %489 = vmatprep.subr.bf16.mxu1 %v765_v0 }
  0x1a   : > { %691 = vmatpush3.bf16.msra.mxu0 %v728_v11 }
  0x1b   : > { %692 = vmatprep.subr.bf16.mxu0 %v730_v13 }
  0x1c   : > { %490 = vmatpush1.bf16.msra.mxu1 %v729_v12 }
  0x1d   : > { %491 = vmatprep.subr.bf16.mxu1 %v765_v0 }
  0x1e   : > { %693 = vmatpush3.bf16.msra.mxu0 %v731_v14 }
  0x1f   : > { %694 = vmatprep.subr.bf16.mxu0 %v733_v15 }
  0x20   : > { %492 = vmatpush1.bf16.msra.mxu1 %v732_v16 }
  0x21   : > { %493 = vmatprep.subr.bf16.mxu1 %v765_v0 }
  0x22   : > { %695 = vmatpush3.bf16.msra.mxu0 %v734_v17 }
  0x23   : > { %696 = vmatprep.subr.bf16.mxu0 %v736_v18 }
  0x24   : > { %494 = vmatpush1.bf16.msra.mxu1 %v735_v19 }
  0x25   : > { %495 = vmatprep.subr.bf16.mxu1 %v765_v0 }
  0x26   : > { %697 = vmatpush3.bf16.msra.mxu0 %v737_v20 }
  0x27   : > { %698 = vmatprep.subr.bf16.mxu0 %v739_v21 }
  0x28   : > { %496 = vmatpush1.bf16.msra.mxu1 %v738_v22 }
  0x29   : > { %497 = vmatprep.subr.bf16.mxu1 %v765_v0 }
  0x2a   : > { %699 = vmatpush3.bf16.msra.mxu0 %v740_v23 }
  0x2b   : > { %700 = vmatprep.subr.bf16.mxu0 %v742_v24 }
  0x2c   : > { %498 = vmatpush1.bf16.msra.mxu1 %v741_v25 }
  0x2d   : > { %509 = vmatprep.subr.bf16.mxu1 %v765_v0 }
  0x2e   : > { %701 = vmatpush3.bf16.msra.mxu0 %v743_v26 }
  0x30   : > { %510 = vmatpush2.bf16.msra.mxu1 %v747_v27 }
  0x31   : > { %475 = vmatmul.mubr.bf16.vlgmr.msra.gmra.mxu0 %v744_v28  ;;  %511 = vmatprep.subr.bf16.mxu1 %v765_v0 }
  0x34   : > { %512 = vmatpush2.bf16.msra.mxu1 %v748_v29 }
  0x35   : > { %513 = vmatprep.subr.bf16.mxu1 %v765_v0 }
  0x38   : > { %514 = vmatpush2.bf16.msra.mxu1 %v749_v30 }
  0x3b   : > { %516 = vmatmul.mubr.bf16.vlgmr.msra.gmra.mxu1 %v750_v31 }
  0x89   : > { %v564_v60 = vpop.permute.xlu1 %563 }
  0x8d   : > { %v571_v61 = vpop.permute.xlu1 %570 }
  0xf1   : > { %v702_v34 = vpop.f32.mrf.mxu0 }
  0xf3   : > { %v703_v35 = vpop.f32.mrf.mxu0 }
  0xf4   : > { %v704_v37 = vadd.f32 %v703_v35, %v702_v34 }
  0xf5   : > { %v705_v36 = vpop.f32.mrf.mxu0 }
  0xf7   : > { %v706_v38 = vpop.f32.mrf.mxu0 }
  0xf8   : > { %v707_v42 = vadd.f32 %v706_v38, %v705_v36 }
  0xfb   : > { %v517_v39 = vpop.f32.mrf.mxu1 }
  0xfc   : > { %v518_v40 = vadd.f32 %v704_v37, %v517_v39 }
  0xfd   : > { %v519_v41 = vpop.f32.mrf.mxu1 }
  0xfe   : > { %v529_v43 = vsel %vm528_vm1, %v518_v40, 0.0 }
  0xff   : > { %v520_v44 = vpop.f32.mrf.mxu1  ;;  %530 = vadd.xlane.f32.xlu0 %v529_v43 }
 0x100   : > { %v521_v45 = vadd.f32 %v707_v42, %v520_v44 }
 0x101   : > { %v522_v46 = vpop.f32.mrf.mxu1 }
 0x102   : > { %v532_v47 = vsel %vm528_vm1, %v521_v45, 0.0 }
 0x103   : > { %533 = vadd.xlane.f32.xlu0 %v532_v47 }
 0x119   : > { %558 = vperm.xlu0 %718, %v524_v48  }
 0x188   : > { %v531_v49 = vpop.xlane.xlu0 %530 }
 0x189   : > { %v536_v50 = vmul.f32 0.015625, %v531_v49 }
 0x18b   : > { %v538_v51 = vsub.f32 %v518_v40, %v536_v50 }
 0x18c   : > { %v534_v52 = vpop.xlane.xlu0 %533 }
 0x18d   : > { %v537_v53 = vmul.f32 0.015625, %v534_v52  ;;  %v540_v54 = vmul.f32 %v538_v51, %v538_v51 }
 0x18f   : > { %v539_v55 = vsub.f32 %v521_v45, %v537_v53  ;;  %v542_v56 = vsel %vm528_vm1, %v540_v54, 0.0 }
 0x190   : > { %543 = vadd.xlane.f32.xlu1 %v542_v56 }
 0x191   : > { %v541_v57 = vmul.f32 %v539_v55, %v539_v55 }
 0x193   : > { %v545_v58 = vsel %vm528_vm1, %v541_v57, 0.0 }
 0x194   : > { %546 = vadd.xlane.f32.xlu1 %v545_v58  ;;  %v559_v5 = vpop.permute.xlu0 %558 }
 0x1a5   : > { %575 = vperm.xlu1 %719, %v527_v59  }
 0x219   : > { %v544_v62 = vpop.xlane.xlu1 %543 }
 0x21a   : > { %v548_v63 = vmul.f32 0.015625, %v544_v62 }
 0x21c   : > { %v550_v0 = vadd.f32 1e-05, %v548_v63 }
 0x21d   : > { %v547_v1 = vpop.xlane.xlu1 %546 }
 0x21e   : > { %753 = vrsqrt.f32 %v550_v0  ;;  %v549_v2 = vmul.f32 0.015625, %v547_v1 }
 0x220   : > { %v551_v3 = vadd.f32 1e-05, %v549_v2 }
 0x221   : > { %v576_v13 = vpop.permute.xlu1 %575 }
 0x222   : > { %755 = vrsqrt.f32 %v551_v3 }
 0x22b   : > { %v754_v4 = vpop.eup %753 }
 0x22c   : > { %v554_v6 = vmul.f32 %v754_v4, %v538_v51 }
 0x22e   : > { %v566_v7 = vmul.f32 %v559_v5, %v554_v6 }
 0x22f   : > { %v756_v8 = vpop.eup %755 }
 0x230   : > { %v555_v9 = vmul.f32 %v756_v8, %v539_v55  ;;  %v578_v10 = vadd.f32 %v571_v61, %v566_v7 }
 0x232   : > { %v567_v11 = vmul.f32 %v564_v60, %v555_v9  ;;  %vm580_vm2 = vcmp.gt.f32.partialorder %v578_v10, 0.0  ;;  %v582_v12 = vmul.f32 0.01, %v578_v10 }
 0x234   : > { %v579_v14 = vadd.f32 %v576_v13, %v567_v11  ;;  %v584_v15 = vsel %vm580_vm2, %v578_v10, %v582_v12 }
 0x235   : > { %586 = vst.msk [vmem:[%s197_s14] sm:$0xff] %vm528_vm1, %v584_v15 }
 0x236   : > { %vm581_vm3 = vcmp.gt.f32.partialorder %v579_v14, 0.0  ;;  %v583_v16 = vmul.f32 0.01, %v579_v14 }
 0x238   : > { %v585_v17 = vsel %vm581_vm3, %v579_v14, %v583_v16 }
 0x239   : > { %587 = vst.msk [vmem:[%s197_s14 + $0x8] sm:$0xff] %vm528_vm1, %v585_v17 }
 0x23a PF: > { %s14_s15 = sadd.s32 1, %s763_s15  }
 0x23b   : > { %p11_p4 = scmp.ge.s32.totalorder %s14_s15, 5  }
 0x23d   :  { %13 = sbr.rel (!%p11_p4) target bundleno = 1 (0x1), region = 66 }

// kernel: gate_dyn_unet_forward.26
= control target key start
LH: loop header
LB: loop body
LE: loop exit
PB: predicated region body
PF: predicated region fallthrough
CT: control target
= control target key end

     0   :  { %s1299_s21 = smov 0   ;;  %s1453_s0 = inlined_call_operand.vmem [shape: bf16[3,432,64], index: 0, kind: input, shape index: {}]   ;;  %s1454_s1 = inlined_call_operand.vmem [shape: bf16[16,432], index: 1, kind: input, shape index: {}]   ;;  %s1455_s2 = inlined_call_operand.vmem [shape: bf16[3,432,64], index: 2, kind: input, shape index: {}]   ;;  %s1456_s3 = inlined_call_operand.vmem [shape: bf16[16,432], index: 3, kind: input, shape index: {}]   ;;  %s1457_s4 = inlined_call_operand.vmem [shape: f32[16,1], index: 4, kind: input, shape index: {}]   ;;  %s1458_s5 = inlined_call_operand.vmem [shape: f32[16,1], index: 5, kind: input, shape index: {}]   ;;  %s1459_s6 = inlined_call_operand.vmem [shape: f32[3,16,64], index: 6, kind: output, shape index: {}]  }
   0x1 LB: > { %s1053_s22 = sadd.s32 4294967295, %s1261_s21   ;;  %p1057_p0 = scmp.ge.s32.totalorder %s1261_s21, 1  ;;  %s1261_s21 = sphi %s1299_s21, %s16_s21  }
   0x2   : > { %p222_p1 = scmp.lt.s32.totalorder %s1261_s21, 4 }
   0x4   : > { %p223_p2 = pnand %p1057_p0, %p222_p1 }
   0x5   : > { %p257_p3 = scmp.lt.s32.totalorder (!%p223_p2), %s1053_s22, 2 }
   0x6   : > { %226 = sbr.rel (%p223_p2) target bundleno = 615 (0x267), region = 44 }
   0xb   : > { %v1263_v0 = vmov 0   ;;  %v1211_v1 = vld [vmem:[%s1456_s3 + $0x4] ss:$16 sps:$4 sm:$0xff]   ;;  %vm570_vm0 = vcmask 392192   ;;  %s1461_s22 = smov (!%p257_p3, %s1053_s22), 2  ;;  %v923_v63 = vld [vmem:[%s1457_s4 + $0x8] sm:$0xff] }
   0xc   : > { %615 = vmatprep.subr.bf16.mxu1 %v1263_v0  ;;  %1184 = vset.pattern.permute.xlu1 %v1263_v0  ;;  %v1223_v2 = vld [vmem:[%s1456_s3 + $0xc] ss:$16 sps:$4 sm:$0xff]   ;;  %s1173_s27 = smul.u32 216, %s1461_s22  ;;  %v1209_v28 = vld [vmem:[%s1456_s3] ss:$16 sps:$4 sm:$0xff]   ;;  %vm926_vm1 = vcmask 523264  }
   0xd   : > { %1183 = vset.pattern.permute.xlu0 %v1263_v0  ;;  %606 = vmatprep.mubr.bf16.mxu0 %v1211_v1  ;;  %v1241_v30 = vld [vmem:[%s1454_s1 + $0x4] ss:$16 sps:$4 sm:$0xff]   ;;  %v1221_v38 = vld [vmem:[%s1456_s3 + $0x8] ss:$16 sps:$4 sm:$0xff]   ;;  %v1248_v40 = vld [vmem:[%s1454_s1 + $0xc] ss:$16 sps:$4 sm:$0xff]  }
   0xe   : > { %1093 = vmatprep.mubr.msk.bf16.mxu1 %vm570_vm0, %v1223_v2  ;;  %s1325_s30 = scalar_lea.vmem %s1455_s2, %s1173_s27  ;;  %s1359_s9 = scalar_lea.vmem %s1453_s0, %s1173_s27  ;;  %v1239_v55 = vld [vmem:[%s1454_s1] ss:$16 sps:$4 sm:$0xff]   ;;  %v1250_v62 = vld [vmem:[%s1454_s1 + $0x8] ss:$16 sps:$4 sm:$0xff]   ;;  %961 = vperm.xlu1 %1184, %v923_v63  }
   0xf   : > { %v1185_v3 = vld [vmem:[%s1325_s30 + $0x78] sm:$0xff]   ;;  %v1188_v6 = vld [vmem:[%s1325_s30 + $0x70] sm:$0xff]   ;;  %v1191_v9 = vld [vmem:[%s1325_s30 + $0x68] sm:$0xff]   ;;  %s1128_s8 = sshll.u32 %s1461_s22, 4 }
  0x10   : > { %v1186_v4 = vld [vmem:[%s1325_s30 + $0xb8] sm:$0xff]   ;;  %1129 = vmatprep.subr.bf16.mxu0 %v1185_v3  ;;  %v1189_v7 = vld [vmem:[%s1325_s30 + $0xb0] sm:$0xff]   ;;  %v1192_v10 = vld [vmem:[%s1325_s30 + $0xa8] sm:$0xff]   ;;  %s271_s11 = scalar_lea.vmem %s1459_s6, %s1128_s8 }
  0x11   : > { %v1187_v5 = vld [vmem:[%s1325_s30 + $0x38] sm:$0xff]   ;;  %616 = vmatpush1.bf16.msra.mxu1 %v1186_v4  ;;  %v1190_v8 = vld [vmem:[%s1325_s30 + $0x30] sm:$0xff]   ;;  %v1193_v11 = vld [vmem:[%s1325_s30 + $0x28] sm:$0xff]  }
  0x12   : > { %1130 = vmatpush3.bf16.msra.mxu0 %v1187_v5  ;;  %617 = vmatprep.subr.bf16.mxu1 %v1263_v0  ;;  %v1194_v12 = vld [vmem:[%s1325_s30 + $0x60] sm:$0xff]   ;;  %v1197_v15 = vld [vmem:[%s1325_s30 + $0x58] sm:$0xff]   ;;  %v1200_v18 = vld [vmem:[%s1325_s30 + $0x50] sm:$0xff]  }
  0x13   : > { %1131 = vmatprep.subr.bf16.mxu0 %v1188_v6  ;;  %v1195_v13 = vld [vmem:[%s1325_s30 + $0xa0] sm:$0xff]   ;;  %v1198_v16 = vld [vmem:[%s1325_s30 + $0x98] sm:$0xff]   ;;  %v1201_v19 = vld [vmem:[%s1325_s30 + $0x90] sm:$0xff]  }
  0x14   : > { %v1196_v14 = vld [vmem:[%s1325_s30 + $0x20] sm:$0xff]   ;;  %v1199_v17 = vld [vmem:[%s1325_s30 + $0x18] sm:$0xff]   ;;  %v1202_v20 = vld [vmem:[%s1325_s30 + $0x10] sm:$0xff]  }
  0x15   : > { %618 = vmatpush1.bf16.msra.mxu1 %v1189_v7  ;;  %v1203_v21 = vld [vmem:[%s1325_s30 + $0x48] sm:$0xff]   ;;  %v1206_v24 = vld [vmem:[%s1325_s30 + $0x40] sm:$0xff]   ;;  %v1213_v27 = vld [vmem:[%s1359_s9 + $0x78] sm:$0xff]  }
  0x16   : > { %1132 = vmatpush3.bf16.msra.mxu0 %v1190_v8  ;;  %619 = vmatprep.subr.bf16.mxu1 %v1263_v0  ;;  %v1204_v22 = vld [vmem:[%s1325_s30 + $0x88] sm:$0xff]   ;;  %v1207_v25 = vld [vmem:[%s1325_s30 + $0x80] sm:$0xff]   ;;  %v1212_v29 = vld [vmem:[%s1325_s30 + $0xd0] sm:$0xff]  }
  0x17   : > { %1133 = vmatprep.subr.bf16.mxu0 %v1191_v9  ;;  %v1205_v23 = vld [vmem:[%s1325_s30 + $0x8] sm:$0xff]   ;;  %v1208_v26 = vld [vmem:[%s1325_s30] sm:$0xff]   ;;  %v1214_v31 = vld [vmem:[%s1359_s9 + $0x38] sm:$0xff]  }
  0x18   : > { %v1216_v32 = vld [vmem:[%s1359_s9 + $0x70] sm:$0xff]   ;;  %v1215_v33 = vld [vmem:[%s1325_s30 + $0xc8] sm:$0xff]   ;;  %v1218_v36 = vld [vmem:[%s1325_s30 + $0xc0] sm:$0xff]  }
  0x19   : > { %620 = vmatpush1.bf16.msra.mxu1 %v1192_v10  ;;  %v1217_v34 = vld [vmem:[%s1359_s9 + $0x30] sm:$0xff]   ;;  %v1219_v35 = vld [vmem:[%s1359_s9 + $0x68] sm:$0xff]   ;;  %v1224_v39 = vld [vmem:[%s1359_s9 + $0x60] sm:$0xff]  }
  0x1a   : > { %1134 = vmatpush3.bf16.msra.mxu0 %v1193_v11  ;;  %621 = vmatprep.subr.bf16.mxu1 %v1263_v0  ;;  %v1220_v37 = vld [vmem:[%s1359_s9 + $0x28] sm:$0xff]   ;;  %v1225_v41 = vld [vmem:[%s1359_s9 + $0xb8] sm:$0xff]   ;;  %v1226_v42 = vld [vmem:[%s1359_s9 + $0x20] sm:$0xff]  }
  0x1b   : > { %1135 = vmatprep.subr.bf16.mxu0 %v1194_v12  ;;  %v1227_v43 = vld [vmem:[%s1359_s9 + $0x58] sm:$0xff]   ;;  %v1228_v44 = vld [vmem:[%s1359_s9 + $0xb0] sm:$0xff]   ;;  %v1231_v47 = vld [vmem:[%s1359_s9 + $0xa8] sm:$0xff]  }
  0x1c   : > { %v1229_v45 = vld [vmem:[%s1359_s9 + $0x18] sm:$0xff]   ;;  %v1230_v46 = vld [vmem:[%s1359_s9 + $0x50] sm:$0xff]   ;;  %v1233_v49 = vld [vmem:[%s1359_s9 + $0x48] sm:$0xff]  }
  0x1d   : > { %622 = vmatpush1.bf16.msra.mxu1 %v1195_v13  ;;  %v1232_v48 = vld [vmem:[%s1359_s9 + $0x10] sm:$0xff]   ;;  %v1234_v50 = vld [vmem:[%s1359_s9 + $0xa0] sm:$0xff]   ;;  %v1235_v51 = vld [vmem:[%s1359_s9 + $0x8] sm:$0xff]  }
  0x1e   : > { %1136 = vmatpush3.bf16.msra.mxu0 %v1196_v14  ;;  %623 = vmatprep.subr.bf16.mxu1 %v1263_v0  ;;  %v1236_v52 = vld [vmem:[%s1359_s9 + $0x40] sm:$0xff]   ;;  %v1237_v53 = vld [vmem:[%s1359_s9 + $0x98] sm:$0xff]   ;;  %v1242_v56 = vld [vmem:[%s1359_s9 + $0x90] sm:$0xff]  }
  0x1f   : > { %1137 = vmatprep.subr.bf16.mxu0 %v1197_v15  ;;  %v1238_v54 = vld [vmem:[%s1359_s9] sm:$0xff]   ;;  %v1243_v57 = vld [vmem:[%s1359_s9 + $0x88] sm:$0xff]   ;;  %v1245_v59 = vld [vmem:[%s1359_s9 + $0xd0] sm:$0xff]  }
  0x20   : > { %v1244_v58 = vld [vmem:[%s1359_s9 + $0x80] sm:$0xff]   ;;  %v1246_v60 = vld [vmem:[%s1359_s9 + $0xc8] sm:$0xff]  }
  0x21   : > { %624 = vmatpush1.bf16.msra.mxu1 %v1198_v16  ;;  %v1247_v61 = vld [vmem:[%s1359_s9 + $0xc0] sm:$0xff]  }
  0x22   : > { %1138 = vmatpush3.bf16.msra.mxu0 %v1199_v17  ;;  %625 = vmatprep.subr.bf16.mxu1 %v1263_v0  ;;  %v924_v1 = vld [vmem:[%s1458_s5] sm:$0xff] }
  0x23   : > { %1139 = vmatprep.subr.bf16.mxu0 %v1200_v18  ;;  %968 = vperm.xlu1 %1184, %v924_v1  }
  0x25   : > { %626 = vmatpush1.bf16.msra.mxu1 %v1201_v19 }
  0x26   : > { %1140 = vmatpush3.bf16.msra.mxu0 %v1202_v20  ;;  %627 = vmatprep.subr.bf16.mxu1 %v1263_v0 }
  0x27   : > { %1141 = vmatprep.subr.bf16.mxu0 %v1203_v21 }
  0x29   : > { %628 = vmatpush1.bf16.msra.mxu1 %v1204_v22 }
  0x2a   : > { %1142 = vmatpush3.bf16.msra.mxu0 %v1205_v23  ;;  %629 = vmatprep.subr.bf16.mxu1 %v1263_v0 }
  0x2b   : > { %1143 = vmatprep.subr.bf16.mxu0 %v1206_v24 }
  0x2d   : > { %630 = vmatpush1.bf16.msra.mxu1 %v1207_v25 }
  0x2e   : > { %1144 = vmatpush3.bf16.msra.mxu0 %v1208_v26  ;;  %641 = vmatprep.subr.bf16.mxu1 %v1263_v0 }
  0x2f   : > { %1151 = vmatprep.subr.bf16.mxu0 %v1213_v27 }
  0x31   : > { %642 = vmatpush2.bf16.msra.mxu1 %v1212_v29  ;;  %607 = vmatmul.mubr.bf16.vlgmr.msra.gmra.mxu0 %v1209_v28  ;;  %v922_v29 = vld [vmem:[%s1457_s4] sm:$0xff] }
  0x32   : > { %1152 = vmatpush3.bf16.msra.mxu0 %v1214_v31  ;;  %643 = vmatprep.subr.bf16.mxu1 %v1263_v0 }
  0x33   : > { %1153 = vmatprep.subr.bf16.mxu0 %v1216_v32  ;;  %872 = vmatprep.mubr.bf16.mxu0 %v1241_v30 }
  0x35   : > { %644 = vmatpush2.bf16.msra.mxu1 %v1215_v33 }
  0x36   : > { %1154 = vmatpush3.bf16.msra.mxu0 %v1217_v34  ;;  %645 = vmatprep.subr.bf16.mxu1 %v1263_v0 }
  0x37   : > { %1155 = vmatprep.subr.bf16.mxu0 %v1219_v35 }
  0x39   : > { %646 = vmatpush2.bf16.msra.mxu1 %v1218_v36 }
  0x3a   : > { %1156 = vmatpush3.bf16.msra.mxu0 %v1220_v37  ;;  %881 = vmatprep.subr.bf16.mxu1 %v1263_v0 }
  0x3b   : > { %1157 = vmatprep.subr.bf16.mxu0 %v1224_v39 }
  0x3c   : > { %648 = vmatmul.mubr.bf16.vlgmr.msra.gmra.mxu1 %v1221_v38 }
  0x3d   : > { %882 = vmatpush1.bf16.msra.mxu1 %v1225_v41  ;;  %1125 = vmatprep.mubr.msk.bf16.mxu1 %vm570_vm0, %v1248_v40  ;;  %v925_v40 = vld [vmem:[%s1458_s5 + $0x8] sm:$0xff] }
  0x3e   : > { %1158 = vmatpush3.bf16.msra.mxu0 %v1226_v42  ;;  %883 = vmatprep.subr.bf16.mxu1 %v1263_v0 }
  0x3f   : > { %1159 = vmatprep.subr.bf16.mxu0 %v1227_v43 }
  0x41   : > { %884 = vmatpush1.bf16.msra.mxu1 %v1228_v44 }
  0x42   : > { %1160 = vmatpush3.bf16.msra.mxu0 %v1229_v45  ;;  %885 = vmatprep.subr.bf16.mxu1 %v1263_v0 }
  0x43   : > { %1161 = vmatprep.subr.bf16.mxu0 %v1230_v46 }
  0x45   : > { %886 = vmatpush1.bf16.msra.mxu1 %v1231_v47 }
  0x46   : > { %1162 = vmatpush3.bf16.msra.mxu0 %v1232_v48  ;;  %887 = vmatprep.subr.bf16.mxu1 %v1263_v0 }
  0x47   : > { %1163 = vmatprep.subr.bf16.mxu0 %v1233_v49 }
  0x49   : > { %888 = vmatpush1.bf16.msra.mxu1 %v1234_v50 }
  0x4a   : > { %1164 = vmatpush3.bf16.msra.mxu0 %v1235_v51  ;;  %889 = vmatprep.subr.bf16.mxu1 %v1263_v0 }
  0x4b   : > { %1165 = vmatprep.subr.bf16.mxu0 %v1236_v52 }
  0x4d   : > { %890 = vmatpush1.bf16.msra.mxu1 %v1237_v53 }
  0x4e   : > { %1166 = vmatpush3.bf16.msra.mxu0 %v1238_v54  ;;  %891 = vmatprep.subr.bf16.mxu1 %v1263_v0 }
  0x51   : > { %873 = vmatmul.mubr.bf16.vlgmr.msra.gmra.mxu0 %v1239_v55  ;;  %892 = vmatpush1.bf16.msra.mxu1 %v1242_v56 }
  0x52   : > { %893 = vmatprep.subr.bf16.mxu1 %v1263_v0 }
  0x55   : > { %894 = vmatpush1.bf16.msra.mxu1 %v1243_v57 }
  0x56   : > { %895 = vmatprep.subr.bf16.mxu1 %v1263_v0 }
  0x59   : > { %896 = vmatpush1.bf16.msra.mxu1 %v1244_v58 }
  0x5a   : > { %907 = vmatprep.subr.bf16.mxu1 %v1263_v0 }
  0x5d   : > { %908 = vmatpush2.bf16.msra.mxu1 %v1245_v59 }
  0x5e   : > { %909 = vmatprep.subr.bf16.mxu1 %v1263_v0 }
  0x61   : > { %910 = vmatpush2.bf16.msra.mxu1 %v1246_v60 }
  0x62   : > { %911 = vmatprep.subr.bf16.mxu1 %v1263_v0 }
  0x65   : > { %912 = vmatpush2.bf16.msra.mxu1 %v1247_v61 }
  0x68   : > { %914 = vmatmul.mubr.bf16.vlgmr.msra.gmra.mxu1 %v1250_v62 }
  0x89   : > { %v962_v41 = vpop.permute.xlu1 %961 }
  0x9e   : > { %v969_v42 = vpop.permute.xlu1 %968 }
  0xf1   : > { %v1145_v5 = vpop.f32.mrf.mxu0 }
  0xf3   : > { %v1146_v6 = vpop.f32.mrf.mxu0 }
  0xf4   : > { %v1147_v12 = vadd.f32 %v1146_v6, %v1145_v5 }
  0xf5   : > { %v1148_v7 = vpop.f32.mrf.mxu0 }
  0xf7   : > { %v1149_v8 = vpop.f32.mrf.mxu0 }
  0xf8   : > { %v1150_v16 = vadd.f32 %v1149_v8, %v1148_v7 }
  0xfc   : > { %v649_v2 = vpop.f32.mrf.mxu1 }
  0xfd   : > { %v650_v15 = vadd.f32 %v1147_v12, %v649_v2 }
  0xfe   : > { %v651_v3 = vpop.f32.mrf.mxu1 }
 0x100   : > { %v652_v4 = vpop.f32.mrf.mxu1 }
 0x101   : > { %v653_v20 = vadd.f32 %v1150_v16, %v652_v4 }
 0x102   : > { %v654_v0 = vpop.f32.mrf.mxu1 }
 0x111   : > { %v1167_v9 = vpop.f32.mrf.mxu0 }
 0x113   : > { %v1168_v10 = vpop.f32.mrf.mxu0 }
 0x114   : > { %v1169_v13 = vadd.f32 %v1168_v10, %v1167_v9 }
 0x115   : > { %v1170_v11 = vpop.f32.mrf.mxu0 }
 0x116   : > { %v875_v18 = vadd.f32 %v1169_v13, %v650_v15 }
 0x117   : > { %v1171_v14 = vpop.f32.mrf.mxu0 }
 0x118   : > { %v1172_v17 = vadd.f32 %v1171_v14, %v1170_v11 }
 0x11a   : > { %v878_v23 = vadd.f32 %v1172_v17, %v653_v20 }
 0x128   : > { %v915_v19 = vpop.f32.mrf.mxu1 }
 0x129   : > { %v916_v21 = vadd.f32 %v915_v19, %v875_v18 }
 0x12a   : > { %v917_v22 = vpop.f32.mrf.mxu1 }
 0x12b   : > { %v927_v24 = vsel %vm926_vm1, %v916_v21, 0.0 }
 0x12c   : > { %v918_v25 = vpop.f32.mrf.mxu1  ;;  %928 = vadd.xlane.f32.xlu0 %v927_v24 }
 0x12d   : > { %v919_v26 = vadd.f32 %v918_v25, %v878_v23 }
 0x12e   : > { %v920_v27 = vpop.f32.mrf.mxu1 }
 0x12f   : > { %v930_v28 = vsel %vm926_vm1, %v919_v26, 0.0 }
 0x130   : > { %931 = vadd.xlane.f32.xlu0 %v930_v28 }
 0x146   : > { %956 = vperm.xlu0 %1183, %v922_v29  }
 0x1b5   : > { %v929_v30 = vpop.xlane.xlu0 %928 }
 0x1b6   : > { %v934_v31 = vmul.f32 0.015625, %v929_v30 }
 0x1b8   : > { %v936_v32 = vsub.f32 %v916_v21, %v934_v31 }
 0x1b9   : > { %v932_v33 = vpop.xlane.xlu0 %931 }
 0x1ba   : > { %v935_v34 = vmul.f32 0.015625, %v932_v33  ;;  %v938_v35 = vmul.f32 %v936_v32, %v936_v32 }
 0x1bc   : > { %v937_v36 = vsub.f32 %v919_v26, %v935_v34  ;;  %v940_v37 = vsel %vm926_vm1, %v938_v35, 0.0 }
 0x1bd   : > { %941 = vadd.xlane.f32.xlu1 %v940_v37 }
 0x1be   : > { %v939_v38 = vmul.f32 %v937_v36, %v937_v36 }
 0x1c0   : > { %v943_v39 = vsel %vm926_vm1, %v939_v38, 0.0 }
 0x1c1   : > { %944 = vadd.xlane.f32.xlu1 %v943_v39  ;;  %v957_v50 = vpop.permute.xlu0 %956 }
 0x1d2   : > { %973 = vperm.xlu1 %1184, %v925_v40  }
 0x246   : > { %v942_v43 = vpop.xlane.xlu1 %941 }
 0x247   : > { %v946_v44 = vmul.f32 0.015625, %v942_v43 }
 0x249   : > { %v948_v45 = vadd.f32 1e-05, %v946_v44 }
 0x24a   : > { %v945_v46 = vpop.xlane.xlu1 %944 }
 0x24b   : > { %1251 = vrsqrt.f32 %v948_v45  ;;  %v947_v47 = vmul.f32 0.015625, %v945_v46 }
 0x24d   : > { %v949_v48 = vadd.f32 1e-05, %v947_v47 }
 0x24e   : > { %v974_v58 = vpop.permute.xlu1 %973 }
 0x24f   : > { %1253 = vrsqrt.f32 %v949_v48 }
 0x258   : > { %v1252_v49 = vpop.eup %1251 }
 0x259   : > { %v952_v51 = vmul.f32 %v1252_v49, %v936_v32 }
 0x25b   : > { %v964_v52 = vmul.f32 %v957_v50, %v952_v51 }
 0x25c   : > { %v1254_v53 = vpop.eup %1253 }
 0x25d   : > { %v953_v54 = vmul.f32 %v1254_v53, %v937_v36  ;;  %v976_v55 = vadd.f32 %v969_v42, %v964_v52 }
 0x25f   : > { %v965_v56 = vmul.f32 %v962_v41, %v953_v54  ;;  %vm978_vm2 = vcmp.gt.f32.partialorder %v976_v55, 0.0  ;;  %v980_v57 = vmul.f32 0.01, %v976_v55 }
 0x261   : > { %v977_v59 = vadd.f32 %v974_v58, %v965_v56  ;;  %v982_v60 = vsel %vm978_vm2, %v976_v55, %v980_v57 }
 0x262   : > { %984 = vst.msk [vmem:[%s271_s11] sm:$0xff] %vm926_vm1, %v982_v60 }
 0x263   : > { %vm979_vm3 = vcmp.gt.f32.partialorder %v977_v59, 0.0  ;;  %v981_v61 = vmul.f32 0.01, %v977_v59 }
 0x265   : > { %v983_v62 = vsel %vm979_vm3, %v977_v59, %v981_v61 }
 0x266   : > { %985 = vst.msk [vmem:[%s271_s11 + $0x8] sm:$0xff] %vm926_vm1, %v983_v62 }
 0x267 PF: > { %s16_s21 = sadd.s32 1, %s1261_s21  }
 0x268   : > { %p13_p4 = scmp.ge.s32.totalorder %s16_s21, 5  }
 0x26a   :  { %15 = sbr.rel (!%p13_p4) target bundleno = 1 (0x1), region = 77 }

// kernel: gate_dyn_unet_forward.28
= control target key start
LH: loop header
LB: loop body
LE: loop exit
PB: predicated region body
PF: predicated region fallthrough
CT: control target
= control target key end

     0   :  { %s398_s9 = smov 0   ;;  %s435_s0 = inlined_call_operand.vmem [shape: bf16[3,16,64], index: 0, kind: input, shape index: {}]   ;;  %s436_s1 = inlined_call_operand.vmem [shape: bf16[64,16], index: 1, kind: input, shape index: {}]   ;;  %s437_s2 = inlined_call_operand.vmem [shape: f32[3,64,64], index: 2, kind: output, shape index: {}]  }
   0x1 LB: > { %s323_s10 = sadd.s32 4294967295, %s381_s9   ;;  %p327_p0 = scmp.ge.s32.totalorder %s381_s9, 1  ;;  %s381_s9 = sphi %s398_s9, %s12_s9  }
   0x2   : > { %p112_p1 = scmp.lt.s32.totalorder %s381_s9, 4 }
   0x4   : > { %p113_p2 = pnand %p327_p0, %p112_p1 }
   0x5   : > { %p134_p3 = scmp.lt.s32.totalorder (!%p113_p2), %s323_s10, 2 }
   0x6   : > { %116 = sbr.rel (%p113_p2) target bundleno = 219 (0xdb), region = 28 }
   0xb   : > { %v371_v0 = vld [vmem:[%s436_s1] sm:$0xff]   ;;  %vm181_vm0 = vcmask 130048   ;;  %v372_v1 = vld [vmem:[%s436_s1 + $0x10] sm:$0xff]   ;;  %s439_s10 = smov (!%p134_p3, %s323_s10), 2  ;;  %v373_v3 = vld [vmem:[%s436_s1 + $0x8] sm:$0xff]   ;;  %vm259_vm1 = vcmask 523264  }
   0xc   : > { %352 = vmatprep.mubr.msk.bf16.mxu0 %vm181_vm0, %v371_v0  ;;  %356 = vmatprep.mubr.msk.bf16.mxu1 %vm181_vm0, %v372_v1  ;;  %s343_s15 = sshll.u32 %s439_s10, 3  ;;  %v374_v4 = vld [vmem:[%s436_s1 + $0x18] sm:$0xff]   ;;  %s344_s23 = sshll.u32 %s439_s10, 6 }
   0xd   : > { %s138_s18 = scalar_lea.vmem %s435_s0, %s343_s15  ;;  %s143_s26 = scalar_lea.vmem %s437_s2, %s344_s23 }
   0xe   : > { %v370_v2 = vld [vmem:[%s138_s18] sm:$0xff]  }
   0xf   : > { %350 = vmatprep.subr.bf16.mxu0 %v370_v2  ;;  %360 = vmatprep.subr.bf16.mxu1 %v370_v2 }
  0x10   : > { %351 = vmatpush3.bf16.msra.mxu0 %v370_v2  ;;  %361 = vmatpush3.bf16.msra.mxu1 %v370_v2 }
  0x13   : > { %353 = vmatmul.mubr.msk.bf16.vlgmr.msra.gmra.mxu0 %vm181_vm0, %v373_v3  ;;  %357 = vmatmul.mubr.msk.bf16.vlgmr.msra.gmra.mxu1 %vm181_vm0, %v374_v4 }
  0xd3   : > { %v354_v5 = vpop.f32.mrf.mxu0  ;;  %v358_v6 = vpop.f32.mrf.mxu1 }
  0xd4   : > { %262 = vst.msk [vmem:[%s143_s26 + $0x10] sm:$0xff] %vm259_vm1, %v354_v5  ;;  %266 = vst.msk [vmem:[%s143_s26 + $0x30] sm:$0xff] %vm259_vm1, %v358_v6 }
  0xd5   : > { %v228_v7 = vpop.f32.mrf.mxu0  ;;  %v244_v8 = vpop.f32.mrf.mxu1 }
  0xd6   : > { %260 = vst.msk [vmem:[%s143_s26] sm:$0xff] %vm259_vm1, %v228_v7  ;;  %264 = vst.msk [vmem:[%s143_s26 + $0x20] sm:$0xff] %vm259_vm1, %v244_v8 }
  0xd7   : > { %v355_v9 = vpop.f32.mrf.mxu0  ;;  %v359_v10 = vpop.f32.mrf.mxu1 }
  0xd8   : > { %263 = vst.msk [vmem:[%s143_s26 + $0x18] sm:$0xff] %vm259_vm1, %v355_v9  ;;  %267 = vst.msk [vmem:[%s143_s26 + $0x38] sm:$0xff] %vm259_vm1, %v359_v10 }
  0xd9   : > { %v231_v11 = vpop.f32.mrf.mxu0  ;;  %v247_v12 = vpop.f32.mrf.mxu1 }
  0xda   : > { %261 = vst.msk [vmem:[%s143_s26 + $0x8] sm:$0xff] %vm259_vm1, %v231_v11  ;;  %265 = vst.msk [vmem:[%s143_s26 + $0x28] sm:$0xff] %vm259_vm1, %v247_v12 }
  0xdb PF: > { %s12_s9 = sadd.s32 1, %s381_s9  }
  0xdc   : > { %p9_p4 = scmp.ge.s32.totalorder %s12_s9, 5  }
  0xde   :  { %11 = sbr.rel (!%p9_p4) target bundleno = 1 (0x1), region = 58 }

// kernel: gate_dyn_unet_forward.30
= control target key start
LH: loop header
LB: loop body
LE: loop exit
PB: predicated region body
PF: predicated region fallthrough
CT: control target
= control target key end

     0   :  { %s952_s15 = smov 0   ;;  %s1044_s0 = inlined_call_operand.vmem [shape: bf16[3,216,512], index: 0, kind: input, shape index: {}]   ;;  %s1045_s1 = inlined_call_operand.vmem [shape: bf16[8,216], index: 1, kind: input, shape index: {}]   ;;  %s1046_s2 = inlined_call_operand.vmem [shape: f32[8,1], index: 2, kind: input, shape index: {}]   ;;  %s1047_s3 = inlined_call_operand.vmem [shape: f32[8,1], index: 3, kind: input, shape index: {}]   ;;  %s1048_s4 = inlined_call_operand.vmem [shape: f32[3,8,512], index: 4, kind: output, shape index: {}]  }
   0x1 LB: > { %s747_s16 = sadd.s32 4294967295, %s924_s15   ;;  %p751_p0 = scmp.ge.s32.totalorder %s924_s15, 1  ;;  %s924_s15 = sphi %s952_s15, %s14_s15  }
   0x2   : > { %p162_p1 = scmp.lt.s32.totalorder %s924_s15, 4 }
   0x4   : > { %p163_p2 = pnand %p751_p0, %p162_p1 }
   0x5   : > { %p188_p3 = scmp.lt.s32.totalorder (!%p163_p2), %s747_s16, 2 }
   0x6   : > { %166 = sbr.rel (%p163_p2) target bundleno = 591 (0x24f), region = 36 }
   0xb   : > { %v963_v0 = vld [vmem:[%s1045_s1] sm:$0xff]  ;;  %vm530_vm0 = vcmask 719872   ;;  %s1050_s16 = smov (!%p188_p3, %s747_s16), 2  ;;  %vm534_vm1 = vcmask 1043456  }
   0xc   : > { %v756_v1 = vcombine.high %v963_v0, %v963_v0  ;;  %s820_s19 = smul.u32 432, %s1050_s16  ;;  %v755_v62 = vcombine.low %v963_v0, %v963_v0  ;;  %v629_v0 = vld [vmem:[%s1046_s2] sm:$0xff]  ;;  %s819_s27 = sshll.u32 %s1050_s16, 5 }
   0xd   : > { %s197_s30 = scalar_lea.vmem %s1048_s4, %s819_s27 }
   0xe   : > { %814 = vmatprep.mubr.msk.bf16.mxu0 %vm530_vm0, %v756_v1  ;;  %816 = vmatprep.mubr.msk.bf16.mxu1 %vm530_vm0, %v756_v1  ;;  %s973_s22 = scalar_lea.vmem %s1044_s0, %s820_s19 }
   0xf   : > { %v832_v2 = vld [vmem:[%s973_s22 + $0xe4] ss:$16 sps:$4 sm:$0xff]   ;;  %v834_v3 = vld [vmem:[%s973_s22 + $0xec] ss:$16 sps:$4 sm:$0xff]   ;;  %v836_v4 = vld [vmem:[%s973_s22 + $0xe0] ss:$16 sps:$4 sm:$0xff]  }
  0x10   : > { %547 = vmatprep.subr.bf16.mxu0 %v832_v2  ;;  %v837_v5 = vld [vmem:[%s973_s22 + $0xe8] ss:$16 sps:$4 sm:$0xff]   ;;  %588 = vmatprep.subr.bf16.mxu1 %v834_v3  ;;  %v838_v6 = vld [vmem:[%s973_s22 + $0xc4] ss:$16 sps:$4 sm:$0xff]   ;;  %v840_v7 = vld [vmem:[%s973_s22 + $0xcc] ss:$16 sps:$4 sm:$0xff]  }
  0x11   : > { %548 = vmatpush1.bf16.msra.mxu0 %v836_v4  ;;  %589 = vmatpush1.bf16.msra.mxu1 %v837_v5  ;;  %v842_v8 = vld [vmem:[%s973_s22 + $0xc0] ss:$16 sps:$4 sm:$0xff]   ;;  %v843_v9 = vld [vmem:[%s973_s22 + $0xc8] ss:$16 sps:$4 sm:$0xff]   ;;  %v844_v10 = vld [vmem:[%s973_s22 + $0xa4] ss:$16 sps:$4 sm:$0xff]  }
  0x12   : > { %549 = vmatprep.subr.bf16.mxu0 %v838_v6  ;;  %590 = vmatprep.subr.bf16.mxu1 %v840_v7  ;;  %v846_v11 = vld [vmem:[%s973_s22 + $0xac] ss:$16 sps:$4 sm:$0xff]   ;;  %v848_v12 = vld [vmem:[%s973_s22 + $0xa0] ss:$16 sps:$4 sm:$0xff]   ;;  %v849_v13 = vld [vmem:[%s973_s22 + $0xa8] ss:$16 sps:$4 sm:$0xff]  }
  0x13   : > { %v850_v14 = vld [vmem:[%s973_s22 + $0x84] ss:$16 sps:$4 sm:$0xff]   ;;  %v852_v15 = vld [vmem:[%s973_s22 + $0x8c] ss:$16 sps:$4 sm:$0xff]   ;;  %v854_v16 = vld [vmem:[%s973_s22 + $0x80] ss:$16 sps:$4 sm:$0xff]  }
  0x14   : > { %v855_v17 = vld [vmem:[%s973_s22 + $0x88] ss:$16 sps:$4 sm:$0xff]   ;;  %v856_v18 = vld [vmem:[%s973_s22 + $0x64] ss:$16 sps:$4 sm:$0xff]   ;;  %v858_v19 = vld [vmem:[%s973_s22 + $0x6c] ss:$16 sps:$4 sm:$0xff]  }
  0x15   : > { %550 = vmatpush1.bf16.msra.mxu0 %v842_v8  ;;  %591 = vmatpush1.bf16.msra.mxu1 %v843_v9  ;;  %v860_v20 = vld [vmem:[%s973_s22 + $0x60] ss:$16 sps:$4 sm:$0xff]   ;;  %v861_v21 = vld [vmem:[%s973_s22 + $0x68] ss:$16 sps:$4 sm:$0xff]   ;;  %v862_v22 = vld [vmem:[%s973_s22 + $0x44] ss:$16 sps:$4 sm:$0xff]  }
  0x16   : > { %551 = vmatprep.subr.bf16.mxu0 %v844_v10  ;;  %592 = vmatprep.subr.bf16.mxu1 %v846_v11  ;;  %v864_v23 = vld [vmem:[%s973_s22 + $0x4c] ss:$16 sps:$4 sm:$0xff]   ;;  %v866_v24 = vld [vmem:[%s973_s22 + $0x40] ss:$16 sps:$4 sm:$0xff]   ;;  %v867_v25 = vld [vmem:[%s973_s22 + $0x48] ss:$16 sps:$4 sm:$0xff]  }
  0x17   : > { %v868_v26 = vld [vmem:[%s973_s22 + $0x24] ss:$16 sps:$4 sm:$0xff]   ;;  %v870_v27 = vld [vmem:[%s973_s22 + $0x2c] ss:$16 sps:$4 sm:$0xff]   ;;  %v872_v28 = vld [vmem:[%s973_s22 + $0x20] ss:$16 sps:$4 sm:$0xff]  }
  0x18   : > { %v873_v29 = vld [vmem:[%s973_s22 + $0x28] ss:$16 sps:$4 sm:$0xff]   ;;  %v874_v30 = vld [vmem:[%s973_s22 + $0x4] ss:$16 sps:$4 sm:$0xff]   ;;  %v876_v31 = vld [vmem:[%s973_s22 + $0xc] ss:$16 sps:$4 sm:$0xff]  }
  0x19   : > { %552 = vmatpush1.bf16.msra.mxu0 %v848_v12  ;;  %593 = vmatpush1.bf16.msra.mxu1 %v849_v13  ;;  %v251_v32 = vld [vmem:[%s973_s22 + $0x1a0] sm:$0xff]  ;;  %v252_v33 = vld [vmem:[%s973_s22 + $0x1a8] sm:$0xff]  ;;  %v926_v11 = vmov 0  }
  0x1a   : > { %553 = vmatprep.subr.bf16.mxu0 %v850_v14  ;;  %594 = vmatprep.subr.bf16.mxu1 %v852_v15  ;;  %v878_v34 = vld [vmem:[%s973_s22] ss:$16 sps:$4 sm:$0xff]   ;;  %v879_v35 = vld [vmem:[%s973_s22 + $0x8] ss:$16 sps:$4 sm:$0xff]   ;;  %v810_v36 = vcombine.high %v251_v32, %v251_v32  ;;  %v812_v37 = vcombine.high %v252_v33, %v252_v33  ;;  %v809_v38 = vcombine.low %v251_v32, %v251_v32  ;;  %v884_v40 = vld [vmem:[%s973_s22 + $0x184] ss:$16 sps:$4 sm:$0xff]  }
  0x1b   : > { %v811_v39 = vcombine.low %v252_v33, %v252_v33  ;;  %v886_v43 = vld [vmem:[%s973_s22 + $0x18c] ss:$16 sps:$4 sm:$0xff]   ;;  %v888_v44 = vld [vmem:[%s973_s22 + $0x180] ss:$16 sps:$4 sm:$0xff]   ;;  %v889_v45 = vld [vmem:[%s973_s22 + $0x188] ss:$16 sps:$4 sm:$0xff]   ;;  %830 = vset.pattern.permute.xlu1 %v926_v11  ;;  %831 = vset.pattern.permute.xlu0 %v926_v11 }
  0x1c   : > { %v536_v41 = vsel %vm534_vm1, %v809_v38, 0  ;;  %v890_v46 = vld [vmem:[%s973_s22 + $0x164] ss:$16 sps:$4 sm:$0xff]   ;;  %v892_v47 = vld [vmem:[%s973_s22 + $0x16c] ss:$16 sps:$4 sm:$0xff]   ;;  %660 = vperm.xlu1 %830, %v629_v0  }
  0x1d   : > { %554 = vmatpush1.bf16.msra.mxu0 %v854_v16  ;;  %595 = vmatpush1.bf16.msra.mxu1 %v855_v17  ;;  %v542_v42 = vsel %vm534_vm1, %v811_v39, 0  ;;  %v894_v48 = vld [vmem:[%s973_s22 + $0x160] ss:$16 sps:$4 sm:$0xff]   ;;  %v895_v49 = vld [vmem:[%s973_s22 + $0x168] ss:$16 sps:$4 sm:$0xff]  }
  0x1e   : > { %555 = vmatprep.subr.bf16.mxu0 %v856_v18  ;;  %596 = vmatprep.subr.bf16.mxu1 %v858_v19  ;;  %v896_v50 = vld [vmem:[%s973_s22 + $0x144] ss:$16 sps:$4 sm:$0xff]   ;;  %v898_v51 = vld [vmem:[%s973_s22 + $0x14c] ss:$16 sps:$4 sm:$0xff]   ;;  %v900_v52 = vld [vmem:[%s973_s22 + $0x140] ss:$16 sps:$4 sm:$0xff]  }
  0x1f   : > { %v901_v53 = vld [vmem:[%s973_s22 + $0x148] ss:$16 sps:$4 sm:$0xff]   ;;  %v902_v54 = vld [vmem:[%s973_s22 + $0x124] ss:$16 sps:$4 sm:$0xff]   ;;  %v904_v55 = vld [vmem:[%s973_s22 + $0x12c] ss:$16 sps:$4 sm:$0xff]  }
  0x20   : > { %v906_v56 = vld [vmem:[%s973_s22 + $0x120] ss:$16 sps:$4 sm:$0xff]   ;;  %v907_v57 = vld [vmem:[%s973_s22 + $0x128] ss:$16 sps:$4 sm:$0xff]   ;;  %v908_v58 = vld [vmem:[%s973_s22 + $0x104] ss:$16 sps:$4 sm:$0xff]  }
  0x21   : > { %556 = vmatpush1.bf16.msra.mxu0 %v860_v20  ;;  %597 = vmatpush1.bf16.msra.mxu1 %v861_v21  ;;  %v910_v59 = vld [vmem:[%s973_s22 + $0x10c] ss:$16 sps:$4 sm:$0xff]   ;;  %v912_v60 = vld [vmem:[%s973_s22 + $0x100] ss:$16 sps:$4 sm:$0xff]   ;;  %v913_v61 = vld [vmem:[%s973_s22 + $0x108] ss:$16 sps:$4 sm:$0xff]  }
  0x22   : > { %557 = vmatprep.subr.bf16.mxu0 %v862_v22  ;;  %598 = vmatprep.subr.bf16.mxu1 %v864_v23  ;;  %v630_v12 = vld [vmem:[%s1047_s3] sm:$0xff] }
  0x23   : > { %669 = vperm.xlu1 %830, %v630_v12  }
  0x25   : > { %558 = vmatpush1.bf16.msra.mxu0 %v866_v24  ;;  %599 = vmatpush1.bf16.msra.mxu1 %v867_v25 }
  0x26   : > { %559 = vmatprep.subr.bf16.mxu0 %v868_v26  ;;  %600 = vmatprep.subr.bf16.mxu1 %v870_v27 }
  0x29   : > { %560 = vmatpush1.bf16.msra.mxu0 %v872_v28  ;;  %601 = vmatpush1.bf16.msra.mxu1 %v873_v29 }
  0x2a   : > { %561 = vmatprep.subr.bf16.mxu0 %v874_v30  ;;  %602 = vmatprep.subr.bf16.mxu1 %v876_v31 }
  0x2d   : > { %562 = vmatpush1.bf16.msra.mxu0 %v878_v34  ;;  %603 = vmatpush1.bf16.msra.mxu1 %v879_v35 }
  0x2e   : > { %813 = vmatprep.subr.msk.bf16.mxu0 %vm534_vm1, %v810_v36  ;;  %815 = vmatprep.subr.msk.bf16.mxu1 %vm534_vm1, %v812_v37 }
  0x31   : > { %568 = vmatpush2.bf16.msra.mxu0 %v536_v41  ;;  %609 = vmatpush2.bf16.msra.mxu1 %v542_v42 }
  0x32   : > { %569 = vmatprep.subr.bf16.mxu0 %v884_v40  ;;  %610 = vmatprep.subr.bf16.mxu1 %v886_v43 }
  0x35   : > { %570 = vmatpush2.bf16.msra.mxu0 %v888_v44  ;;  %611 = vmatpush2.bf16.msra.mxu1 %v889_v45 }
  0x36   : > { %571 = vmatprep.subr.bf16.mxu0 %v890_v46  ;;  %612 = vmatprep.subr.bf16.mxu1 %v892_v47 }
  0x39   : > { %572 = vmatpush2.bf16.msra.mxu0 %v894_v48  ;;  %613 = vmatpush2.bf16.msra.mxu1 %v895_v49 }
  0x3a   : > { %573 = vmatprep.subr.bf16.mxu0 %v896_v50  ;;  %614 = vmatprep.subr.bf16.mxu1 %v898_v51 }
  0x3d   : > { %574 = vmatpush2.bf16.msra.mxu0 %v900_v52  ;;  %615 = vmatpush2.bf16.msra.mxu1 %v901_v53 }
  0x3e   : > { %575 = vmatprep.subr.bf16.mxu0 %v902_v54  ;;  %616 = vmatprep.subr.bf16.mxu1 %v904_v55 }
  0x41   : > { %576 = vmatpush2.bf16.msra.mxu0 %v906_v56  ;;  %617 = vmatpush2.bf16.msra.mxu1 %v907_v57 }
  0x42   : > { %577 = vmatprep.subr.bf16.mxu0 %v908_v58  ;;  %618 = vmatprep.subr.bf16.mxu1 %v910_v59 }
  0x45   : > { %578 = vmatpush2.bf16.msra.mxu0 %v912_v60  ;;  %619 = vmatpush2.bf16.msra.mxu1 %v913_v61 }
  0x48   : > { %580 = vmatmul.mubr.bf16.vlgmr.msra.gmra.mxu0 %v755_v62  ;;  %621 = vmatmul.mubr.bf16.vlgmr.msra.gmra.mxu1 %v755_v62 }
  0x97   : > { %v661_v29 = vpop.permute.xlu1 %660 }
  0x9e   : > { %v670_v39 = vpop.permute.xlu1 %669 }
 0x108   : > { %v581_v63 = vpop.f32.mrf.mxu0  ;;  %v622_v1 = vpop.f32.mrf.mxu1 }
 0x10a   : > { %v583_v2 = vpop.f32.mrf.mxu0  ;;  %v624_v3 = vpop.f32.mrf.mxu1 }
 0x10b   : > { %v631_v4 = vadd.f32 %v583_v2, %v581_v63 }
 0x10c   : > { %v585_v5 = vpop.f32.mrf.mxu0  ;;  %v626_v6 = vpop.f32.mrf.mxu1 }
 0x10d   : > { %v632_v7 = vadd.f32 %v631_v4, %v622_v1 }
 0x10e   : > { %v586_v8 = vpop.f32.mrf.mxu0  ;;  %v627_v9 = vpop.f32.mrf.mxu1 }
 0x10f   : > { %v633_v10 = vadd.f32 %v632_v7, %v624_v3 }
 0x111   : > { %634 = vadd.xlane.f32.xlu0 %v633_v10 }
 0x19a   : > { %v635_v13 = vpop.xlane.xlu0 %634 }
 0x19b   : > { %v637_v14 = vmul.f32 0.001953125, %v635_v13 }
 0x19d   : > { %v638_v15 = vsub.f32 %v581_v63, %v637_v14  ;;  %v639_v16 = vsub.f32 %v583_v2, %v637_v14  ;;  %v640_v17 = vsub.f32 %v622_v1, %v637_v14  ;;  %v641_v18 = vsub.f32 %v624_v3, %v637_v14 }
 0x19f   : > { %v642_v19 = vmul.f32 %v638_v15, %v638_v15  ;;  %v643_v20 = vmul.f32 %v639_v16, %v639_v16  ;;  %v644_v21 = vmul.f32 %v640_v17, %v640_v17  ;;  %v645_v23 = vmul.f32 %v641_v18, %v641_v18 }
 0x1a1   : > { %v646_v22 = vadd.f32 %v643_v20, %v642_v19 }
 0x1a3   : > { %v647_v24 = vadd.f32 %v646_v22, %v644_v21 }
 0x1a5   : > { %v648_v25 = vadd.f32 %v647_v24, %v645_v23 }
 0x1a7   : > { %649 = vadd.xlane.f32.xlu0 %v648_v25 }
 0x230   : > { %v650_v26 = vpop.xlane.xlu0 %649 }
 0x231   : > { %v651_v27 = vmul.f32 0.001953125, %v650_v26 }
 0x233   : > { %v652_v28 = vadd.f32 1e-05, %v651_v27 }
 0x235   : > { %916 = vrsqrt.f32 %v652_v28 }
 0x242   : > { %v917_v30 = vpop.eup %916 }
 0x243   : > { %v654_v31 = vmul.f32 %v917_v30, %v638_v15  ;;  %v655_v32 = vmul.f32 %v917_v30, %v639_v16  ;;  %v656_v33 = vmul.f32 %v917_v30, %v640_v17  ;;  %v657_v34 = vmul.f32 %v917_v30, %v641_v18 }
 0x245   : > { %v663_v35 = vmul.f32 %v661_v29, %v654_v31  ;;  %v664_v36 = vmul.f32 %v661_v29, %v655_v32  ;;  %v665_v37 = vmul.f32 %v661_v29, %v656_v33  ;;  %v666_v38 = vmul.f32 %v661_v29, %v657_v34 }
 0x247   : > { %v672_v40 = vadd.f32 %v670_v39, %v663_v35  ;;  %v673_v41 = vadd.f32 %v670_v39, %v664_v36  ;;  %v674_v42 = vadd.f32 %v670_v39, %v665_v37  ;;  %v675_v43 = vadd.f32 %v670_v39, %v666_v38 }
 0x249   : > { %vm676_vm2 = vcmp.gt.f32.partialorder %v672_v40, 0.0  ;;  %vm677_vm3 = vcmp.gt.f32.partialorder %v673_v41, 0.0  ;;  %vm678_vm4 = vcmp.gt.f32.partialorder %v674_v42, 0.0  ;;  %vm679_vm5 = vcmp.gt.f32.partialorder %v675_v43, 0.0 }
 0x24a   : > { %v680_v44 = vmul.f32 0.01, %v672_v40  ;;  %v681_v45 = vmul.f32 0.01, %v673_v41  ;;  %v682_v46 = vmul.f32 0.01, %v674_v42 }
 0x24b   : > { %v683_v47 = vmul.f32 0.01, %v675_v43 }
 0x24c   : > { %v684_v48 = vsel %vm676_vm2, %v672_v40, %v680_v44  ;;  %v685_v49 = vsel %vm677_vm3, %v673_v41, %v681_v45  ;;  %v686_v50 = vsel %vm678_vm4, %v674_v42, %v682_v46 }
 0x24d   : > { %v687_v51 = vsel %vm679_vm5, %v675_v43, %v683_v47  ;;  %688 = vst [vmem:[%s197_s30] sm:$0xff] %v684_v48  ;;  %689 = vst [vmem:[%s197_s30 + $0x8] sm:$0xff] %v685_v49 }
 0x24e   : > { %690 = vst [vmem:[%s197_s30 + $0x10] sm:$0xff] %v686_v50  ;;  %691 = vst [vmem:[%s197_s30 + $0x18] sm:$0xff] %v687_v51 }
 0x24f PF: > { %s14_s15 = sadd.s32 1, %s924_s15  }
 0x250   : > { %p11_p4 = scmp.ge.s32.totalorder %s14_s15, 5  }
 0x252   :  { %13 = sbr.rel (!%p11_p4) target bundleno = 1 (0x1), region = 66 }

// kernel: gate_dyn_unet_forward.31
= control target key start
LH: loop header
LB: loop body
LE: loop exit
PB: predicated region body
PF: predicated region fallthrough
CT: control target
= control target key end

     0   :  { %s434_s12 = smov 0   ;;  %s461_s0 = inlined_call_operand.vmem [shape: bf16[3,8,512], index: 0, kind: input, shape index: {}]   ;;  %s462_s1 = inlined_call_operand.vmem [shape: bf16[2,8], index: 1, kind: input, shape index: {}]   ;;  %s463_s2 = inlined_call_operand.vmem [shape: f32[2,1], index: 2, kind: input, shape index: {}]   ;;  %s464_s3 = inlined_call_operand.vmem [shape: f32[3,2,512], index: 3, kind: output, shape index: {}]  }
   0x1 LB: > { %s368_s13 = sadd.s32 4294967295, %s410_s12   ;;  %p372_p0 = scmp.ge.s32.totalorder %s410_s12, 1  ;;  %s410_s12 = sphi %s434_s12, %s13_s12  }
   0x2   : > { %p137_p1 = scmp.lt.s32.totalorder %s410_s12, 4 }
   0x4   : > { %p138_p2 = pnand %p372_p0, %p137_p1 }
   0x5   : > { %p161_p3 = scmp.lt.s32.totalorder (!%p138_p2), %s368_s13, 2 }
   0x6   : > { %141 = sbr.rel (%p138_p2) target bundleno = 225 (0xe1), region = 32 }
   0xb   : > { %v412_v0 = vmov 0   ;;  %v175_v1 = vld [vmem:[%s463_s2] sm:$0x3]  ;;  %s466_s13 = smov (!%p161_p3, %s368_s13), 2  ;;  %vm195_vm0 = vcmask 1043456   ;;  %vm191_vm1 = vcmask 64512   ;;  %v299_v13 = vlaneseq }
   0xc   : > { %240 = vmatprep.mubr.bf16.mxu0 %v412_v0  ;;  %281 = vmatprep.mubr.bf16.mxu1 %v412_v0  ;;  %s387_s16 = sshll.u32 %s466_s13, 4  ;;  %v174_v10 = vld [vmem:[%s462_s1] sm:$0x1]  ;;  %v413_v11 = vmov 1983009808   ;;  %s388_s22 = sshll.u32 %s466_s13, 3 }
   0xd   : > { %399 = vset.pattern.permute.xlu0 %v412_v0  ;;  %s165_s19 = scalar_lea.vmem %s461_s0, %s387_s16  ;;  %v297_v12 = vunpack.c.l.s4 %v413_v11  ;;  %v300_v15 = vshrl.u32 %v299_v13, 7  ;;  %s170_s25 = scalar_lea.vmem %s464_s3, %s388_s22 }
   0xe   : > { %178 = vperm.xlu0 %399, %v175_v1   ;;  %v172_v2 = vld [vmem:[%s165_s19] sm:$0xff]  ;;  %v173_v3 = vld [vmem:[%s165_s19 + $0x8] sm:$0xff] }
   0xf   : > { %v378_v4 = vcombine.high %v172_v2, %v172_v2  ;;  %v380_v5 = vcombine.high %v173_v3, %v173_v3  ;;  %v377_v6 = vcombine.low %v172_v2, %v172_v2  ;;  %v379_v7 = vcombine.low %v173_v3, %v173_v3 }
  0x10   : > { %v298_v14 = vunpack.c.0.s8 %v297_v12 }
  0x11   : > { %381 = vmatprep.subr.msk.bf16.mxu0 %vm195_vm0, %v378_v4  ;;  %383 = vmatprep.subr.msk.bf16.mxu1 %vm195_vm0, %v380_v5  ;;  %v197_v8 = vsel %vm195_vm0, %v377_v6, 0  ;;  %v203_v9 = vsel %vm195_vm0, %v379_v7, 0 }
  0x12   : > { %223 = vmatpush1.bf16.msra.mxu0 %v197_v8  ;;  %264 = vmatpush1.bf16.msra.mxu1 %v203_v9  ;;  %v301_v20 = vsub.s32 %v298_v14, %v300_v15 }
  0x15   : > { %382 = vmatmul.mubr.msk.bf16.vlgmr.msra.gmra.mxu0 %vm191_vm1, %v174_v10  ;;  %384 = vmatmul.mubr.msk.bf16.vlgmr.msra.gmra.mxu1 %vm191_vm1, %v174_v10 }
  0x89   : > { %v179_v16 = vpop.permute.xlu0 %178 }
  0xd5   : > { %v242_v17 = vpop.f32.mrf.mxu0  ;;  %v283_v18 = vpop.f32.mrf.mxu1 }
  0xd6   : > { %v243_v22 = vadd.f32 %v242_v17, %v179_v16  ;;  %v284_v23 = vadd.f32 %v283_v18, %v179_v16 }
  0xd7   : > { %v244_v19 = vpop.f32.mrf.mxu0  ;;  %v285_v21 = vpop.f32.mrf.mxu1 }
  0xd8   : > { %v245_v24 = vadd.f32 %v244_v19, %v179_v16  ;;  %v286_v25 = vadd.f32 %v285_v21, %v179_v16 }
  0xd9   : > { %v246_v26 = vpop.f32.mrf.mxu0  ;;  %v287_v27 = vpop.f32.mrf.mxu1 }
  0xda   : > { %v294_v28 = vcombine.low %v243_v22, %v245_v24  ;;  %v295_v29 = vcombine.low %v284_v23, %v286_v25 }
  0xdb   : > { %v247_v30 = vpop.f32.mrf.mxu0  ;;  %v288_v31 = vpop.f32.mrf.mxu1 }
  0xdc   : > { %v302_v32 = vrot.slane %v294_v28, %v301_v20  ;;  %v309_v33 = vrot.slane %v295_v29, %v301_v20 }
  0xde   : > { %v310_v34 = vcombine.low %v302_v32, %v309_v33 }
  0xe0   : > { %312 = vst [vmem:[%s170_s25] sm:$0xff] %v310_v34 }
  0xe1 PF: > { %s13_s12 = sadd.s32 1, %s410_s12  }
  0xe2   : > { %p10_p4 = scmp.ge.s32.totalorder %s13_s12, 5  }
  0xe4   :  { %12 = sbr.rel (!%p10_p4) target bundleno = 1 (0x1), region = 62 }

// kernel: gate_dyn_unet_forward.29
= control target key start
LH: loop header
LB: loop body
LE: loop exit
PB: predicated region body
PF: predicated region fallthrough
CT: control target
= control target key end

     0   :  { %s1623_s21 = smov 0   ;;  %s1799_s0 = inlined_call_operand.vmem [shape: bf16[3,216,512], index: 0, kind: input, shape index: {}]   ;;  %s1800_s1 = inlined_call_operand.vmem [shape: bf16[8,216], index: 1, kind: input, shape index: {}]   ;;  %s1801_s2 = inlined_call_operand.vmem [shape: bf16[3,216,512], index: 2, kind: input, shape index: {}]   ;;  %s1802_s3 = inlined_call_operand.vmem [shape: bf16[8,216], index: 3, kind: input, shape index: {}]   ;;  %s1803_s4 = inlined_call_operand.vmem [shape: f32[8,1], index: 4, kind: input, shape index: {}]   ;;  %s1804_s5 = inlined_call_operand.vmem [shape: f32[8,1], index: 5, kind: input, shape index: {}]   ;;  %s1805_s6 = inlined_call_operand.vmem [shape: f32[3,8,512], index: 6, kind: output, shape index: {}]  }
   0x1 LB: > { %s1261_s22 = sadd.s32 4294967295, %s1585_s21   ;;  %p1265_p0 = scmp.ge.s32.totalorder %s1585_s21, 1  ;;  %s1585_s21 = sphi %s1623_s21, %s16_s21  }
   0x2   : > { %p222_p1 = scmp.lt.s32.totalorder %s1585_s21, 4 }
   0x4   : > { %p223_p2 = pnand %p1265_p0, %p222_p1 }
   0x5   : > { %p257_p3 = scmp.lt.s32.totalorder (!%p223_p2), %s1261_s22, 2 }
   0x6   : > { %226 = sbr.rel (%p223_p2) target bundleno = 649 (0x289), region = 44 }
   0xb   : > { %v1634_v0 = vld [vmem:[%s1802_s3] sm:$0xff]  ;;  %vm659_vm0 = vcmask 719872   ;;  %s1807_s22 = smov (!%p257_p3, %s1261_s22), 2  ;;  %vm663_vm1 = vcmask 1043456  }
   0xc   : > { %v1271_v1 = vcombine.high %v1634_v0, %v1634_v0  ;;  %s1397_s25 = smul.u32 432, %s1807_s22  ;;  %s1396_s14 = sshll.u32 %s1807_s22, 5 }
   0xd   : > { %s271_s17 = scalar_lea.vmem %s1805_s6, %s1396_s14 }
   0xe   : > { %1329 = vmatprep.mubr.msk.bf16.mxu0 %vm659_vm0, %v1271_v1  ;;  %1331 = vmatprep.mubr.msk.bf16.mxu1 %vm659_vm0, %v1271_v1  ;;  %s1648_s28 = scalar_lea.vmem %s1801_s2, %s1397_s25  ;;  %s1695_s7 = scalar_lea.vmem %s1799_s0, %s1397_s25  ;;  %v1270_v1 = vcombine.low %v1634_v0, %v1634_v0 }
   0xf   : > { %v1409_v2 = vld [vmem:[%s1648_s28 + $0xe4] ss:$16 sps:$4 sm:$0xff]   ;;  %v1411_v3 = vld [vmem:[%s1648_s28 + $0xec] ss:$16 sps:$4 sm:$0xff]   ;;  %v1413_v4 = vld [vmem:[%s1648_s28 + $0xe0] ss:$16 sps:$4 sm:$0xff]  }
  0x10   : > { %676 = vmatprep.subr.bf16.mxu0 %v1409_v2  ;;  %v1414_v5 = vld [vmem:[%s1648_s28 + $0xe8] ss:$16 sps:$4 sm:$0xff]   ;;  %717 = vmatprep.subr.bf16.mxu1 %v1411_v3  ;;  %v1415_v6 = vld [vmem:[%s1648_s28 + $0xc4] ss:$16 sps:$4 sm:$0xff]   ;;  %v1417_v7 = vld [vmem:[%s1648_s28 + $0xcc] ss:$16 sps:$4 sm:$0xff]  }
  0x11   : > { %677 = vmatpush1.bf16.msra.mxu0 %v1413_v4  ;;  %718 = vmatpush1.bf16.msra.mxu1 %v1414_v5  ;;  %v1419_v8 = vld [vmem:[%s1648_s28 + $0xc0] ss:$16 sps:$4 sm:$0xff]   ;;  %v1420_v9 = vld [vmem:[%s1648_s28 + $0xc8] ss:$16 sps:$4 sm:$0xff]   ;;  %v1421_v10 = vld [vmem:[%s1648_s28 + $0xa4] ss:$16 sps:$4 sm:$0xff]  }
  0x12   : > { %678 = vmatprep.subr.bf16.mxu0 %v1415_v6  ;;  %719 = vmatprep.subr.bf16.mxu1 %v1417_v7  ;;  %v1423_v11 = vld [vmem:[%s1648_s28 + $0xac] ss:$16 sps:$4 sm:$0xff]   ;;  %v1425_v12 = vld [vmem:[%s1648_s28 + $0xa0] ss:$16 sps:$4 sm:$0xff]   ;;  %v1426_v13 = vld [vmem:[%s1648_s28 + $0xa8] ss:$16 sps:$4 sm:$0xff]  }
  0x13   : > { %v1427_v14 = vld [vmem:[%s1648_s28 + $0x84] ss:$16 sps:$4 sm:$0xff]   ;;  %v1429_v15 = vld [vmem:[%s1648_s28 + $0x8c] ss:$16 sps:$4 sm:$0xff]   ;;  %v1431_v16 = vld [vmem:[%s1648_s28 + $0x80] ss:$16 sps:$4 sm:$0xff]  }
  0x14   : > { %v1432_v17 = vld [vmem:[%s1648_s28 + $0x88] ss:$16 sps:$4 sm:$0xff]   ;;  %v1433_v18 = vld [vmem:[%s1648_s28 + $0x64] ss:$16 sps:$4 sm:$0xff]   ;;  %v1435_v19 = vld [vmem:[%s1648_s28 + $0x6c] ss:$16 sps:$4 sm:$0xff]  }
  0x15   : > { %679 = vmatpush1.bf16.msra.mxu0 %v1419_v8  ;;  %720 = vmatpush1.bf16.msra.mxu1 %v1420_v9  ;;  %v1437_v20 = vld [vmem:[%s1648_s28 + $0x60] ss:$16 sps:$4 sm:$0xff]   ;;  %v1438_v21 = vld [vmem:[%s1648_s28 + $0x68] ss:$16 sps:$4 sm:$0xff]   ;;  %v1439_v22 = vld [vmem:[%s1648_s28 + $0x44] ss:$16 sps:$4 sm:$0xff]  }
  0x16   : > { %680 = vmatprep.subr.bf16.mxu0 %v1421_v10  ;;  %721 = vmatprep.subr.bf16.mxu1 %v1423_v11  ;;  %v1441_v23 = vld [vmem:[%s1648_s28 + $0x4c] ss:$16 sps:$4 sm:$0xff]   ;;  %v1443_v24 = vld [vmem:[%s1648_s28 + $0x40] ss:$16 sps:$4 sm:$0xff]   ;;  %v1444_v25 = vld [vmem:[%s1648_s28 + $0x48] ss:$16 sps:$4 sm:$0xff]  }
  0x17   : > { %v1445_v26 = vld [vmem:[%s1648_s28 + $0x24] ss:$16 sps:$4 sm:$0xff]   ;;  %v1447_v27 = vld [vmem:[%s1648_s28 + $0x2c] ss:$16 sps:$4 sm:$0xff]   ;;  %v1449_v28 = vld [vmem:[%s1648_s28 + $0x20] ss:$16 sps:$4 sm:$0xff]  }
  0x18   : > { %v1450_v29 = vld [vmem:[%s1648_s28 + $0x28] ss:$16 sps:$4 sm:$0xff]   ;;  %v1451_v30 = vld [vmem:[%s1648_s28 + $0x4] ss:$16 sps:$4 sm:$0xff]   ;;  %v1453_v31 = vld [vmem:[%s1648_s28 + $0xc] ss:$16 sps:$4 sm:$0xff]  }
  0x19   : > { %681 = vmatpush1.bf16.msra.mxu0 %v1425_v12  ;;  %722 = vmatpush1.bf16.msra.mxu1 %v1426_v13  ;;  %v380_v32 = vld [vmem:[%s1648_s28 + $0x1a0] sm:$0xff]  ;;  %v381_v33 = vld [vmem:[%s1648_s28 + $0x1a8] sm:$0xff] }
  0x1a   : > { %682 = vmatprep.subr.bf16.mxu0 %v1427_v14  ;;  %723 = vmatprep.subr.bf16.mxu1 %v1429_v15  ;;  %v1455_v34 = vld [vmem:[%s1648_s28] ss:$16 sps:$4 sm:$0xff]   ;;  %v1456_v35 = vld [vmem:[%s1648_s28 + $0x8] ss:$16 sps:$4 sm:$0xff]   ;;  %v1325_v36 = vcombine.high %v380_v32, %v380_v32  ;;  %v1327_v37 = vcombine.high %v381_v33, %v381_v33  ;;  %v1324_v38 = vcombine.low %v380_v32, %v380_v32  ;;  %v1461_v40 = vld [vmem:[%s1648_s28 + $0x184] ss:$16 sps:$4 sm:$0xff]  }
  0x1b   : > { %v1326_v39 = vcombine.low %v381_v33, %v381_v33  ;;  %v1463_v43 = vld [vmem:[%s1648_s28 + $0x18c] ss:$16 sps:$4 sm:$0xff]   ;;  %v1465_v44 = vld [vmem:[%s1648_s28 + $0x180] ss:$16 sps:$4 sm:$0xff]   ;;  %v1466_v45 = vld [vmem:[%s1648_s28 + $0x188] ss:$16 sps:$4 sm:$0xff]  }
  0x1c   : > { %v665_v41 = vsel %vm663_vm1, %v1324_v38, 0  ;;  %v1467_v46 = vld [vmem:[%s1648_s28 + $0x164] ss:$16 sps:$4 sm:$0xff]   ;;  %v1469_v47 = vld [vmem:[%s1648_s28 + $0x16c] ss:$16 sps:$4 sm:$0xff]  }
  0x1d   : > { %683 = vmatpush1.bf16.msra.mxu0 %v1431_v16  ;;  %724 = vmatpush1.bf16.msra.mxu1 %v1432_v17  ;;  %v671_v42 = vsel %vm663_vm1, %v1326_v39, 0  ;;  %v1471_v48 = vld [vmem:[%s1648_s28 + $0x160] ss:$16 sps:$4 sm:$0xff]   ;;  %v1472_v49 = vld [vmem:[%s1648_s28 + $0x168] ss:$16 sps:$4 sm:$0xff]  }
  0x1e   : > { %684 = vmatprep.subr.bf16.mxu0 %v1433_v18  ;;  %725 = vmatprep.subr.bf16.mxu1 %v1435_v19  ;;  %v1473_v50 = vld [vmem:[%s1648_s28 + $0x144] ss:$16 sps:$4 sm:$0xff]   ;;  %v1475_v51 = vld [vmem:[%s1648_s28 + $0x14c] ss:$16 sps:$4 sm:$0xff]   ;;  %v1477_v52 = vld [vmem:[%s1648_s28 + $0x140] ss:$16 sps:$4 sm:$0xff]  }
  0x1f   : > { %v1478_v53 = vld [vmem:[%s1648_s28 + $0x148] ss:$16 sps:$4 sm:$0xff]   ;;  %v1479_v54 = vld [vmem:[%s1648_s28 + $0x124] ss:$16 sps:$4 sm:$0xff]   ;;  %v1481_v55 = vld [vmem:[%s1648_s28 + $0x12c] ss:$16 sps:$4 sm:$0xff]  }
  0x20   : > { %v1483_v56 = vld [vmem:[%s1648_s28 + $0x120] ss:$16 sps:$4 sm:$0xff]   ;;  %v1484_v57 = vld [vmem:[%s1648_s28 + $0x128] ss:$16 sps:$4 sm:$0xff]   ;;  %v1485_v58 = vld [vmem:[%s1648_s28 + $0x104] ss:$16 sps:$4 sm:$0xff]  }
  0x21   : > { %685 = vmatpush1.bf16.msra.mxu0 %v1437_v20  ;;  %726 = vmatpush1.bf16.msra.mxu1 %v1438_v21  ;;  %v1487_v59 = vld [vmem:[%s1648_s28 + $0x10c] ss:$16 sps:$4 sm:$0xff]   ;;  %v1489_v60 = vld [vmem:[%s1648_s28 + $0x100] ss:$16 sps:$4 sm:$0xff]   ;;  %v1490_v61 = vld [vmem:[%s1648_s28 + $0x108] ss:$16 sps:$4 sm:$0xff]  }
  0x22   : > { %686 = vmatprep.subr.bf16.mxu0 %v1439_v22  ;;  %727 = vmatprep.subr.bf16.mxu1 %v1441_v23  ;;  %v1495_v62 = vld [vmem:[%s1695_s7 + $0xe4] ss:$16 sps:$4 sm:$0xff]   ;;  %v1498_v63 = vld [vmem:[%s1695_s7 + $0xec] ss:$16 sps:$4 sm:$0xff]   ;;  %v1493_v3 = vld [vmem:[%s1695_s7 + $0xe0] ss:$16 sps:$4 sm:$0xff]  }
  0x23   : > { %v1722_v2 = vld [vmem:[%s1800_s1] sm:$0xff]  ;;  %v1496_v4 = vld [vmem:[%s1695_s7 + $0xe8] ss:$16 sps:$4 sm:$0xff]   ;;  %v1504_v6 = vld [vmem:[%s1695_s7 + $0xcc] ss:$16 sps:$4 sm:$0xff]  }
  0x24   : > { %v1501_v5 = vld [vmem:[%s1695_s7 + $0xc4] ss:$16 sps:$4 sm:$0xff]   ;;  %v1333_v0 = vcombine.high %v1722_v2, %v1722_v2  ;;  %v1499_v7 = vld [vmem:[%s1695_s7 + $0xc0] ss:$16 sps:$4 sm:$0xff]   ;;  %v1502_v8 = vld [vmem:[%s1695_s7 + $0xc8] ss:$16 sps:$4 sm:$0xff]  }
  0x25   : > { %687 = vmatpush1.bf16.msra.mxu0 %v1443_v24  ;;  %728 = vmatpush1.bf16.msra.mxu1 %v1444_v25  ;;  %v1507_v9 = vld [vmem:[%s1695_s7 + $0xa4] ss:$16 sps:$4 sm:$0xff]   ;;  %v1510_v10 = vld [vmem:[%s1695_s7 + $0xac] ss:$16 sps:$4 sm:$0xff]   ;;  %v1505_v11 = vld [vmem:[%s1695_s7 + $0xa0] ss:$16 sps:$4 sm:$0xff]  }
  0x26   : > { %688 = vmatprep.subr.bf16.mxu0 %v1445_v26  ;;  %729 = vmatprep.subr.bf16.mxu1 %v1447_v27  ;;  %v1508_v12 = vld [vmem:[%s1695_s7 + $0xa8] ss:$16 sps:$4 sm:$0xff]   ;;  %v1513_v13 = vld [vmem:[%s1695_s7 + $0x84] ss:$16 sps:$4 sm:$0xff]   ;;  %v1516_v14 = vld [vmem:[%s1695_s7 + $0x8c] ss:$16 sps:$4 sm:$0xff]  }
  0x27   : > { %v1511_v15 = vld [vmem:[%s1695_s7 + $0x80] ss:$16 sps:$4 sm:$0xff]   ;;  %v1514_v16 = vld [vmem:[%s1695_s7 + $0x88] ss:$16 sps:$4 sm:$0xff]   ;;  %v1519_v17 = vld [vmem:[%s1695_s7 + $0x64] ss:$16 sps:$4 sm:$0xff]  }
  0x28   : > { %v1522_v18 = vld [vmem:[%s1695_s7 + $0x6c] ss:$16 sps:$4 sm:$0xff]   ;;  %v1517_v19 = vld [vmem:[%s1695_s7 + $0x60] ss:$16 sps:$4 sm:$0xff]   ;;  %v1520_v20 = vld [vmem:[%s1695_s7 + $0x68] ss:$16 sps:$4 sm:$0xff]  }
  0x29   : > { %689 = vmatpush1.bf16.msra.mxu0 %v1449_v28  ;;  %730 = vmatpush1.bf16.msra.mxu1 %v1450_v29  ;;  %v1525_v21 = vld [vmem:[%s1695_s7 + $0x44] ss:$16 sps:$4 sm:$0xff]   ;;  %v1528_v22 = vld [vmem:[%s1695_s7 + $0x4c] ss:$16 sps:$4 sm:$0xff]   ;;  %v1523_v23 = vld [vmem:[%s1695_s7 + $0x40] ss:$16 sps:$4 sm:$0xff]  }
  0x2a   : > { %690 = vmatprep.subr.bf16.mxu0 %v1451_v30  ;;  %731 = vmatprep.subr.bf16.mxu1 %v1453_v31  ;;  %v1526_v24 = vld [vmem:[%s1695_s7 + $0x48] ss:$16 sps:$4 sm:$0xff]   ;;  %v1531_v25 = vld [vmem:[%s1695_s7 + $0x24] ss:$16 sps:$4 sm:$0xff]   ;;  %v1534_v26 = vld [vmem:[%s1695_s7 + $0x2c] ss:$16 sps:$4 sm:$0xff]  }
  0x2b   : > { %v1529_v27 = vld [vmem:[%s1695_s7 + $0x20] ss:$16 sps:$4 sm:$0xff]   ;;  %v1532_v28 = vld [vmem:[%s1695_s7 + $0x28] ss:$16 sps:$4 sm:$0xff]   ;;  %v1537_v29 = vld [vmem:[%s1695_s7 + $0x4] ss:$16 sps:$4 sm:$0xff]  }
  0x2c   : > { %v1540_v30 = vld [vmem:[%s1695_s7 + $0xc] ss:$16 sps:$4 sm:$0xff]   ;;  %v325_v31 = vld [vmem:[%s1695_s7 + $0x1a0] sm:$0xff] }
  0x2d   : > { %691 = vmatpush1.bf16.msra.mxu0 %v1455_v34  ;;  %732 = vmatpush1.bf16.msra.mxu1 %v1456_v35  ;;  %v326_v32 = vld [vmem:[%s1695_s7 + $0x1a8] sm:$0xff]  ;;  %v1535_v33 = vld [vmem:[%s1695_s7] ss:$16 sps:$4 sm:$0xff]   ;;  %v1387_v35 = vcombine.high %v325_v31, %v325_v31 }
  0x2e   : > { %1328 = vmatprep.subr.msk.bf16.mxu0 %vm663_vm1, %v1325_v36  ;;  %1330 = vmatprep.subr.msk.bf16.mxu1 %vm663_vm1, %v1327_v37  ;;  %v1538_v34 = vld [vmem:[%s1695_s7 + $0x8] ss:$16 sps:$4 sm:$0xff]   ;;  %v1389_v36 = vcombine.high %v326_v32, %v326_v32  ;;  %v1386_v37 = vcombine.low %v325_v31, %v325_v31  ;;  %v1388_v38 = vcombine.low %v326_v32, %v326_v32 }
  0x30   : > { %v1038_v39 = vsel %vm663_vm1, %v1386_v37, 0 }
  0x31   : > { %697 = vmatpush2.bf16.msra.mxu0 %v665_v41  ;;  %738 = vmatpush2.bf16.msra.mxu1 %v671_v42  ;;  %v1547_v41 = vld [vmem:[%s1695_s7 + $0x184] ss:$16 sps:$4 sm:$0xff]   ;;  %v1550_v42 = vld [vmem:[%s1695_s7 + $0x18c] ss:$16 sps:$4 sm:$0xff]  }
  0x32   : > { %698 = vmatprep.subr.bf16.mxu0 %v1461_v40  ;;  %739 = vmatprep.subr.bf16.mxu1 %v1463_v43  ;;  %v1044_v40 = vsel %vm663_vm1, %v1388_v38, 0  ;;  %v1545_v43 = vld [vmem:[%s1695_s7 + $0x180] ss:$16 sps:$4 sm:$0xff]  }
  0x35   : > { %699 = vmatpush2.bf16.msra.mxu0 %v1465_v44  ;;  %740 = vmatpush2.bf16.msra.mxu1 %v1466_v45  ;;  %v1548_v44 = vld [vmem:[%s1695_s7 + $0x188] ss:$16 sps:$4 sm:$0xff]   ;;  %v1553_v45 = vld [vmem:[%s1695_s7 + $0x164] ss:$16 sps:$4 sm:$0xff]  }
  0x36   : > { %700 = vmatprep.subr.bf16.mxu0 %v1467_v46  ;;  %741 = vmatprep.subr.bf16.mxu1 %v1469_v47  ;;  %v1556_v46 = vld [vmem:[%s1695_s7 + $0x16c] ss:$16 sps:$4 sm:$0xff]   ;;  %v1551_v47 = vld [vmem:[%s1695_s7 + $0x160] ss:$16 sps:$4 sm:$0xff]  }
  0x39   : > { %701 = vmatpush2.bf16.msra.mxu0 %v1471_v48  ;;  %742 = vmatpush2.bf16.msra.mxu1 %v1472_v49  ;;  %v1554_v48 = vld [vmem:[%s1695_s7 + $0x168] ss:$16 sps:$4 sm:$0xff]   ;;  %v1559_v49 = vld [vmem:[%s1695_s7 + $0x144] ss:$16 sps:$4 sm:$0xff]  }
  0x3a   : > { %702 = vmatprep.subr.bf16.mxu0 %v1473_v50  ;;  %743 = vmatprep.subr.bf16.mxu1 %v1475_v51  ;;  %v1562_v50 = vld [vmem:[%s1695_s7 + $0x14c] ss:$16 sps:$4 sm:$0xff]   ;;  %v1557_v51 = vld [vmem:[%s1695_s7 + $0x140] ss:$16 sps:$4 sm:$0xff]  }
  0x3d   : > { %703 = vmatpush2.bf16.msra.mxu0 %v1477_v52  ;;  %744 = vmatpush2.bf16.msra.mxu1 %v1478_v53  ;;  %v1560_v52 = vld [vmem:[%s1695_s7 + $0x148] ss:$16 sps:$4 sm:$0xff]   ;;  %v1565_v53 = vld [vmem:[%s1695_s7 + $0x124] ss:$16 sps:$4 sm:$0xff]  }
  0x3e   : > { %704 = vmatprep.subr.bf16.mxu0 %v1479_v54  ;;  %745 = vmatprep.subr.bf16.mxu1 %v1481_v55  ;;  %v1568_v54 = vld [vmem:[%s1695_s7 + $0x12c] ss:$16 sps:$4 sm:$0xff]   ;;  %v1563_v55 = vld [vmem:[%s1695_s7 + $0x120] ss:$16 sps:$4 sm:$0xff]  }
  0x41   : > { %705 = vmatpush2.bf16.msra.mxu0 %v1483_v56  ;;  %746 = vmatpush2.bf16.msra.mxu1 %v1484_v57  ;;  %v1566_v56 = vld [vmem:[%s1695_s7 + $0x128] ss:$16 sps:$4 sm:$0xff]   ;;  %v1571_v57 = vld [vmem:[%s1695_s7 + $0x104] ss:$16 sps:$4 sm:$0xff]  }
  0x42   : > { %706 = vmatprep.subr.bf16.mxu0 %v1485_v58  ;;  %747 = vmatprep.subr.bf16.mxu1 %v1487_v59  ;;  %v1574_v58 = vld [vmem:[%s1695_s7 + $0x10c] ss:$16 sps:$4 sm:$0xff]   ;;  %v1569_v59 = vld [vmem:[%s1695_s7 + $0x100] ss:$16 sps:$4 sm:$0xff]  }
  0x45   : > { %707 = vmatpush2.bf16.msra.mxu0 %v1489_v60  ;;  %748 = vmatpush2.bf16.msra.mxu1 %v1490_v61  ;;  %v1572_v60 = vld [vmem:[%s1695_s7 + $0x108] ss:$16 sps:$4 sm:$0xff]   ;;  %v1332_v61 = vcombine.low %v1722_v2, %v1722_v2 }
  0x46   : > { %1049 = vmatprep.subr.bf16.mxu0 %v1495_v62  ;;  %1090 = vmatprep.subr.bf16.mxu1 %v1498_v63 }
  0x48   : > { %709 = vmatmul.mubr.bf16.vlgmr.msra.gmra.mxu0 %v1270_v1  ;;  %750 = vmatmul.mubr.bf16.vlgmr.msra.gmra.mxu1 %v1270_v1 }
  0x49   : > { %1050 = vmatpush1.bf16.msra.mxu0 %v1493_v3  ;;  %1091 = vmatpush1.bf16.msra.mxu1 %v1496_v4 }
  0x4a   : > { %1051 = vmatprep.subr.bf16.mxu0 %v1501_v5  ;;  %1092 = vmatprep.subr.bf16.mxu1 %v1504_v6 }
  0x4b   : > { %1391 = vmatprep.mubr.msk.bf16.mxu0 %vm659_vm0, %v1333_v0  ;;  %1393 = vmatprep.mubr.msk.bf16.mxu1 %vm659_vm0, %v1333_v0 }
  0x4d   : > { %1052 = vmatpush1.bf16.msra.mxu0 %v1499_v7  ;;  %1093 = vmatpush1.bf16.msra.mxu1 %v1502_v8 }
  0x4e   : > { %1053 = vmatprep.subr.bf16.mxu0 %v1507_v9  ;;  %1094 = vmatprep.subr.bf16.mxu1 %v1510_v10 }
  0x51   : > { %1054 = vmatpush1.bf16.msra.mxu0 %v1505_v11  ;;  %1095 = vmatpush1.bf16.msra.mxu1 %v1508_v12 }
  0x52   : > { %1055 = vmatprep.subr.bf16.mxu0 %v1513_v13  ;;  %1096 = vmatprep.subr.bf16.mxu1 %v1516_v14 }
  0x55   : > { %1056 = vmatpush1.bf16.msra.mxu0 %v1511_v15  ;;  %1097 = vmatpush1.bf16.msra.mxu1 %v1514_v16 }
  0x56   : > { %1057 = vmatprep.subr.bf16.mxu0 %v1519_v17  ;;  %1098 = vmatprep.subr.bf16.mxu1 %v1522_v18 }
  0x59   : > { %1058 = vmatpush1.bf16.msra.mxu0 %v1517_v19  ;;  %1099 = vmatpush1.bf16.msra.mxu1 %v1520_v20 }
  0x5a   : > { %1059 = vmatprep.subr.bf16.mxu0 %v1525_v21  ;;  %1100 = vmatprep.subr.bf16.mxu1 %v1528_v22  ;;  %v1131_v21 = vld [vmem:[%s1803_s4] sm:$0xff]  ;;  %v1587_v22 = vmov 0  }
  0x5b   : > { %1407 = vset.pattern.permute.xlu1 %v1587_v22  ;;  %1408 = vset.pattern.permute.xlu0 %v1587_v22 }
  0x5c   : > { %1162 = vperm.xlu1 %1407, %v1131_v21  }
  0x5d   : > { %1060 = vmatpush1.bf16.msra.mxu0 %v1523_v23  ;;  %1101 = vmatpush1.bf16.msra.mxu1 %v1526_v24  ;;  %v1132_v23 = vld [vmem:[%s1804_s5] sm:$0xff] }
  0x5e   : > { %1061 = vmatprep.subr.bf16.mxu0 %v1531_v25  ;;  %1102 = vmatprep.subr.bf16.mxu1 %v1534_v26 }
  0x60   : > { %1171 = vperm.xlu1 %1407, %v1132_v23  }
  0x61   : > { %1062 = vmatpush1.bf16.msra.mxu0 %v1529_v27  ;;  %1103 = vmatpush1.bf16.msra.mxu1 %v1532_v28 }
  0x62   : > { %1063 = vmatprep.subr.bf16.mxu0 %v1537_v29  ;;  %1104 = vmatprep.subr.bf16.mxu1 %v1540_v30 }
  0x65   : > { %1064 = vmatpush1.bf16.msra.mxu0 %v1535_v33  ;;  %1105 = vmatpush1.bf16.msra.mxu1 %v1538_v34 }
  0x66   : > { %1390 = vmatprep.subr.msk.bf16.mxu0 %vm663_vm1, %v1387_v35  ;;  %1392 = vmatprep.subr.msk.bf16.mxu1 %vm663_vm1, %v1389_v36 }
  0x69   : > { %1070 = vmatpush2.bf16.msra.mxu0 %v1038_v39  ;;  %1111 = vmatpush2.bf16.msra.mxu1 %v1044_v40 }
  0x6a   : > { %1071 = vmatprep.subr.bf16.mxu0 %v1547_v41  ;;  %1112 = vmatprep.subr.bf16.mxu1 %v1550_v42 }
  0x6d   : > { %1072 = vmatpush2.bf16.msra.mxu0 %v1545_v43  ;;  %1113 = vmatpush2.bf16.msra.mxu1 %v1548_v44 }
  0x6e   : > { %1073 = vmatprep.subr.bf16.mxu0 %v1553_v45  ;;  %1114 = vmatprep.subr.bf16.mxu1 %v1556_v46 }
  0x71   : > { %1074 = vmatpush2.bf16.msra.mxu0 %v1551_v47  ;;  %1115 = vmatpush2.bf16.msra.mxu1 %v1554_v48 }
  0x72   : > { %1075 = vmatprep.subr.bf16.mxu0 %v1559_v49  ;;  %1116 = vmatprep.subr.bf16.mxu1 %v1562_v50 }
  0x75   : > { %1076 = vmatpush2.bf16.msra.mxu0 %v1557_v51  ;;  %1117 = vmatpush2.bf16.msra.mxu1 %v1560_v52 }
  0x76   : > { %1077 = vmatprep.subr.bf16.mxu0 %v1565_v53  ;;  %1118 = vmatprep.subr.bf16.mxu1 %v1568_v54 }
  0x79   : > { %1078 = vmatpush2.bf16.msra.mxu0 %v1563_v55  ;;  %1119 = vmatpush2.bf16.msra.mxu1 %v1566_v56 }
  0x7a   : > { %1079 = vmatprep.subr.bf16.mxu0 %v1571_v57  ;;  %1120 = vmatprep.subr.bf16.mxu1 %v1574_v58 }
  0x7d   : > { %1080 = vmatpush2.bf16.msra.mxu0 %v1569_v59  ;;  %1121 = vmatpush2.bf16.msra.mxu1 %v1572_v60 }
  0x80   : > { %1082 = vmatmul.mubr.bf16.vlgmr.msra.gmra.mxu0 %v1332_v61  ;;  %1123 = vmatmul.mubr.bf16.vlgmr.msra.gmra.mxu1 %v1332_v61 }
  0xd7   : > { %v1163_v40 = vpop.permute.xlu1 %1162 }
  0xdb   : > { %v1172_v50 = vpop.permute.xlu1 %1171 }
 0x108   : > { %v710_v62 = vpop.f32.mrf.mxu0  ;;  %v751_v63 = vpop.f32.mrf.mxu1 }
 0x10a   : > { %v712_v1 = vpop.f32.mrf.mxu0  ;;  %v753_v3 = vpop.f32.mrf.mxu1 }
 0x10c   : > { %v714_v4 = vpop.f32.mrf.mxu0  ;;  %v755_v5 = vpop.f32.mrf.mxu1 }
 0x10e   : > { %v715_v6 = vpop.f32.mrf.mxu0  ;;  %v756_v0 = vpop.f32.mrf.mxu1 }
 0x140   : > { %v1083_v7 = vpop.f32.mrf.mxu0  ;;  %v1124_v8 = vpop.f32.mrf.mxu1 }
 0x141   : > { %v1084_v11 = vadd.f32 %v1083_v7, %v710_v62  ;;  %v1125_v14 = vadd.f32 %v1124_v8, %v751_v63 }
 0x142   : > { %v1085_v9 = vpop.f32.mrf.mxu0  ;;  %v1126_v10 = vpop.f32.mrf.mxu1 }
 0x143   : > { %v1086_v12 = vadd.f32 %v1085_v9, %v712_v1  ;;  %v1127_v18 = vadd.f32 %v1126_v10, %v753_v3 }
 0x144   : > { %v1087_v13 = vpop.f32.mrf.mxu0  ;;  %v1128_v2 = vpop.f32.mrf.mxu1 }
 0x145   : > { %v1133_v15 = vadd.f32 %v1086_v12, %v1084_v11 }
 0x146   : > { %v1088_v16 = vpop.f32.mrf.mxu0  ;;  %v1129_v17 = vpop.f32.mrf.mxu1 }
 0x147   : > { %v1134_v19 = vadd.f32 %v1133_v15, %v1125_v14 }
 0x149   : > { %v1135_v20 = vadd.f32 %v1134_v19, %v1127_v18 }
 0x14b   : > { %1136 = vadd.xlane.f32.xlu0 %v1135_v20 }
 0x1d4   : > { %v1137_v24 = vpop.xlane.xlu0 %1136 }
 0x1d5   : > { %v1139_v25 = vmul.f32 0.001953125, %v1137_v24 }
 0x1d7   : > { %v1140_v26 = vsub.f32 %v1084_v11, %v1139_v25  ;;  %v1141_v27 = vsub.f32 %v1086_v12, %v1139_v25  ;;  %v1142_v28 = vsub.f32 %v1125_v14, %v1139_v25  ;;  %v1143_v29 = vsub.f32 %v1127_v18, %v1139_v25 }
 0x1d9   : > { %v1144_v30 = vmul.f32 %v1140_v26, %v1140_v26  ;;  %v1145_v31 = vmul.f32 %v1141_v27, %v1141_v27  ;;  %v1146_v32 = vmul.f32 %v1142_v28, %v1142_v28  ;;  %v1147_v34 = vmul.f32 %v1143_v29, %v1143_v29 }
 0x1db   : > { %v1148_v33 = vadd.f32 %v1145_v31, %v1144_v30 }
 0x1dd   : > { %v1149_v35 = vadd.f32 %v1148_v33, %v1146_v32 }
 0x1df   : > { %v1150_v36 = vadd.f32 %v1149_v35, %v1147_v34 }
 0x1e1   : > { %1151 = vadd.xlane.f32.xlu0 %v1150_v36 }
 0x26a   : > { %v1152_v37 = vpop.xlane.xlu0 %1151 }
 0x26b   : > { %v1153_v38 = vmul.f32 0.001953125, %v1152_v37 }
 0x26d   : > { %v1154_v39 = vadd.f32 1e-05, %v1153_v38 }
 0x26f   : > { %1577 = vrsqrt.f32 %v1154_v39 }
 0x27c   : > { %v1578_v41 = vpop.eup %1577 }
 0x27d   : > { %v1156_v42 = vmul.f32 %v1578_v41, %v1140_v26  ;;  %v1157_v43 = vmul.f32 %v1578_v41, %v1141_v27  ;;  %v1158_v44 = vmul.f32 %v1578_v41, %v1142_v28  ;;  %v1159_v45 = vmul.f32 %v1578_v41, %v1143_v29 }
 0x27f   : > { %v1165_v46 = vmul.f32 %v1163_v40, %v1156_v42  ;;  %v1166_v47 = vmul.f32 %v1163_v40, %v1157_v43  ;;  %v1167_v48 = vmul.f32 %v1163_v40, %v1158_v44  ;;  %v1168_v49 = vmul.f32 %v1163_v40, %v1159_v45 }
 0x281   : > { %v1174_v51 = vadd.f32 %v1172_v50, %v1165_v46  ;;  %v1175_v52 = vadd.f32 %v1172_v50, %v1166_v47  ;;  %v1176_v53 = vadd.f32 %v1172_v50, %v1167_v48  ;;  %v1177_v54 = vadd.f32 %v1172_v50, %v1168_v49 }
 0x283   : > { %vm1178_vm2 = vcmp.gt.f32.partialorder %v1174_v51, 0.0  ;;  %vm1179_vm3 = vcmp.gt.f32.partialorder %v1175_v52, 0.0  ;;  %vm1180_vm4 = vcmp.gt.f32.partialorder %v1176_v53, 0.0  ;;  %vm1181_vm5 = vcmp.gt.f32.partialorder %v1177_v54, 0.0 }
 0x284   : > { %v1182_v55 = vmul.f32 0.01, %v1174_v51  ;;  %v1183_v56 = vmul.f32 0.01, %v1175_v52  ;;  %v1184_v57 = vmul.f32 0.01, %v1176_v53 }
 0x285   : > { %v1185_v58 = vmul.f32 0.01, %v1177_v54 }
 0x286   : > { %v1186_v59 = vsel %vm1178_vm2, %v1174_v51, %v1182_v55  ;;  %v1187_v60 = vsel %vm1179_vm3, %v1175_v52, %v1183_v56  ;;  %v1188_v61 = vsel %vm1180_vm4, %v1176_v53, %v1184_v57 }
 0x287   : > { %v1189_v62 = vsel %vm1181_vm5, %v1177_v54, %v1185_v58  ;;  %1190 = vst [vmem:[%s271_s17] sm:$0xff] %v1186_v59  ;;  %1191 = vst [vmem:[%s271_s17 + $0x8] sm:$0xff] %v1187_v60 }
 0x288   : > { %1192 = vst [vmem:[%s271_s17 + $0x10] sm:$0xff] %v1188_v61  ;;  %1193 = vst [vmem:[%s271_s17 + $0x18] sm:$0xff] %v1189_v62 }
 0x289 PF: > { %s16_s21 = sadd.s32 1, %s1585_s21  }
 0x28a   : > { %p13_p4 = scmp.ge.s32.totalorder %s16_s21, 5  }
 0x28c   :  { %15 = sbr.rel (!%p13_p4) target bundleno = 1 (0x1), region = 77 }

</bundles_post_ra>
